<compile_context>
chip_gen: v7x
topology: tpu7x:2x2x1
jax: 0.10.0
libtpu: 0.0.40
codegen_flags: <defaults>
</compile_context>

<pallas_src>
import jax
import jax.numpy as jnp
from jax.experimental import pallas as pl
from jax.experimental.pallas import tpu as pltpu


# ----------------------------------------------------------------------------
# Kernel 1: fused Conv2d(3x3, pad=1) + bias + ReLU + MaxPool(2x2, stride 2)
#
# Input is pre-padded and "phase split" along W:  x[:, h, phase*Cin + ci, j]
# holds padded column 2j (phase 0) / 2j+1 (phase 1).  For a pooled output row
# i the kernel loads padded rows 2i..2i+3, assembles the (9*Cin, W/2) patch
# matrix for each of the 4 pool-window positions (rows 2i,2i+1 x even/odd
# columns), matmuls against the (Cout, 9*Cin) weight, takes the 4-way max and
# applies bias+ReLU (valid after the max: bias is per-channel, ReLU monotone).
# Output layout: (N, H/2, Cout, W/2).
# ----------------------------------------------------------------------------
def _conv_pool_kernel(x_ref, w_ref, b_ref, o_ref):
    # x_ref: (1, H+2, 2*Cin, W/2+1)   phase-split zero-padded input
    # w_ref: (Cout, 9*Cin)            rows ordered (dx, dy, ci)
    # b_ref: (Cout, 1)
    # o_ref: (1, H/2, Cout, W/2)      pooled output, (N H C W) layout
    cin = x_ref.shape[2] // 2
    hp = o_ref.shape[1]
    wp = o_ref.shape[3]

    wmat = w_ref[...]                                   # (Cout, 9*Cin), resident
    bias = b_ref[...]                                   # (Cout, 1)

    def body(i, carry):
        # conv rows 2i, 2i+1 need padded rows 2i .. 2i+3
        win = x_ref[0, pl.ds(2 * i, 4), :, :]           # (4, 2*Cin, W/2+1)
        ev = win[:, 0:cin, :]                           # even padded columns E[j]
        od = win[:, cin:2 * cin, :]                     # odd padded columns  O[j]
        ev0 = ev[:, :, 0:wp]                            # E[j]
        ev1 = ev[:, :, 1:wp + 1]                        # E[j+1]
        od0 = od[:, :, 0:wp]                            # O[j]
        od1 = od[:, :, 1:wp + 1]                        # O[j+1]

        def conv_row(a0, a1, a2, r):
            # taps for dx=0,1,2 are a0, a1, a2; conv row offset r in {0,1}
            km = jnp.concatenate(
                [a0[r:r + 3].reshape(3 * cin, wp),
                 a1[r:r + 3].reshape(3 * cin, wp),
                 a2[r:r + 3].reshape(3 * cin, wp)], axis=0)      # (9*Cin, wp)
            if cin == 1:
                # conv1 (K=9): cheaper as 9 VPU outer products than a K=9 matmul
                acc = wmat[:, 0:1] * km[0:1, :]
                for t in range(1, 9):
                    acc = acc + wmat[:, t:t + 1] * km[t:t + 1, :]
                return acc
            return jnp.dot(wmat, km, preferred_element_type=jnp.float32)

        # 2x2 pool window: conv rows 2i (r=0), 2i+1 (r=1) x even/odd columns
        c_e0 = conv_row(ev0, od0, ev1, 0)
        c_o0 = conv_row(od0, ev1, od1, 0)
        c_e1 = conv_row(ev0, od0, ev1, 1)
        c_o1 = conv_row(od0, ev1, od1, 1)
        m = jnp.maximum(jnp.maximum(c_e0, c_o0), jnp.maximum(c_e1, c_o1))
        m = jnp.maximum(m + bias, 0.0)                  # bias + ReLU after max
        o_ref[0, i, :, :] = m.astype(o_ref.dtype)
        return carry

    jax.lax.fori_loop(0, hp, body, 0)


def conv3x3_relu_pool(xps, wm, b):
    N, hpad, c2, wh = xps.shape
    cin = c2 // 2
    h = hpad - 2
    wp = wh - 1
    hp = h // 2
    cout = wm.shape[0]
    return pl.pallas_call(
        _conv_pool_kernel,
        out_shape=jax.ShapeDtypeStruct((N, hp, cout, wp), jnp.float32),
        grid_spec=pltpu.PrefetchScalarGridSpec(
            num_scalar_prefetch=0,
            grid=(N,),
            in_specs=[
                pl.BlockSpec((1, hpad, c2, wh), lambda n: (n, 0, 0, 0)),
                pl.BlockSpec((cout, 9 * cin), lambda n: (0, 0)),
                pl.BlockSpec((cout, 1), lambda n: (0, 0)),
            ],
            out_specs=pl.BlockSpec((1, hp, cout, wp), lambda n: (n, 0, 0, 0)),
        ),
        compiler_params=pltpu.CompilerParams(
            dimension_semantics=("parallel",),
            vmem_limit_bytes=32 * 1024 * 1024,
        ),
    )(xps, wm, b)


# ----------------------------------------------------------------------------
# Kernel 2: FC1 partial matmul.  K split in half on a leading "parallel" axis
# (2 TensorCores on v7x each stream half of w_fc1), K-chunks on an "arbitrary"
# axis, accumulating into the resident f32 output block.  w_fc1 stays in its
# torch (56, K) layout and is contracted over axis 1 (no transpose in-jit).
# ----------------------------------------------------------------------------
def _fc1_partial_kernel(x_ref, w1_ref, o_ref):
    @pl.when(pl.program_id(1) == 0)
    def _():
        o_ref[...] = jnp.zeros_like(o_ref)

    o_ref[0, :, :] += jax.lax.dot_general(
        x_ref[...], w1_ref[...],
        dimension_numbers=(((1,), (1,)), ((), ())),
        preferred_element_type=jnp.float32)


def fc1_partial(x, w1, *, tk=7168):
    N, K = x.shape
    F = w1.shape[0]
    half = K // 2
    assert K % 2 == 0 and half % tk == 0, (K, tk)
    kc = half // tk
    return pl.pallas_call(
        _fc1_partial_kernel,
        out_shape=jax.ShapeDtypeStruct((2, N, F), jnp.float32),
        grid_spec=pltpu.PrefetchScalarGridSpec(
            num_scalar_prefetch=0,
            grid=(2, kc),
            in_specs=[
                pl.BlockSpec((N, tk), lambda c, k: (0, c * kc + k)),
                pl.BlockSpec((F, tk), lambda c, k: (0, c * kc + k)),
            ],
            out_specs=pl.BlockSpec((1, N, F), lambda c, k: (c, 0, 0)),
        ),
        compiler_params=pltpu.CompilerParams(
            dimension_semantics=("parallel", "arbitrary"),
            vmem_limit_bytes=32 * 1024 * 1024,
        ),
    )(x, w1)


# ----------------------------------------------------------------------------
# Kernel 3: FC-head finalize: sum the two K-halves, +b1, ReLU, tiny classifier.
# ----------------------------------------------------------------------------
def _fc_finalize_kernel(p_ref, b1_ref, w2_ref, b2_ref, o_ref):
    h = jnp.maximum(p_ref[0] + p_ref[1] + b1_ref[...], 0.0)          # (N, 56)
    y = jax.lax.dot_general(
        h, w2_ref[...],
        dimension_numbers=(((1,), (1,)), ((), ())),
        preferred_element_type=jnp.float32)                          # (N, 4)
    o_ref[...] = y + b2_ref[...]


def fc_finalize(partial, b1, w2, b2):
    _, N, F = partial.shape
    out_dim = w2.shape[0]
    return pl.pallas_call(
        _fc_finalize_kernel,
        out_shape=jax.ShapeDtypeStruct((N, out_dim), jnp.float32),
        grid_spec=pltpu.PrefetchScalarGridSpec(
            num_scalar_prefetch=0,
            grid=(1,),
            in_specs=[
                pl.BlockSpec((2, N, F), lambda i: (0, 0, 0)),
                pl.BlockSpec((1, F), lambda i: (0, 0)),
                pl.BlockSpec((out_dim, F), lambda i: (0, 0)),
                pl.BlockSpec((1, out_dim), lambda i: (0, 0)),
            ],
            out_specs=pl.BlockSpec((N, out_dim), lambda i: (0, 0)),
        ),
    )(partial, b1, w2, b2)


# ----------------------------------------------------------------------------
# JAX glue (cheap data movement) + parameter setup
# ----------------------------------------------------------------------------
def prep_conv_input(x_nhcw):
    """(N, H, C, W) -> (N, H+2, 2*C, W//2+1): zero-pad H/W by 1 and split the
    padded W axis into even/odd column planes (phase-major, then channel)."""
    N, H, C, W = x_nhcw.shape
    xp = jnp.pad(x_nhcw, ((0, 0), (1, 1), (0, 0), (1, 1)))
    xs = jnp.stack([xp[:, :, :, 0::2], xp[:, :, :, 1::2]], axis=2)
    return xs.reshape(N, H + 2, 2 * C, W // 2 + 1)


def init_params(key):
    # Deterministic torch-default-style uniform(-1/sqrt(fan_in), 1/sqrt(fan_in)),
    # in native PyTorch layouts.
    ks = jax.random.split(key, 8)

    def u(k, shape, fan_in):
        bound = 1.0 / float(fan_in) ** 0.5
        return jax.random.uniform(k, shape, jnp.float32, -bound, bound)

    return {
        "w_conv1": u(ks[0], (32, 1, 3, 3), 1 * 9),
        "b_conv1": u(ks[1], (32,), 1 * 9),
        "w_conv2": u(ks[2], (32, 32, 3, 3), 32 * 9),
        "b_conv2": u(ks[3], (32,), 32 * 9),
        "w_fc1":   u(ks[4], (56, 32 * 56 * 56), 32 * 56 * 56),  # torch (out, in)
        "b_fc1":   u(ks[5], (56,), 32 * 56 * 56),
        "w_fc2":   u(ks[6], (4, 56), 56),
        "b_fc2":   u(ks[7], (4,), 56),
    }


def prepare_params(p):
    """One-time (outside jit) conversion of torch-layout params to kernel layouts."""
    def conv_w(w):
        # (Cout, Cin, 3, 3) -> (Cout, 9*Cin), column order (dx, dy, ci) to match
        # the in-kernel patch-matrix row order.
        cout = w.shape[0]
        return jnp.transpose(w, (0, 3, 2, 1)).reshape(cout, -1)

    f, k = p["w_fc1"].shape
    # Reorder w_fc1 columns from torch's (C, H, W) flatten to the kernel's
    # (H, C, W) flatten order, so the forward pass needs no activation transpose.
    w1 = p["w_fc1"].reshape(f, 32, 56, 56).transpose(0, 2, 1, 3).reshape(f, k)
    return {
        "wm1": conv_w(p["w_conv1"]), "b1": p["b_conv1"].reshape(-1, 1),
        "wm2": conv_w(p["w_conv2"]), "b2": p["b_conv2"].reshape(-1, 1),
        "w_fc1": w1, "b_fc1": p["b_fc1"].reshape(1, -1),
        "w_fc2": p["w_fc2"], "b_fc2": p["b_fc2"].reshape(1, -1),
    }


@jax.jit
def cnn_forward(x, params):
    # x: (N, 1, 224, 224) float32, NCHW like PyTorch.
    N = x.shape[0]

    # conv1 (1->32, 3x3, pad 1) + ReLU + 2x2 max-pool, fused
    x_nhcw = jnp.transpose(x, (0, 2, 1, 3))                     # (N, 224, 1, 224)
    p1 = conv3x3_relu_pool(prep_conv_input(x_nhcw),
                           params["wm1"], params["b1"])         # (N, 112, 32, 112)

    # conv2 (32->32, 3x3, pad 1) + ReLU + 2x2 max-pool, fused
    p2 = conv3x3_relu_pool(prep_conv_input(p1),
                           params["wm2"], params["b2"])         # (N, 56, 32, 56)

    # flatten; the (C,H,W) order of nn.Flatten is pre-folded into w_fc1 columns
    flat = p2.reshape(N, 56 * 32 * 56)                          # (N, 100352)

    # FC head: Linear(100352,56) + ReLU + Linear(56,4)
    partial = fc1_partial(flat, params["w_fc1"])                # (2, N, 56)
    return fc_finalize(partial, params["b_fc1"],
                       params["w_fc2"], params["b_fc2"])        # (N, 4)


if __name__ == "__main__":
    key = jax.random.PRNGKey(0)
    k_x, k_p = jax.random.split(key)
    # 224x224 spatial size is forced by Linear(in_features=32*56*56); batch=2.
    x = jax.random.normal(k_x, (2, 1, 224, 224), dtype=jnp.float32)
    params = prepare_params(init_params(k_p))

    out = cnn_forward(x, params)
    out = jax.block_until_ready(out)
    assert out.shape == (2, 4) and out.dtype == jnp.float32
    print("KERNEL_OK")
</pallas_src>

<mosaic_0001>
module attributes {stable_mosaic.version = 11 : i64} {
  func.func @_conv_pool_kernel(%arg0: i32, %arg1: memref<1x226x2x113xf32, #tpu.memory_space<vmem>>, %arg2: memref<32x9xf32, #tpu.memory_space<vmem>>, %arg3: memref<32x1xf32, #tpu.memory_space<vmem>>, %arg4: memref<1x112x32x112xf32, #tpu.memory_space<vmem>>) attributes {dimension_semantics = [#tpu.dimension_semantics<parallel>], iteration_bounds = array<i64: 2>, scalar_prefetch = 0 : i64, scratch_operands = 0 : i64, tpu.core_type = #tpu.core_type<tc>, window_params = [{transform_indices = @transform_0, window_bounds = array<i64: 1, 226, 2, 113>}, {pipeline_mode = #tpu.pipeline_mode<synchronous>, transform_indices = @transform_1, window_bounds = array<i64: 32, 9>}, {pipeline_mode = #tpu.pipeline_mode<synchronous>, transform_indices = @transform_2, window_bounds = array<i64: 32, 1>}, {transform_indices = @transform_3, window_bounds = array<i64: 1, 112, 32, 112>}]} {
    %c0 = arith.constant 0 : index
    %c0_0 = arith.constant 0 : index
    %0 = vector.load %arg2[%c0, %c0_0] : memref<32x9xf32, #tpu.memory_space<vmem>>, vector<32x9xf32>
    %c0_1 = arith.constant 0 : index
    %c0_2 = arith.constant 0 : index
    %1 = vector.load %arg3[%c0_1, %c0_2] : memref<32x1xf32, #tpu.memory_space<vmem>>, vector<32x1xf32>
    %c0_i32 = arith.constant 0 : i32
    %c112_i32 = arith.constant 112 : i32
    %2 = arith.addi %c0_i32, %c112_i32 : i32
    %c1_i32 = arith.constant 1 : i32
    scf.for %arg5 = %c0_i32 to %2 step %c1_i32  : i32 {
      %c2_i32 = arith.constant 2 : i32
      %3 = arith.muli %c2_i32, %arg5 : i32
      %c0_4 = arith.constant 0 : index
      %4 = arith.index_cast %3 : i32 to index
      %c0_5 = arith.constant 0 : index
      %c0_6 = arith.constant 0 : index
      %5 = vector.load %arg1[%c0_4, %4, %c0_5, %c0_6] : memref<1x226x2x113xf32, #tpu.memory_space<vmem>>, vector<1x4x2x113xf32>
      %6 = vector.shape_cast %5 : vector<1x4x2x113xf32> to vector<4x2x113xf32>
      %7 = vector.extract_strided_slice %6 {offsets = [0, 0, 0], sizes = [4, 1, 113], strides = [1, 1, 1]} : vector<4x2x113xf32> to vector<4x1x113xf32>
      %8 = vector.extract_strided_slice %6 {offsets = [0, 1, 0], sizes = [4, 1, 113], strides = [1, 1, 1]} : vector<4x2x113xf32> to vector<4x1x113xf32>
      %9 = vector.extract_strided_slice %7 {offsets = [0, 0, 0], sizes = [4, 1, 112], strides = [1, 1, 1]} : vector<4x1x113xf32> to vector<4x1x112xf32>
      %10 = vector.extract_strided_slice %7 {offsets = [0, 0, 1], sizes = [4, 1, 112], strides = [1, 1, 1]} : vector<4x1x113xf32> to vector<4x1x112xf32>
      %11 = vector.extract_strided_slice %8 {offsets = [0, 0, 0], sizes = [4, 1, 112], strides = [1, 1, 1]} : vector<4x1x113xf32> to vector<4x1x112xf32>
      %12 = vector.extract_strided_slice %8 {offsets = [0, 0, 1], sizes = [4, 1, 112], strides = [1, 1, 1]} : vector<4x1x113xf32> to vector<4x1x112xf32>
      %13 = vector.extract_strided_slice %9 {offsets = [0, 0, 0], sizes = [3, 1, 112], strides = [1, 1, 1]} : vector<4x1x112xf32> to vector<3x1x112xf32>
      %14 = vector.shape_cast %13 : vector<3x1x112xf32> to vector<3x112xf32>
      %15 = vector.extract_strided_slice %11 {offsets = [0, 0, 0], sizes = [3, 1, 112], strides = [1, 1, 1]} : vector<4x1x112xf32> to vector<3x1x112xf32>
      %16 = vector.shape_cast %15 : vector<3x1x112xf32> to vector<3x112xf32>
      %17 = vector.extract_strided_slice %10 {offsets = [0, 0, 0], sizes = [3, 1, 112], strides = [1, 1, 1]} : vector<4x1x112xf32> to vector<3x1x112xf32>
      %18 = vector.shape_cast %17 : vector<3x1x112xf32> to vector<3x112xf32>
      %19 = tpu.concatenate %14, %16, %18 in 0 : vector<3x112xf32>, vector<3x112xf32>, vector<3x112xf32> -> vector<9x112xf32>
      %20 = vector.extract_strided_slice %0 {offsets = [0, 0], sizes = [32, 1], strides = [1, 1]} : vector<32x9xf32> to vector<32x1xf32>
      %21 = vector.extract_strided_slice %19 {offsets = [0, 0], sizes = [1, 112], strides = [1, 1]} : vector<9x112xf32> to vector<1x112xf32>
      %22 = vector.broadcast %20 : vector<32x1xf32> to vector<32x112xf32>
      %23 = vector.broadcast %21 : vector<1x112xf32> to vector<32x112xf32>
      %24 = arith.mulf %22, %23 : vector<32x112xf32>
      %25 = vector.extract_strided_slice %0 {offsets = [0, 1], sizes = [32, 1], strides = [1, 1]} : vector<32x9xf32> to vector<32x1xf32>
      %26 = vector.extract_strided_slice %19 {offsets = [1, 0], sizes = [1, 112], strides = [1, 1]} : vector<9x112xf32> to vector<1x112xf32>
      %27 = vector.broadcast %25 : vector<32x1xf32> to vector<32x112xf32>
      %28 = vector.broadcast %26 : vector<1x112xf32> to vector<32x112xf32>
      %29 = arith.mulf %27, %28 : vector<32x112xf32>
      %30 = arith.addf %24, %29 : vector<32x112xf32>
      %31 = vector.extract_strided_slice %0 {offsets = [0, 2], sizes = [32, 1], strides = [1, 1]} : vector<32x9xf32> to vector<32x1xf32>
      %32 = vector.extract_strided_slice %19 {offsets = [2, 0], sizes = [1, 112], strides = [1, 1]} : vector<9x112xf32> to vector<1x112xf32>
      %33 = vector.broadcast %31 : vector<32x1xf32> to vector<32x112xf32>
      %34 = vector.broadcast %32 : vector<1x112xf32> to vector<32x112xf32>
      %35 = arith.mulf %33, %34 : vector<32x112xf32>
      %36 = arith.addf %30, %35 : vector<32x112xf32>
      %37 = vector.extract_strided_slice %0 {offsets = [0, 3], sizes = [32, 1], strides = [1, 1]} : vector<32x9xf32> to vector<32x1xf32>
      %38 = vector.extract_strided_slice %19 {offsets = [3, 0], sizes = [1, 112], strides = [1, 1]} : vector<9x112xf32> to vector<1x112xf32>
      %39 = vector.broadcast %37 : vector<32x1xf32> to vector<32x112xf32>
      %40 = vector.broadcast %38 : vector<1x112xf32> to vector<32x112xf32>
      %41 = arith.mulf %39, %40 : vector<32x112xf32>
      %42 = arith.addf %36, %41 : vector<32x112xf32>
      %43 = vector.extract_strided_slice %0 {offsets = [0, 4], sizes = [32, 1], strides = [1, 1]} : vector<32x9xf32> to vector<32x1xf32>
      %44 = vector.extract_strided_slice %19 {offsets = [4, 0], sizes = [1, 112], strides = [1, 1]} : vector<9x112xf32> to vector<1x112xf32>
      %45 = vector.broadcast %43 : vector<32x1xf32> to vector<32x112xf32>
      %46 = vector.broadcast %44 : vector<1x112xf32> to vector<32x112xf32>
      %47 = arith.mulf %45, %46 : vector<32x112xf32>
      %48 = arith.addf %42, %47 : vector<32x112xf32>
      %49 = vector.extract_strided_slice %0 {offsets = [0, 5], sizes = [32, 1], strides = [1, 1]} : vector<32x9xf32> to vector<32x1xf32>
      %50 = vector.extract_strided_slice %19 {offsets = [5, 0], sizes = [1, 112], strides = [1, 1]} : vector<9x112xf32> to vector<1x112xf32>
      %51 = vector.broadcast %49 : vector<32x1xf32> to vector<32x112xf32>
      %52 = vector.broadcast %50 : vector<1x112xf32> to vector<32x112xf32>
      %53 = arith.mulf %51, %52 : vector<32x112xf32>
      %54 = arith.addf %48, %53 : vector<32x112xf32>
      %55 = vector.extract_strided_slice %0 {offsets = [0, 6], sizes = [32, 1], strides = [1, 1]} : vector<32x9xf32> to vector<32x1xf32>
      %56 = vector.extract_strided_slice %19 {offsets = [6, 0], sizes = [1, 112], strides = [1, 1]} : vector<9x112xf32> to vector<1x112xf32>
      %57 = vector.broadcast %55 : vector<32x1xf32> to vector<32x112xf32>
      %58 = vector.broadcast %56 : vector<1x112xf32> to vector<32x112xf32>
      %59 = arith.mulf %57, %58 : vector<32x112xf32>
      %60 = arith.addf %54, %59 : vector<32x112xf32>
      %61 = vector.extract_strided_slice %0 {offsets = [0, 7], sizes = [32, 1], strides = [1, 1]} : vector<32x9xf32> to vector<32x1xf32>
      %62 = vector.extract_strided_slice %19 {offsets = [7, 0], sizes = [1, 112], strides = [1, 1]} : vector<9x112xf32> to vector<1x112xf32>
      %63 = vector.broadcast %61 : vector<32x1xf32> to vector<32x112xf32>
      %64 = vector.broadcast %62 : vector<1x112xf32> to vector<32x112xf32>
      %65 = arith.mulf %63, %64 : vector<32x112xf32>
      %66 = arith.addf %60, %65 : vector<32x112xf32>
      %67 = vector.extract_strided_slice %0 {offsets = [0, 8], sizes = [32, 1], strides = [1, 1]} : vector<32x9xf32> to vector<32x1xf32>
      %68 = vector.extract_strided_slice %19 {offsets = [8, 0], sizes = [1, 112], strides = [1, 1]} : vector<9x112xf32> to vector<1x112xf32>
      %69 = vector.broadcast %67 : vector<32x1xf32> to vector<32x112xf32>
      %70 = vector.broadcast %68 : vector<1x112xf32> to vector<32x112xf32>
      %71 = arith.mulf %69, %70 : vector<32x112xf32>
      %72 = arith.addf %66, %71 : vector<32x112xf32>
      %73 = vector.extract_strided_slice %11 {offsets = [0, 0, 0], sizes = [3, 1, 112], strides = [1, 1, 1]} : vector<4x1x112xf32> to vector<3x1x112xf32>
      %74 = vector.shape_cast %73 : vector<3x1x112xf32> to vector<3x112xf32>
      %75 = vector.extract_strided_slice %10 {offsets = [0, 0, 0], sizes = [3, 1, 112], strides = [1, 1, 1]} : vector<4x1x112xf32> to vector<3x1x112xf32>
      %76 = vector.shape_cast %75 : vector<3x1x112xf32> to vector<3x112xf32>
      %77 = vector.extract_strided_slice %12 {offsets = [0, 0, 0], sizes = [3, 1, 112], strides = [1, 1, 1]} : vector<4x1x112xf32> to vector<3x1x112xf32>
      %78 = vector.shape_cast %77 : vector<3x1x112xf32> to vector<3x112xf32>
      %79 = tpu.concatenate %74, %76, %78 in 0 : vector<3x112xf32>, vector<3x112xf32>, vector<3x112xf32> -> vector<9x112xf32>
      %80 = vector.extract_strided_slice %0 {offsets = [0, 0], sizes = [32, 1], strides = [1, 1]} : vector<32x9xf32> to vector<32x1xf32>
      %81 = vector.extract_strided_slice %79 {offsets = [0, 0], sizes = [1, 112], strides = [1, 1]} : vector<9x112xf32> to vector<1x112xf32>
      %82 = vector.broadcast %80 : vector<32x1xf32> to vector<32x112xf32>
      %83 = vector.broadcast %81 : vector<1x112xf32> to vector<32x112xf32>
      %84 = arith.mulf %82, %83 : vector<32x112xf32>
      %85 = vector.extract_strided_slice %0 {offsets = [0, 1], sizes = [32, 1], strides = [1, 1]} : vector<32x9xf32> to vector<32x1xf32>
      %86 = vector.extract_strided_slice %79 {offsets = [1, 0], sizes = [1, 112], strides = [1, 1]} : vector<9x112xf32> to vector<1x112xf32>
      %87 = vector.broadcast %85 : vector<32x1xf32> to vector<32x112xf32>
      %88 = vector.broadcast %86 : vector<1x112xf32> to vector<32x112xf32>
      %89 = arith.mulf %87, %88 : vector<32x112xf32>
      %90 = arith.addf %84, %89 : vector<32x112xf32>
      %91 = vector.extract_strided_slice %0 {offsets = [0, 2], sizes = [32, 1], strides = [1, 1]} : vector<32x9xf32> to vector<32x1xf32>
      %92 = vector.extract_strided_slice %79 {offsets = [2, 0], sizes = [1, 112], strides = [1, 1]} : vector<9x112xf32> to vector<1x112xf32>
      %93 = vector.broadcast %91 : vector<32x1xf32> to vector<32x112xf32>
      %94 = vector.broadcast %92 : vector<1x112xf32> to vector<32x112xf32>
      %95 = arith.mulf %93, %94 : vector<32x112xf32>
      %96 = arith.addf %90, %95 : vector<32x112xf32>
      %97 = vector.extract_strided_slice %0 {offsets = [0, 3], sizes = [32, 1], strides = [1, 1]} : vector<32x9xf32> to vector<32x1xf32>
      %98 = vector.extract_strided_slice %79 {offsets = [3, 0], sizes = [1, 112], strides = [1, 1]} : vector<9x112xf32> to vector<1x112xf32>
      %99 = vector.broadcast %97 : vector<32x1xf32> to vector<32x112xf32>
      %100 = vector.broadcast %98 : vector<1x112xf32> to vector<32x112xf32>
      %101 = arith.mulf %99, %100 : vector<32x112xf32>
      %102 = arith.addf %96, %101 : vector<32x112xf32>
      %103 = vector.extract_strided_slice %0 {offsets = [0, 4], sizes = [32, 1], strides = [1, 1]} : vector<32x9xf32> to vector<32x1xf32>
      %104 = vector.extract_strided_slice %79 {offsets = [4, 0], sizes = [1, 112], strides = [1, 1]} : vector<9x112xf32> to vector<1x112xf32>
      %105 = vector.broadcast %103 : vector<32x1xf32> to vector<32x112xf32>
      %106 = vector.broadcast %104 : vector<1x112xf32> to vector<32x112xf32>
      %107 = arith.mulf %105, %106 : vector<32x112xf32>
      %108 = arith.addf %102, %107 : vector<32x112xf32>
      %109 = vector.extract_strided_slice %0 {offsets = [0, 5], sizes = [32, 1], strides = [1, 1]} : vector<32x9xf32> to vector<32x1xf32>
      %110 = vector.extract_strided_slice %79 {offsets = [5, 0], sizes = [1, 112], strides = [1, 1]} : vector<9x112xf32> to vector<1x112xf32>
      %111 = vector.broadcast %109 : vector<32x1xf32> to vector<32x112xf32>
      %112 = vector.broadcast %110 : vector<1x112xf32> to vector<32x112xf32>
      %113 = arith.mulf %111, %112 : vector<32x112xf32>
      %114 = arith.addf %108, %113 : vector<32x112xf32>
      %115 = vector.extract_strided_slice %0 {offsets = [0, 6], sizes = [32, 1], strides = [1, 1]} : vector<32x9xf32> to vector<32x1xf32>
      %116 = vector.extract_strided_slice %79 {offsets = [6, 0], sizes = [1, 112], strides = [1, 1]} : vector<9x112xf32> to vector<1x112xf32>
      %117 = vector.broadcast %115 : vector<32x1xf32> to vector<32x112xf32>
      %118 = vector.broadcast %116 : vector<1x112xf32> to vector<32x112xf32>
      %119 = arith.mulf %117, %118 : vector<32x112xf32>
      %120 = arith.addf %114, %119 : vector<32x112xf32>
      %121 = vector.extract_strided_slice %0 {offsets = [0, 7], sizes = [32, 1], strides = [1, 1]} : vector<32x9xf32> to vector<32x1xf32>
      %122 = vector.extract_strided_slice %79 {offsets = [7, 0], sizes = [1, 112], strides = [1, 1]} : vector<9x112xf32> to vector<1x112xf32>
      %123 = vector.broadcast %121 : vector<32x1xf32> to vector<32x112xf32>
      %124 = vector.broadcast %122 : vector<1x112xf32> to vector<32x112xf32>
      %125 = arith.mulf %123, %124 : vector<32x112xf32>
      %126 = arith.addf %120, %125 : vector<32x112xf32>
      %127 = vector.extract_strided_slice %0 {offsets = [0, 8], sizes = [32, 1], strides = [1, 1]} : vector<32x9xf32> to vector<32x1xf32>
      %128 = vector.extract_strided_slice %79 {offsets = [8, 0], sizes = [1, 112], strides = [1, 1]} : vector<9x112xf32> to vector<1x112xf32>
      %129 = vector.broadcast %127 : vector<32x1xf32> to vector<32x112xf32>
      %130 = vector.broadcast %128 : vector<1x112xf32> to vector<32x112xf32>
      %131 = arith.mulf %129, %130 : vector<32x112xf32>
      %132 = arith.addf %126, %131 : vector<32x112xf32>
      %133 = vector.extract_strided_slice %9 {offsets = [1, 0, 0], sizes = [3, 1, 112], strides = [1, 1, 1]} : vector<4x1x112xf32> to vector<3x1x112xf32>
      %134 = vector.shape_cast %133 : vector<3x1x112xf32> to vector<3x112xf32>
      %135 = vector.extract_strided_slice %11 {offsets = [1, 0, 0], sizes = [3, 1, 112], strides = [1, 1, 1]} : vector<4x1x112xf32> to vector<3x1x112xf32>
      %136 = vector.shape_cast %135 : vector<3x1x112xf32> to vector<3x112xf32>
      %137 = vector.extract_strided_slice %10 {offsets = [1, 0, 0], sizes = [3, 1, 112], strides = [1, 1, 1]} : vector<4x1x112xf32> to vector<3x1x112xf32>
      %138 = vector.shape_cast %137 : vector<3x1x112xf32> to vector<3x112xf32>
      %139 = tpu.concatenate %134, %136, %138 in 0 : vector<3x112xf32>, vector<3x112xf32>, vector<3x112xf32> -> vector<9x112xf32>
      %140 = vector.extract_strided_slice %0 {offsets = [0, 0], sizes = [32, 1], strides = [1, 1]} : vector<32x9xf32> to vector<32x1xf32>
      %141 = vector.extract_strided_slice %139 {offsets = [0, 0], sizes = [1, 112], strides = [1, 1]} : vector<9x112xf32> to vector<1x112xf32>
      %142 = vector.broadcast %140 : vector<32x1xf32> to vector<32x112xf32>
      %143 = vector.broadcast %141 : vector<1x112xf32> to vector<32x112xf32>
      %144 = arith.mulf %142, %143 : vector<32x112xf32>
      %145 = vector.extract_strided_slice %0 {offsets = [0, 1], sizes = [32, 1], strides = [1, 1]} : vector<32x9xf32> to vector<32x1xf32>
      %146 = vector.extract_strided_slice %139 {offsets = [1, 0], sizes = [1, 112], strides = [1, 1]} : vector<9x112xf32> to vector<1x112xf32>
      %147 = vector.broadcast %145 : vector<32x1xf32> to vector<32x112xf32>
      %148 = vector.broadcast %146 : vector<1x112xf32> to vector<32x112xf32>
      %149 = arith.mulf %147, %148 : vector<32x112xf32>
      %150 = arith.addf %144, %149 : vector<32x112xf32>
      %151 = vector.extract_strided_slice %0 {offsets = [0, 2], sizes = [32, 1], strides = [1, 1]} : vector<32x9xf32> to vector<32x1xf32>
      %152 = vector.extract_strided_slice %139 {offsets = [2, 0], sizes = [1, 112], strides = [1, 1]} : vector<9x112xf32> to vector<1x112xf32>
      %153 = vector.broadcast %151 : vector<32x1xf32> to vector<32x112xf32>
      %154 = vector.broadcast %152 : vector<1x112xf32> to vector<32x112xf32>
      %155 = arith.mulf %153, %154 : vector<32x112xf32>
      %156 = arith.addf %150, %155 : vector<32x112xf32>
      %157 = vector.extract_strided_slice %0 {offsets = [0, 3], sizes = [32, 1], strides = [1, 1]} : vector<32x9xf32> to vector<32x1xf32>
      %158 = vector.extract_strided_slice %139 {offsets = [3, 0], sizes = [1, 112], strides = [1, 1]} : vector<9x112xf32> to vector<1x112xf32>
      %159 = vector.broadcast %157 : vector<32x1xf32> to vector<32x112xf32>
      %160 = vector.broadcast %158 : vector<1x112xf32> to vector<32x112xf32>
      %161 = arith.mulf %159, %160 : vector<32x112xf32>
      %162 = arith.addf %156, %161 : vector<32x112xf32>
      %163 = vector.extract_strided_slice %0 {offsets = [0, 4], sizes = [32, 1], strides = [1, 1]} : vector<32x9xf32> to vector<32x1xf32>
      %164 = vector.extract_strided_slice %139 {offsets = [4, 0], sizes = [1, 112], strides = [1, 1]} : vector<9x112xf32> to vector<1x112xf32>
      %165 = vector.broadcast %163 : vector<32x1xf32> to vector<32x112xf32>
      %166 = vector.broadcast %164 : vector<1x112xf32> to vector<32x112xf32>
      %167 = arith.mulf %165, %166 : vector<32x112xf32>
      %168 = arith.addf %162, %167 : vector<32x112xf32>
      %169 = vector.extract_strided_slice %0 {offsets = [0, 5], sizes = [32, 1], strides = [1, 1]} : vector<32x9xf32> to vector<32x1xf32>
      %170 = vector.extract_strided_slice %139 {offsets = [5, 0], sizes = [1, 112], strides = [1, 1]} : vector<9x112xf32> to vector<1x112xf32>
      %171 = vector.broadcast %169 : vector<32x1xf32> to vector<32x112xf32>
      %172 = vector.broadcast %170 : vector<1x112xf32> to vector<32x112xf32>
      %173 = arith.mulf %171, %172 : vector<32x112xf32>
      %174 = arith.addf %168, %173 : vector<32x112xf32>
      %175 = vector.extract_strided_slice %0 {offsets = [0, 6], sizes = [32, 1], strides = [1, 1]} : vector<32x9xf32> to vector<32x1xf32>
      %176 = vector.extract_strided_slice %139 {offsets = [6, 0], sizes = [1, 112], strides = [1, 1]} : vector<9x112xf32> to vector<1x112xf32>
      %177 = vector.broadcast %175 : vector<32x1xf32> to vector<32x112xf32>
      %178 = vector.broadcast %176 : vector<1x112xf32> to vector<32x112xf32>
      %179 = arith.mulf %177, %178 : vector<32x112xf32>
      %180 = arith.addf %174, %179 : vector<32x112xf32>
      %181 = vector.extract_strided_slice %0 {offsets = [0, 7], sizes = [32, 1], strides = [1, 1]} : vector<32x9xf32> to vector<32x1xf32>
      %182 = vector.extract_strided_slice %139 {offsets = [7, 0], sizes = [1, 112], strides = [1, 1]} : vector<9x112xf32> to vector<1x112xf32>
      %183 = vector.broadcast %181 : vector<32x1xf32> to vector<32x112xf32>
      %184 = vector.broadcast %182 : vector<1x112xf32> to vector<32x112xf32>
      %185 = arith.mulf %183, %184 : vector<32x112xf32>
      %186 = arith.addf %180, %185 : vector<32x112xf32>
      %187 = vector.extract_strided_slice %0 {offsets = [0, 8], sizes = [32, 1], strides = [1, 1]} : vector<32x9xf32> to vector<32x1xf32>
      %188 = vector.extract_strided_slice %139 {offsets = [8, 0], sizes = [1, 112], strides = [1, 1]} : vector<9x112xf32> to vector<1x112xf32>
      %189 = vector.broadcast %187 : vector<32x1xf32> to vector<32x112xf32>
      %190 = vector.broadcast %188 : vector<1x112xf32> to vector<32x112xf32>
      %191 = arith.mulf %189, %190 : vector<32x112xf32>
      %192 = arith.addf %186, %191 : vector<32x112xf32>
      %193 = vector.extract_strided_slice %11 {offsets = [1, 0, 0], sizes = [3, 1, 112], strides = [1, 1, 1]} : vector<4x1x112xf32> to vector<3x1x112xf32>
      %194 = vector.shape_cast %193 : vector<3x1x112xf32> to vector<3x112xf32>
      %195 = vector.extract_strided_slice %10 {offsets = [1, 0, 0], sizes = [3, 1, 112], strides = [1, 1, 1]} : vector<4x1x112xf32> to vector<3x1x112xf32>
      %196 = vector.shape_cast %195 : vector<3x1x112xf32> to vector<3x112xf32>
      %197 = vector.extract_strided_slice %12 {offsets = [1, 0, 0], sizes = [3, 1, 112], strides = [1, 1, 1]} : vector<4x1x112xf32> to vector<3x1x112xf32>
      %198 = vector.shape_cast %197 : vector<3x1x112xf32> to vector<3x112xf32>
      %199 = tpu.concatenate %194, %196, %198 in 0 : vector<3x112xf32>, vector<3x112xf32>, vector<3x112xf32> -> vector<9x112xf32>
      %200 = vector.extract_strided_slice %0 {offsets = [0, 0], sizes = [32, 1], strides = [1, 1]} : vector<32x9xf32> to vector<32x1xf32>
      %201 = vector.extract_strided_slice %199 {offsets = [0, 0], sizes = [1, 112], strides = [1, 1]} : vector<9x112xf32> to vector<1x112xf32>
      %202 = vector.broadcast %200 : vector<32x1xf32> to vector<32x112xf32>
      %203 = vector.broadcast %201 : vector<1x112xf32> to vector<32x112xf32>
      %204 = arith.mulf %202, %203 : vector<32x112xf32>
      %205 = vector.extract_strided_slice %0 {offsets = [0, 1], sizes = [32, 1], strides = [1, 1]} : vector<32x9xf32> to vector<32x1xf32>
      %206 = vector.extract_strided_slice %199 {offsets = [1, 0], sizes = [1, 112], strides = [1, 1]} : vector<9x112xf32> to vector<1x112xf32>
      %207 = vector.broadcast %205 : vector<32x1xf32> to vector<32x112xf32>
      %208 = vector.broadcast %206 : vector<1x112xf32> to vector<32x112xf32>
      %209 = arith.mulf %207, %208 : vector<32x112xf32>
      %210 = arith.addf %204, %209 : vector<32x112xf32>
      %211 = vector.extract_strided_slice %0 {offsets = [0, 2], sizes = [32, 1], strides = [1, 1]} : vector<32x9xf32> to vector<32x1xf32>
      %212 = vector.extract_strided_slice %199 {offsets = [2, 0], sizes = [1, 112], strides = [1, 1]} : vector<9x112xf32> to vector<1x112xf32>
      %213 = vector.broadcast %211 : vector<32x1xf32> to vector<32x112xf32>
      %214 = vector.broadcast %212 : vector<1x112xf32> to vector<32x112xf32>
      %215 = arith.mulf %213, %214 : vector<32x112xf32>
      %216 = arith.addf %210, %215 : vector<32x112xf32>
      %217 = vector.extract_strided_slice %0 {offsets = [0, 3], sizes = [32, 1], strides = [1, 1]} : vector<32x9xf32> to vector<32x1xf32>
      %218 = vector.extract_strided_slice %199 {offsets = [3, 0], sizes = [1, 112], strides = [1, 1]} : vector<9x112xf32> to vector<1x112xf32>
      %219 = vector.broadcast %217 : vector<32x1xf32> to vector<32x112xf32>
      %220 = vector.broadcast %218 : vector<1x112xf32> to vector<32x112xf32>
      %221 = arith.mulf %219, %220 : vector<32x112xf32>
      %222 = arith.addf %216, %221 : vector<32x112xf32>
      %223 = vector.extract_strided_slice %0 {offsets = [0, 4], sizes = [32, 1], strides = [1, 1]} : vector<32x9xf32> to vector<32x1xf32>
      %224 = vector.extract_strided_slice %199 {offsets = [4, 0], sizes = [1, 112], strides = [1, 1]} : vector<9x112xf32> to vector<1x112xf32>
      %225 = vector.broadcast %223 : vector<32x1xf32> to vector<32x112xf32>
      %226 = vector.broadcast %224 : vector<1x112xf32> to vector<32x112xf32>
      %227 = arith.mulf %225, %226 : vector<32x112xf32>
      %228 = arith.addf %222, %227 : vector<32x112xf32>
      %229 = vector.extract_strided_slice %0 {offsets = [0, 5], sizes = [32, 1], strides = [1, 1]} : vector<32x9xf32> to vector<32x1xf32>
      %230 = vector.extract_strided_slice %199 {offsets = [5, 0], sizes = [1, 112], strides = [1, 1]} : vector<9x112xf32> to vector<1x112xf32>
      %231 = vector.broadcast %229 : vector<32x1xf32> to vector<32x112xf32>
      %232 = vector.broadcast %230 : vector<1x112xf32> to vector<32x112xf32>
      %233 = arith.mulf %231, %232 : vector<32x112xf32>
      %234 = arith.addf %228, %233 : vector<32x112xf32>
      %235 = vector.extract_strided_slice %0 {offsets = [0, 6], sizes = [32, 1], strides = [1, 1]} : vector<32x9xf32> to vector<32x1xf32>
      %236 = vector.extract_strided_slice %199 {offsets = [6, 0], sizes = [1, 112], strides = [1, 1]} : vector<9x112xf32> to vector<1x112xf32>
      %237 = vector.broadcast %235 : vector<32x1xf32> to vector<32x112xf32>
      %238 = vector.broadcast %236 : vector<1x112xf32> to vector<32x112xf32>
      %239 = arith.mulf %237, %238 : vector<32x112xf32>
      %240 = arith.addf %234, %239 : vector<32x112xf32>
      %241 = vector.extract_strided_slice %0 {offsets = [0, 7], sizes = [32, 1], strides = [1, 1]} : vector<32x9xf32> to vector<32x1xf32>
      %242 = vector.extract_strided_slice %199 {offsets = [7, 0], sizes = [1, 112], strides = [1, 1]} : vector<9x112xf32> to vector<1x112xf32>
      %243 = vector.broadcast %241 : vector<32x1xf32> to vector<32x112xf32>
      %244 = vector.broadcast %242 : vector<1x112xf32> to vector<32x112xf32>
      %245 = arith.mulf %243, %244 : vector<32x112xf32>
      %246 = arith.addf %240, %245 : vector<32x112xf32>
      %247 = vector.extract_strided_slice %0 {offsets = [0, 8], sizes = [32, 1], strides = [1, 1]} : vector<32x9xf32> to vector<32x1xf32>
      %248 = vector.extract_strided_slice %199 {offsets = [8, 0], sizes = [1, 112], strides = [1, 1]} : vector<9x112xf32> to vector<1x112xf32>
      %249 = vector.broadcast %247 : vector<32x1xf32> to vector<32x112xf32>
      %250 = vector.broadcast %248 : vector<1x112xf32> to vector<32x112xf32>
      %251 = arith.mulf %249, %250 : vector<32x112xf32>
      %252 = arith.addf %246, %251 : vector<32x112xf32>
      %253 = arith.maximumf %72, %132 : vector<32x112xf32>
      %254 = arith.maximumf %192, %252 : vector<32x112xf32>
      %255 = arith.maximumf %253, %254 : vector<32x112xf32>
      %256 = vector.broadcast %1 : vector<32x1xf32> to vector<32x112xf32>
      %257 = arith.addf %255, %256 : vector<32x112xf32>
      %cst = arith.constant 0.000000e+00 : f32
      %258 = vector.broadcast %cst : f32 to vector<32x112xf32>
      %259 = arith.maximumf %257, %258 : vector<32x112xf32>
      %c0_7 = arith.constant 0 : index
      %260 = arith.index_cast %arg5 : i32 to index
      %c0_8 = arith.constant 0 : index
      %c0_9 = arith.constant 0 : index
      %261 = vector.load %arg4[%c0_7, %260, %c0_8, %c0_9] : memref<1x112x32x112xf32, #tpu.memory_space<vmem>>, vector<1x1x32x112xf32>
      %262 = vector.shape_cast %261 : vector<1x1x32x112xf32> to vector<32x112xf32>
      %263 = vector.shape_cast %259 : vector<32x112xf32> to vector<1x1x32x112xf32>
      tpu.vector_store %arg4[%c0_7, %260, %c0_8, %c0_9], %263 {strides = array<i32>} : memref<1x112x32x112xf32, #tpu.memory_space<vmem>>, vector<1x1x32x112xf32>,
    }
    %c112_i32_3 = arith.constant 112 : i32
    return
  }
  func.func @transform_0(%arg0: i32) -> (i32, i32, i32, i32) {
    %c0_i32 = arith.constant 0 : i32
    %c0_i32_0 = arith.constant 0 : i32
    %c0_i32_1 = arith.constant 0 : i32
    %c0_i32_2 = arith.constant 0 : i32
    return %arg0, %c0_i32, %c0_i32_0, %c0_i32_1 : i32, i32, i32, i32
  }
  func.func @transform_1(%arg0: i32) -> (i32, i32) {
    %c0_i32 = arith.constant 0 : i32
    %c0_i32_0 = arith.constant 0 : i32
    %c0_i32_1 = arith.constant 0 : i32
    return %c0_i32, %c0_i32_0 : i32, i32
  }
  func.func @transform_2(%arg0: i32) -> (i32, i32) {
    %c0_i32 = arith.constant 0 : i32
    %c0_i32_0 = arith.constant 0 : i32
    %c0_i32_1 = arith.constant 0 : i32
    return %c0_i32, %c0_i32_0 : i32, i32
  }
  func.func @transform_3(%arg0: i32) -> (i32, i32, i32, i32) {
    %c0_i32 = arith.constant 0 : i32
    %c0_i32_0 = arith.constant 0 : i32
    %c0_i32_1 = arith.constant 0 : i32
    %c0_i32_2 = arith.constant 0 : i32
    return %arg0, %c0_i32, %c0_i32_0, %c0_i32_1 : i32, i32, i32, i32
  }
}

module attributes {stable_mosaic.version = 11 : i64} {
  func.func @_conv_pool_kernel(%arg0: i32, %arg1: memref<1x114x64x57xf32, #tpu.memory_space<vmem>>, %arg2: memref<32x288xf32, #tpu.memory_space<vmem>>, %arg3: memref<32x1xf32, #tpu.memory_space<vmem>>, %arg4: memref<1x56x32x56xf32, #tpu.memory_space<vmem>>) attributes {dimension_semantics = [#tpu.dimension_semantics<parallel>], iteration_bounds = array<i64: 2>, scalar_prefetch = 0 : i64, scratch_operands = 0 : i64, tpu.core_type = #tpu.core_type<tc>, window_params = [{transform_indices = @transform_0, window_bounds = array<i64: 1, 114, 64, 57>}, {pipeline_mode = #tpu.pipeline_mode<synchronous>, transform_indices = @transform_1, window_bounds = array<i64: 32, 288>}, {pipeline_mode = #tpu.pipeline_mode<synchronous>, transform_indices = @transform_2, window_bounds = array<i64: 32, 1>}, {transform_indices = @transform_3, window_bounds = array<i64: 1, 56, 32, 56>}]} {
    %c0 = arith.constant 0 : index
    %c0_0 = arith.constant 0 : index
    %0 = vector.load %arg2[%c0, %c0_0] : memref<32x288xf32, #tpu.memory_space<vmem>>, vector<32x288xf32>
    %c0_1 = arith.constant 0 : index
    %c0_2 = arith.constant 0 : index
    %1 = vector.load %arg3[%c0_1, %c0_2] : memref<32x1xf32, #tpu.memory_space<vmem>>, vector<32x1xf32>
    %c0_i32 = arith.constant 0 : i32
    %c56_i32 = arith.constant 56 : i32
    %2 = arith.addi %c0_i32, %c56_i32 : i32
    %c1_i32 = arith.constant 1 : i32
    scf.for %arg5 = %c0_i32 to %2 step %c1_i32  : i32 {
      %c2_i32 = arith.constant 2 : i32
      %3 = arith.muli %c2_i32, %arg5 : i32
      %c0_4 = arith.constant 0 : index
      %4 = arith.index_cast %3 : i32 to index
      %c0_5 = arith.constant 0 : index
      %c0_6 = arith.constant 0 : index
      %5 = vector.load %arg1[%c0_4, %4, %c0_5, %c0_6] : memref<1x114x64x57xf32, #tpu.memory_space<vmem>>, vector<1x4x64x57xf32>
      %6 = vector.shape_cast %5 : vector<1x4x64x57xf32> to vector<4x64x57xf32>
      %7 = vector.extract_strided_slice %6 {offsets = [0, 0, 0], sizes = [4, 32, 57], strides = [1, 1, 1]} : vector<4x64x57xf32> to vector<4x32x57xf32>
      %8 = vector.extract_strided_slice %6 {offsets = [0, 32, 0], sizes = [4, 32, 57], strides = [1, 1, 1]} : vector<4x64x57xf32> to vector<4x32x57xf32>
      %9 = vector.extract_strided_slice %7 {offsets = [0, 0, 0], sizes = [4, 32, 56], strides = [1, 1, 1]} : vector<4x32x57xf32> to vector<4x32x56xf32>
      %10 = vector.extract_strided_slice %7 {offsets = [0, 0, 1], sizes = [4, 32, 56], strides = [1, 1, 1]} : vector<4x32x57xf32> to vector<4x32x56xf32>
      %11 = vector.extract_strided_slice %8 {offsets = [0, 0, 0], sizes = [4, 32, 56], strides = [1, 1, 1]} : vector<4x32x57xf32> to vector<4x32x56xf32>
      %12 = vector.extract_strided_slice %8 {offsets = [0, 0, 1], sizes = [4, 32, 56], strides = [1, 1, 1]} : vector<4x32x57xf32> to vector<4x32x56xf32>
      %13 = vector.extract_strided_slice %9 {offsets = [0, 0, 0], sizes = [3, 32, 56], strides = [1, 1, 1]} : vector<4x32x56xf32> to vector<3x32x56xf32>
      %14 = vector.shape_cast %13 : vector<3x32x56xf32> to vector<96x56xf32>
      %15 = vector.extract_strided_slice %11 {offsets = [0, 0, 0], sizes = [3, 32, 56], strides = [1, 1, 1]} : vector<4x32x56xf32> to vector<3x32x56xf32>
      %16 = vector.shape_cast %15 : vector<3x32x56xf32> to vector<96x56xf32>
      %17 = vector.extract_strided_slice %10 {offsets = [0, 0, 0], sizes = [3, 32, 56], strides = [1, 1, 1]} : vector<4x32x56xf32> to vector<3x32x56xf32>
      %18 = vector.shape_cast %17 : vector<3x32x56xf32> to vector<96x56xf32>
      %19 = tpu.concatenate %14, %16, %18 in 0 : vector<96x56xf32>, vector<96x56xf32>, vector<96x56xf32> -> vector<288x56xf32>
      %cst = arith.constant dense<0.000000e+00> : vector<32x56xf32>
      %20 = tpu.matmul %0, %19, %cst {dimension_numbers = #tpu.dot_dimension_numbers<[1], [0], [0], [1], [0, 0, 1, 1], [], []>} : vector<32x288xf32>, vector<288x56xf32>, vector<32x56xf32> -> vector<32x56xf32>
      %21 = vector.extract_strided_slice %11 {offsets = [0, 0, 0], sizes = [3, 32, 56], strides = [1, 1, 1]} : vector<4x32x56xf32> to vector<3x32x56xf32>
      %22 = vector.shape_cast %21 : vector<3x32x56xf32> to vector<96x56xf32>
      %23 = vector.extract_strided_slice %10 {offsets = [0, 0, 0], sizes = [3, 32, 56], strides = [1, 1, 1]} : vector<4x32x56xf32> to vector<3x32x56xf32>
      %24 = vector.shape_cast %23 : vector<3x32x56xf32> to vector<96x56xf32>
      %25 = vector.extract_strided_slice %12 {offsets = [0, 0, 0], sizes = [3, 32, 56], strides = [1, 1, 1]} : vector<4x32x56xf32> to vector<3x32x56xf32>
      %26 = vector.shape_cast %25 : vector<3x32x56xf32> to vector<96x56xf32>
      %27 = tpu.concatenate %22, %24, %26 in 0 : vector<96x56xf32>, vector<96x56xf32>, vector<96x56xf32> -> vector<288x56xf32>
      %cst_7 = arith.constant dense<0.000000e+00> : vector<32x56xf32>
      %28 = tpu.matmul %0, %27, %cst_7 {dimension_numbers = #tpu.dot_dimension_numbers<[1], [0], [0], [1], [0, 0, 1, 1], [], []>} : vector<32x288xf32>, vector<288x56xf32>, vector<32x56xf32> -> vector<32x56xf32>
      %29 = vector.extract_strided_slice %9 {offsets = [1, 0, 0], sizes = [3, 32, 56], strides = [1, 1, 1]} : vector<4x32x56xf32> to vector<3x32x56xf32>
      %30 = vector.shape_cast %29 : vector<3x32x56xf32> to vector<96x56xf32>
      %31 = vector.extract_strided_slice %11 {offsets = [1, 0, 0], sizes = [3, 32, 56], strides = [1, 1, 1]} : vector<4x32x56xf32> to vector<3x32x56xf32>
      %32 = vector.shape_cast %31 : vector<3x32x56xf32> to vector<96x56xf32>
      %33 = vector.extract_strided_slice %10 {offsets = [1, 0, 0], sizes = [3, 32, 56], strides = [1, 1, 1]} : vector<4x32x56xf32> to vector<3x32x56xf32>
      %34 = vector.shape_cast %33 : vector<3x32x56xf32> to vector<96x56xf32>
      %35 = tpu.concatenate %30, %32, %34 in 0 : vector<96x56xf32>, vector<96x56xf32>, vector<96x56xf32> -> vector<288x56xf32>
      %cst_8 = arith.constant dense<0.000000e+00> : vector<32x56xf32>
      %36 = tpu.matmul %0, %35, %cst_8 {dimension_numbers = #tpu.dot_dimension_numbers<[1], [0], [0], [1], [0, 0, 1, 1], [], []>} : vector<32x288xf32>, vector<288x56xf32>, vector<32x56xf32> -> vector<32x56xf32>
      %37 = vector.extract_strided_slice %11 {offsets = [1, 0, 0], sizes = [3, 32, 56], strides = [1, 1, 1]} : vector<4x32x56xf32> to vector<3x32x56xf32>
      %38 = vector.shape_cast %37 : vector<3x32x56xf32> to vector<96x56xf32>
      %39 = vector.extract_strided_slice %10 {offsets = [1, 0, 0], sizes = [3, 32, 56], strides = [1, 1, 1]} : vector<4x32x56xf32> to vector<3x32x56xf32>
      %40 = vector.shape_cast %39 : vector<3x32x56xf32> to vector<96x56xf32>
      %41 = vector.extract_strided_slice %12 {offsets = [1, 0, 0], sizes = [3, 32, 56], strides = [1, 1, 1]} : vector<4x32x56xf32> to vector<3x32x56xf32>
      %42 = vector.shape_cast %41 : vector<3x32x56xf32> to vector<96x56xf32>
      %43 = tpu.concatenate %38, %40, %42 in 0 : vector<96x56xf32>, vector<96x56xf32>, vector<96x56xf32> -> vector<288x56xf32>
      %cst_9 = arith.constant dense<0.000000e+00> : vector<32x56xf32>
      %44 = tpu.matmul %0, %43, %cst_9 {dimension_numbers = #tpu.dot_dimension_numbers<[1], [0], [0], [1], [0, 0, 1, 1], [], []>} : vector<32x288xf32>, vector<288x56xf32>, vector<32x56xf32> -> vector<32x56xf32>
      %45 = arith.maximumf %20, %28 : vector<32x56xf32>
      %46 = arith.maximumf %36, %44 : vector<32x56xf32>
      %47 = arith.maximumf %45, %46 : vector<32x56xf32>
      %48 = vector.broadcast %1 : vector<32x1xf32> to vector<32x56xf32>
      %49 = arith.addf %47, %48 : vector<32x56xf32>
      %cst_10 = arith.constant 0.000000e+00 : f32
      %50 = vector.broadcast %cst_10 : f32 to vector<32x56xf32>
      %51 = arith.maximumf %49, %50 : vector<32x56xf32>
      %c0_11 = arith.constant 0 : index
      %52 = arith.index_cast %arg5 : i32 to index
      %c0_12 = arith.constant 0 : index
      %c0_13 = arith.constant 0 : index
      %53 = vector.load %arg4[%c0_11, %52, %c0_12, %c0_13] : memref<1x56x32x56xf32, #tpu.memory_space<vmem>>, vector<1x1x32x56xf32>
      %54 = vector.shape_cast %53 : vector<1x1x32x56xf32> to vector<32x56xf32>
      %55 = vector.shape_cast %51 : vector<32x56xf32> to vector<1x1x32x56xf32>
      tpu.vector_store %arg4[%c0_11, %52, %c0_12, %c0_13], %55 {strides = array<i32>} : memref<1x56x32x56xf32, #tpu.memory_space<vmem>>, vector<1x1x32x56xf32>,
    }
    %c56_i32_3 = arith.constant 56 : i32
    return
  }
  func.func @transform_0(%arg0: i32) -> (i32, i32, i32, i32) {
    %c0_i32 = arith.constant 0 : i32
    %c0_i32_0 = arith.constant 0 : i32
    %c0_i32_1 = arith.constant 0 : i32
    %c0_i32_2 = arith.constant 0 : i32
    return %arg0, %c0_i32, %c0_i32_0, %c0_i32_1 : i32, i32, i32, i32
  }
  func.func @transform_1(%arg0: i32) -> (i32, i32) {
    %c0_i32 = arith.constant 0 : i32
    %c0_i32_0 = arith.constant 0 : i32
    %c0_i32_1 = arith.constant 0 : i32
    return %c0_i32, %c0_i32_0 : i32, i32
  }
  func.func @transform_2(%arg0: i32) -> (i32, i32) {
    %c0_i32 = arith.constant 0 : i32
    %c0_i32_0 = arith.constant 0 : i32
    %c0_i32_1 = arith.constant 0 : i32
    return %c0_i32, %c0_i32_0 : i32, i32
  }
  func.func @transform_3(%arg0: i32) -> (i32, i32, i32, i32) {
    %c0_i32 = arith.constant 0 : i32
    %c0_i32_0 = arith.constant 0 : i32
    %c0_i32_1 = arith.constant 0 : i32
    %c0_i32_2 = arith.constant 0 : i32
    return %arg0, %c0_i32, %c0_i32_0, %c0_i32_1 : i32, i32, i32, i32
  }
}

module attributes {stable_mosaic.version = 11 : i64} {
  func.func @_fc1_partial_kernel(%arg0: i32, %arg1: i32, %arg2: memref<2x7168xf32, #tpu.memory_space<vmem>>, %arg3: memref<56x7168xf32, #tpu.memory_space<vmem>>, %arg4: memref<1x2x56xf32, #tpu.memory_space<vmem>>) attributes {dimension_semantics = [#tpu.dimension_semantics<parallel>, #tpu.dimension_semantics<arbitrary>], iteration_bounds = array<i64: 2, 7>, scalar_prefetch = 0 : i64, scratch_operands = 0 : i64, tpu.core_type = #tpu.core_type<tc>, window_params = [{transform_indices = @transform_0, window_bounds = array<i64: 2, 7168>}, {transform_indices = @transform_1, window_bounds = array<i64: 56, 7168>}, {transform_indices = @transform_2, window_bounds = array<i64: 1, 2, 56>}]} {
    %c0_i32 = arith.constant 0 : i32
    %0 = arith.cmpi eq, %arg1, %c0_i32 : i32
    %1 = arith.extui %0 : i1 to i32
    %c0_i32_0 = arith.constant 0 : i32
    %2 = arith.cmpi ne, %1, %c0_i32_0 : i32
    scf.if %2 {
      %cst_10 = arith.constant 0.000000e+00 : f32
      %12 = vector.broadcast %cst_10 : f32 to vector<1x2x56xf32>
      %c0_11 = arith.constant 0 : index
      %c0_12 = arith.constant 0 : index
      %c0_13 = arith.constant 0 : index
      %13 = vector.load %arg4[%c0_11, %c0_12, %c0_13] : memref<1x2x56xf32, #tpu.memory_space<vmem>>, vector<1x2x56xf32>
      tpu.vector_store %arg4[%c0_11, %c0_12, %c0_13], %12 {strides = array<i32>} : memref<1x2x56xf32, #tpu.memory_space<vmem>>, vector<1x2x56xf32>,
    } else {
    }
    %c0 = arith.constant 0 : index
    %c0_1 = arith.constant 0 : index
    %c0_2 = arith.constant 0 : index
    %3 = vector.load %arg4[%c0, %c0_1, %c0_2] : memref<1x2x56xf32, #tpu.memory_space<vmem>>, vector<1x2x56xf32>
    %4 = vector.shape_cast %3 : vector<1x2x56xf32> to vector<2x56xf32>
    %c0_3 = arith.constant 0 : index
    %c0_4 = arith.constant 0 : index
    %5 = vector.load %arg2[%c0_3, %c0_4] : memref<2x7168xf32, #tpu.memory_space<vmem>>, vector<2x7168xf32>
    %c0_5 = arith.constant 0 : index
    %c0_6 = arith.constant 0 : index
    %6 = vector.load %arg3[%c0_5, %c0_6] : memref<56x7168xf32, #tpu.memory_space<vmem>>, vector<56x7168xf32>
    %cst = arith.constant dense<0.000000e+00> : vector<2x56xf32>
    %7 = tpu.matmul %5, %6, %cst {dimension_numbers = #tpu.dot_dimension_numbers<[1], [1], [0], [0], [0, 0, 1, 0], [], []>} : vector<2x7168xf32>, vector<56x7168xf32>, vector<2x56xf32> -> vector<2x56xf32>
    %8 = arith.addf %4, %7 : vector<2x56xf32>
    %c0_7 = arith.constant 0 : index
    %c0_8 = arith.constant 0 : index
    %c0_9 = arith.constant 0 : index
    %9 = vector.load %arg4[%c0_7, %c0_8, %c0_9] : memref<1x2x56xf32, #tpu.memory_space<vmem>>, vector<1x2x56xf32>
    %10 = vector.shape_cast %9 : vector<1x2x56xf32> to vector<2x56xf32>
    %11 = vector.shape_cast %8 : vector<2x56xf32> to vector<1x2x56xf32>
    tpu.vector_store %arg4[%c0_7, %c0_8, %c0_9], %11 {strides = array<i32>} : memref<1x2x56xf32, #tpu.memory_space<vmem>>, vector<1x2x56xf32>,
    return
  }
  func.func @transform_0(%arg0: i32, %arg1: i32) -> (i32, i32) {
    %c7_i32 = arith.constant 7 : i32
    %0 = arith.muli %arg0, %c7_i32 : i32
    %1 = arith.addi %0, %arg1 : i32
    %c0_i32 = arith.constant 0 : i32
    %c0_i32_0 = arith.constant 0 : i32
    return %c0_i32, %1 : i32, i32
  }
  func.func @transform_1(%arg0: i32, %arg1: i32) -> (i32, i32) {
    %c7_i32 = arith.constant 7 : i32
    %0 = arith.muli %arg0, %c7_i32 : i32
    %1 = arith.addi %0, %arg1 : i32
    %c0_i32 = arith.constant 0 : i32
    %c0_i32_0 = arith.constant 0 : i32
    return %c0_i32, %1 : i32, i32
  }
  func.func @transform_2(%arg0: i32, %arg1: i32) -> (i32, i32, i32) {
    %c0_i32 = arith.constant 0 : i32
    %c0_i32_0 = arith.constant 0 : i32
    %c0_i32_1 = arith.constant 0 : i32
    return %arg0, %c0_i32, %c0_i32_0 : i32, i32, i32
  }
}

module attributes {stable_mosaic.version = 11 : i64} {
  func.func @_fc_finalize_kernel(%arg0: i32, %arg1: memref<2x2x56xf32, #tpu.memory_space<vmem>>, %arg2: memref<1x56xf32, #tpu.memory_space<vmem>>, %arg3: memref<4x56xf32, #tpu.memory_space<vmem>>, %arg4: memref<1x4xf32, #tpu.memory_space<vmem>>, %arg5: memref<2x4xf32, #tpu.memory_space<vmem>>) attributes {dimension_semantics = [#tpu.dimension_semantics<arbitrary>], iteration_bounds = array<i64: 1>, scalar_prefetch = 0 : i64, scratch_operands = 0 : i64, tpu.core_type = #tpu.core_type<tc>, window_params = [{pipeline_mode = #tpu.pipeline_mode<synchronous>, transform_indices = @transform_0, window_bounds = array<i64: 2, 2, 56>}, {pipeline_mode = #tpu.pipeline_mode<synchronous>, transform_indices = @transform_1, window_bounds = array<i64: 1, 56>}, {pipeline_mode = #tpu.pipeline_mode<synchronous>, transform_indices = @transform_2, window_bounds = array<i64: 4, 56>}, {pipeline_mode = #tpu.pipeline_mode<synchronous>, transform_indices = @transform_3, window_bounds = array<i64: 1, 4>}, {pipeline_mode = #tpu.pipeline_mode<synchronous>, transform_indices = @transform_4, window_bounds = array<i64: 2, 4>}]} {
    %c0 = arith.constant 0 : index
    %c0_0 = arith.constant 0 : index
    %c0_1 = arith.constant 0 : index
    %0 = vector.load %arg1[%c0, %c0_0, %c0_1] : memref<2x2x56xf32, #tpu.memory_space<vmem>>, vector<1x2x56xf32>
    %1 = vector.shape_cast %0 : vector<1x2x56xf32> to vector<2x56xf32>
    %c1 = arith.constant 1 : index
    %c0_2 = arith.constant 0 : index
    %c0_3 = arith.constant 0 : index
    %2 = vector.load %arg1[%c1, %c0_2, %c0_3] : memref<2x2x56xf32, #tpu.memory_space<vmem>>, vector<1x2x56xf32>
    %3 = vector.shape_cast %2 : vector<1x2x56xf32> to vector<2x56xf32>
    %4 = arith.addf %1, %3 : vector<2x56xf32>
    %c0_4 = arith.constant 0 : index
    %c0_5 = arith.constant 0 : index
    %5 = vector.load %arg2[%c0_4, %c0_5] : memref<1x56xf32, #tpu.memory_space<vmem>>, vector<1x56xf32>
    %6 = vector.broadcast %5 : vector<1x56xf32> to vector<2x56xf32>
    %7 = arith.addf %4, %6 : vector<2x56xf32>
    %cst = arith.constant 0.000000e+00 : f32
    %8 = vector.broadcast %cst : f32 to vector<2x56xf32>
    %9 = arith.maximumf %7, %8 : vector<2x56xf32>
    %c0_6 = arith.constant 0 : index
    %c0_7 = arith.constant 0 : index
    %10 = vector.load %arg3[%c0_6, %c0_7] : memref<4x56xf32, #tpu.memory_space<vmem>>, vector<4x56xf32>
    %cst_8 = arith.constant dense<0.000000e+00> : vector<2x4xf32>
    %11 = tpu.matmul %9, %10, %cst_8 {dimension_numbers = #tpu.dot_dimension_numbers<[1], [1], [0], [0], [0, 0, 1, 0], [], []>} : vector<2x56xf32>, vector<4x56xf32>, vector<2x4xf32> -> vector<2x4xf32>
    %c0_9 = arith.constant 0 : index
    %c0_10 = arith.constant 0 : index
    %12 = vector.load %arg4[%c0_9, %c0_10] : memref<1x4xf32, #tpu.memory_space<vmem>>, vector<1x4xf32>
    %13 = vector.broadcast %12 : vector<1x4xf32> to vector<2x4xf32>
    %14 = arith.addf %11, %13 : vector<2x4xf32>
    %c0_11 = arith.constant 0 : index
    %c0_12 = arith.constant 0 : index
    %15 = vector.load %arg5[%c0_11, %c0_12] : memref<2x4xf32, #tpu.memory_space<vmem>>, vector<2x4xf32>
    tpu.vector_store %arg5[%c0_11, %c0_12], %14 {strides = array<i32>} : memref<2x4xf32, #tpu.memory_space<vmem>>, vector<2x4xf32>,
    return
  }
  func.func @transform_0(%arg0: i32) -> (i32, i32, i32) {
    %c0_i32 = arith.constant 0 : i32
    %c0_i32_0 = arith.constant 0 : i32
    %c0_i32_1 = arith.constant 0 : i32
    %c0_i32_2 = arith.constant 0 : i32
    return %c0_i32, %c0_i32_0, %c0_i32_1 : i32, i32, i32
  }
  func.func @transform_1(%arg0: i32) -> (i32, i32) {
    %c0_i32 = arith.constant 0 : i32
    %c0_i32_0 = arith.constant 0 : i32
    %c0_i32_1 = arith.constant 0 : i32
    return %c0_i32, %c0_i32_0 : i32, i32
  }
  func.func @transform_2(%arg0: i32) -> (i32, i32) {
    %c0_i32 = arith.constant 0 : i32
    %c0_i32_0 = arith.constant 0 : i32
    %c0_i32_1 = arith.constant 0 : i32
    return %c0_i32, %c0_i32_0 : i32, i32
  }
  func.func @transform_3(%arg0: i32) -> (i32, i32) {
    %c0_i32 = arith.constant 0 : i32
    %c0_i32_0 = arith.constant 0 : i32
    %c0_i32_1 = arith.constant 0 : i32
    return %c0_i32, %c0_i32_0 : i32, i32
  }
  func.func @transform_4(%arg0: i32) -> (i32, i32) {
    %c0_i32 = arith.constant 0 : i32
    %c0_i32_0 = arith.constant 0 : i32
    %c0_i32_1 = arith.constant 0 : i32
    return %c0_i32, %c0_i32_0 : i32, i32
  }
}

</mosaic_0001>

<bundles_post_ra>
// kernel: cnn_forward.4
= control target key start
LH: loop header
LB: loop body
LE: loop exit
PB: predicated region body
PF: predicated region fallthrough
CT: control target
= control target key end

     0   :  { %s1073_s12 = smov 0   ;;  %s1818_s0 = inlined_call_operand.vmem [shape: f32[2,226,2,113], index: 0, kind: input, shape index: {}]   ;;  %s1819_s1 = inlined_call_operand.vmem [shape: f32[32,9], index: 1, kind: input, shape index: {}]   ;;  %s1820_s2 = inlined_call_operand.vmem [shape: f32[32,1], index: 2, kind: input, shape index: {}]   ;;  %s1821_s3 = inlined_call_operand.vmem [shape: f32[2,112,32,112], index: 3, kind: output, shape index: {}]  }
   0x1 LB: > { %s966_s13 = sadd.s32 4294967295, %s1037_s12   ;;  %p970_p0 = scmp.ge.s32.totalorder %s1037_s12, 1  ;;  %s1037_s12 = sphi %s1073_s12, %s13_s12  }
   0x2   : > { %p137_p1 = scmp.lt.s32.totalorder %s1037_s12, 3 }
   0x4   : > { %p138_p2 = pnand %p970_p0, %p137_p1 }
   0x5   : > { %p161_p3 = scmp.lt.s32.totalorder (!%p138_p2), %s966_s13, 1  ;;  %v1084_v0 = vld [vmem:[%s1819_s1] sm:$0xff] (!%p138_p2)  ;;  %v1089_v1 = vld [vmem:[%s1819_s1 + $0x8] sm:$0xff] (!%p138_p2)  ;;  %v1094_v2 = vld [vmem:[%s1819_s1 + $0x10] sm:$0xff] (!%p138_p2)  ;;  %s1131_s11 = smov (!%p138_p2), 0  }
   0x6   : > { %141 = sbr.rel (%p138_p2) target bundleno = 290 (0x122), region = 32  ;;  %1862 = vst [vmem:[#allocation2_spill] sm:$0xff] (!%p138_p2), %v1084_v0  ;;  %1863 = vst [vmem:[#allocation3_spill] sm:$0xff] (!%p138_p2), %v1089_v1  ;;  %v1099_v3 = vld [vmem:[%s1819_s1 + $0x18] sm:$0xff] (!%p138_p2)  ;;  %v1104_v4 = vld [vmem:[%s1820_s2] sm:$0xff] (!%p138_p2) }
   0x7   : > { %1864 = vst [vmem:[#allocation4_spill] sm:$0xff] (!%p138_p2), %v1094_v2  ;;  %1865 = vst [vmem:[#allocation5_spill] sm:$0xff] (!%p138_p2), %v1099_v3  ;;  %v1109_v5 = vld [vmem:[%s1820_s2 + $0x8] sm:$0xff] (!%p138_p2)  ;;  %v1114_v6 = vld [vmem:[%s1820_s2 + $0x10] sm:$0xff] (!%p138_p2) }
   0x8   : > { %1866 = vst [vmem:[#allocation6_spill] sm:$0xff] (!%p138_p2), %v1104_v4  ;;  %1867 = vst [vmem:[#allocation7_spill] sm:$0xff] (!%p138_p2), %v1109_v5  ;;  %v1119_v7 = vld [vmem:[%s1820_s2 + $0x18] sm:$0xff] (!%p138_p2) }
   0x9   : > { %1868 = vst [vmem:[#allocation8_spill] sm:$0xff] (!%p138_p2), %v1114_v6  ;;  %1869 = vst [vmem:[#allocation9_spill] sm:$0xff] (!%p138_p2), %v1119_v7 }
   0xd   : > { %s1936_s13 = smov (!%p161_p3, %s966_s13), 1 }
   0xe   : > { %s979_s30 = smul.u32 452, %s1936_s13 }
   0xf   : > { %s980_s4 = smul.u32 3584, %s1936_s13 }
  0x10   : > { %s1124_s7 = scalar_lea.vmem %s1818_s0, %s979_s30 }
  0x11   : > { %s1129_s10 = scalar_lea.vmem %s1821_s3, %s980_s4 }
  0x12 LB: >> { %v1870_v3 = vld [vmem:[#allocation5_spill] sm:$0xff]  ;;  %v1871_v2 = vld [vmem:[#allocation4_spill] sm:$0xff]  ;;  %v1872_v1 = vld [vmem:[#allocation3_spill] sm:$0xff]  ;;  %v1043_v8 = vmov 0   ;;  %s978_s13 = sshll.u32 %s1041_s11, 2  ;;  %vm212_vm0 = vcmask 1047559   ;;  %v244_v58 = vlaneseq  ;;  %s1041_s11 = sphi %s1131_s11, %s184_s11  }
  0x13   : >> { %v1873_v0 = vld [vmem:[#allocation2_spill] sm:$0xff]  ;;  %1007 = vset.pattern.permute.xlu1 %v1043_v8  ;;  %1008 = vset.pattern.permute.xlu0 %v1043_v8  ;;  %s1141_s14 = scalar_lea.vmem %s1124_s7, %s978_s13  ;;  %s1044_s15 = smov 127   ;;  %vm196_vm1 = vcmask 1041409   ;;  %vm199_vm2 = vcmask 1042434   ;;  %vm204_vm3 = vcmask 1044484   ;;  %vm220_vm4 = vcmask 1042432  }
  0x14   : >> { %226 = vperm.xlu1 %1007, %v1873_v0   ;;  %v1144_v9 = vld [vmem:[%s1141_s14 + $0x4] sm:$0x3]  ;;  %v1147_v10 = vld [vmem:[%s1141_s14] sm:$0x3]  ;;  %v1150_v11 = vld [vmem:[%s1141_s14 + $0x2] sm:$0x3] }
  0x15   : >> { %216 = vrot.lane.b32.xlu0 %v1144_v9, %s1044_s15  ;;  %v210_v12 = vrot.slane %v1147_v10, 2  ;;  %v1822_v13 = vrot.slane %v1150_v11, 1  ;;  %v195_v15 = vrot.slane %v1150_v11, 7  ;;  %v198_v16 = vrot.slane %v1144_v9, 6  ;;  %v1206_v40 = vld [vmem:[%s1141_s14 + $0x6] sm:$0x3] }
  0x16   : >> { %v203_v17 = vrot.slane %v1150_v11, 5  ;;  %v202_v18 = vrot.slane %v1147_v10, 6  ;;  %v206_v19 = vrot.slane %v1144_v9, 4  ;;  %vm207_vm5 = vcmask 1045509   ;;  %v1874_v5 = vld [vmem:[#allocation7_spill] sm:$0xff]  ;;  %v1875_v4 = vld [vmem:[#allocation6_spill] sm:$0xff] }
  0x17   : >> { %v213_v14 = vsel %vm212_vm0, %v1822_v13, %v210_v12  ;;  %v197_v20 = vsel %vm196_vm1, %v195_v15, %v1147_v10  ;;  %v1045_v23 = vmov 1   ;;  %v1046_v26 = vmov 2   ;;  %v1876_v6 = vld [vmem:[#allocation8_spill] sm:$0xff]  ;;  %v1877_v7 = vld [vmem:[#allocation9_spill] sm:$0xff]  ;;  %s975_s16 = sshll.u32 %s1041_s11, 5  ;;  %s184_s11 = sadd.s32 1, %s1041_s11  }
  0x18   : >> { %231 = vperm.xlu1 %1007, %v1872_v1   ;;  %v200_v21 = vsel %vm199_vm2, %v198_v16, %v197_v20  ;;  %v205_v22 = vsel %vm204_vm3, %v203_v17, %v202_v18  ;;  %v1047_v27 = vmov 3   ;;  %v1048_v28 = vmov 4   ;;  %s896_s17 = scalar_lea.vmem %s1129_s10, %s975_s16  ;;  %p181_p4 = scmp.ge.s32.totalorder %s184_s11, 112  }
  0x19   : >> { %214 = vrot.lane.b32.xlu0 %v213_v14, %s1044_s15  ;;  %v208_v24 = vsel %vm207_vm5, %v206_v19, %v205_v22  ;;  %v489_v29 = vrot.slane %v1147_v10, 3  ;;  %v490_v30 = vrot.slane %v1150_v11, 2  ;;  %v1049_v31 = vmov 5  }
  0x1a   : >> { %v1175_v25 = vsel %vm220_vm4, %v200_v21, %v208_v24  ;;  %v739_v33 = vrot.slane %v1150_v11, 3  ;;  %v740_v34 = vrot.slane %v1144_v9, 2  ;;  %v481_v36 = vrot.slane %v1147_v10, 5 }
  0x1b   : >> { %v491_v32 = vsel %vm212_vm0, %v490_v30, %v489_v29  ;;  %v482_v37 = vrot.slane %v1150_v11, 4  ;;  %v484_v38 = vrot.slane %v1144_v9, 3  ;;  %v734_v42 = vrot.slane %v1206_v40, 3 }
  0x1c   : >> { %241 = vperm.xlu1 %1007, %v1870_v3   ;;  %v741_v35 = vsel %vm212_vm0, %v740_v34, %v739_v33  ;;  %v733_v43 = vsel %vm204_vm3, %v206_v19, %v203_v17  ;;  %v1050_v44 = vmov 6   ;;  %v492_v46 = vrot.slane %v1144_v9, 1 }
  0x1d   : >> { %236 = vperm.xlu0 %1008, %v1871_v2   ;;  %v483_v39 = vsel %vm204_vm3, %v482_v37, %v481_v36  ;;  %v735_v45 = vsel %vm207_vm5, %v734_v42, %v733_v43  ;;  %v1051_v47 = vmov 7   ;;  %v610_v49 = vrot.slane %v1150_v11, 6 }
  0x1e   : >> { %v485_v41 = vsel %vm207_vm5, %v484_v38, %v483_v39  ;;  %v616_v48 = vsel %vm212_vm0, %v492_v46, %v490_v30  ;;  %v611_v50 = vrot.slane %v1144_v9, 5  ;;  %v613_v51 = vrot.slane %v1206_v40, 4 }
  0x1f   : >> { %v1052_v54 = vmov 8   ;;  %v742_v55 = vrot.slane %v1206_v40, 1  ;;  %v1256_v60 = vshrl.u32 %v244_v58, 7  ;;  %vm222_vm6 = vcmask 1045504  }
  0x20   : >> { %1009 = vset.pattern.permute.xlu1 %v1045_v23  ;;  %v612_v52 = vsel %vm204_vm3, %v611_v50, %v610_v49  ;;  %vm897_vm7 = vcmask 916480  }
  0x21   : >> { %253 = vperm.xlu1 %1009, %v1873_v0   ;;  %1010 = vset.pattern.permute.xlu0 %v1045_v23  ;;  %v1227_v53 = vsel %vm207_vm5, %v613_v51, %v612_v52  ;;  %v1261_v63 = vsub.s32 0, %v1256_v60  ;;  %v1270_v14 = vsub.s32 1, %v1256_v60  ;;  %v1309_v36 = vsub.s32 4, %v1256_v60 }
  0x22   : >> { %257 = vperm.xlu0 %1010, %v1872_v1  }
  0x23   : >> { %1879 = vst [vmem:[#allocation11_spill] sm:$0xff] %v1261_v63 }
  0x25   : >> { %261 = vperm.xlu1 %1009, %v1871_v2  }
  0x26   : >> { %1011 = vset.pattern.permute.xlu0 %v1046_v26 }
  0x27   : >> { %281 = vperm.xlu0 %1011, %v1873_v0  }
  0x29   : >> { %265 = vperm.xlu1 %1009, %v1870_v3  }
  0x2b   : >> { %293 = vperm.xlu0 %1011, %v1870_v3  }
  0x2d   : >> { %1012 = vset.pattern.permute.xlu1 %v1046_v26 }
  0x2e   : >> { %285 = vperm.xlu1 %1012, %v1872_v1  }
  0x2f   : >> { %1014 = vset.pattern.permute.xlu0 %v1047_v27 }
  0x30   : >> { %313 = vperm.xlu0 %1014, %v1872_v1  }
  0x32   : >> { %289 = vperm.xlu1 %1012, %v1871_v2  }
  0x34   : >> { %1015 = vset.pattern.permute.xlu0 %v1048_v28 }
  0x35   : >> { %337 = vperm.xlu0 %1015, %v1873_v0  }
  0x36   : >> { %1013 = vset.pattern.permute.xlu1 %v1047_v27 }
  0x37   : >> { %309 = vperm.xlu1 %1013, %v1873_v0  }
  0x39   : >> { %349 = vperm.xlu0 %1015, %v1870_v3  }
  0x3b   : >> { %317 = vperm.xlu1 %1013, %v1871_v2  }
  0x3d   : >> { %1018 = vset.pattern.permute.xlu0 %v1049_v31 }
  0x3e   : >> { %369 = vperm.xlu0 %1018, %v1872_v1  }
  0x3f   : >> { %321 = vperm.xlu1 %1013, %v1870_v3  }
  0x42   : >> { %493 = vrot.lane.b32.xlu0 %v491_v32, %s1044_s15 }
  0x43   : >> { %1016 = vset.pattern.permute.xlu1 %v1048_v28 }
  0x44   : >> { %341 = vperm.xlu1 %1016, %v1872_v1  }
  0x46   : >> { %743 = vrot.lane.b32.xlu0 %v741_v35, %s1044_s15 }
  0x48   : >> { %345 = vperm.xlu1 %1016, %v1871_v2  }
  0x4a   : >> { %377 = vperm.xlu0 %1018, %v1870_v3  }
  0x4c   : >> { %1017 = vset.pattern.permute.xlu1 %v1049_v31  ;;  %v1301_v31 = vsub.s32 3, %v1256_v60 }
  0x4d   : >> { %365 = vperm.xlu1 %1017, %v1873_v0  }
  0x4e   : >> { %1020 = vset.pattern.permute.xlu0 %v1050_v44 }
  0x4f   : >> { %397 = vperm.xlu0 %1020, %v1872_v1  }
  0x51   : >> { %486 = vrot.lane.b32.xlu1 %v485_v41, %s1044_s15 }
  0x53   : >> { %1021 = vset.pattern.permute.xlu0 %v1051_v47 }
  0x54   : >> { %421 = vperm.xlu0 %1021, %v1873_v0  }
  0x55   : >> { %736 = vrot.lane.b32.xlu1 %v735_v45, %s1044_s15 }
  0x58   : >> { %433 = vperm.xlu0 %1021, %v1870_v3  }
  0x59   : >> { %617 = vrot.lane.b32.xlu1 %v616_v48, %s1044_s15 }
  0x5c   : >> { %1024 = vset.pattern.permute.xlu0 %v1052_v54 }
  0x5d   : >> { %373 = vperm.xlu1 %1017, %v1871_v2   ;;  %453 = vperm.xlu0 %1024, %v1872_v1  }
  0x61   : >> { %1019 = vset.pattern.permute.xlu1 %v1050_v44  ;;  %495 = vrot.lane.b32.xlu0 %v492_v46, %s1044_s15 }
  0x62   : >> { %393 = vperm.xlu1 %1019, %v1873_v0   ;;  %1026 = vset.pattern.permute.xlu0 %v1043_v8 }
  0x65   : >> { %745 = vrot.lane.b32.xlu0 %v742_v55, %s1044_s15 }
  0x66   : >> { %401 = vperm.xlu1 %1019, %v1871_v2  }
  0x69   : >> { %874 = vperm.xlu0 %1026, %v1874_v5  }
  0x6a   : >> { %405 = vperm.xlu1 %1019, %v1870_v3  }
  0x6e   : >> { %1022 = vset.pattern.permute.xlu1 %v1051_v47 }
  0x6f   : >> { %425 = vperm.xlu1 %1022, %v1872_v1  }
  0x73   : >> { %429 = vperm.xlu1 %1022, %v1871_v2  }
  0x77   : >> { %1023 = vset.pattern.permute.xlu1 %v1052_v54 }
  0x78   : >> { %449 = vperm.xlu1 %1023, %v1873_v0  }
  0x7c   : >> { %457 = vperm.xlu1 %1023, %v1871_v2  }
  0x80   : >> { %461 = vperm.xlu1 %1023, %v1870_v3   ;;  %v438_v3 = vsub.s32 7, %v1256_v60 }
  0x84   : >> { %619 = vrot.lane.b32.xlu1 %v1206_v40, %s1044_s15 }
  0x85   : >> { %1025 = vset.pattern.permute.xlu1 %v1043_v8 }
  0x87   : >> { %v1252_v57 = vpop.permute.xlu0 %216 }
  0x88   : >> { %869 = vperm.xlu1 %1025, %v1875_v4  }
  0x8b   : >> { %v215_v61 = vpop.permute.xlu0 %214 }
  0x8c   : >> { %879 = vperm.xlu1 %1025, %v1876_v6   ;;  %v1265_v8 = vsel %vm222_vm6, %v1175_v25, %v215_v61  ;;  %v1289_v25 = vsub.s32 2, %v1256_v60 }
  0x8d   : >> { %v247_v16 = vrot.slane %v1265_v8, %v1261_v63  ;;  %v271_v18 = vrot.slane %v1265_v8, %v1270_v14  ;;  %v327_v39 = vrot.slane %v1265_v8, %v1301_v31  ;;  %v355_v45 = vrot.slane %v1265_v8, %v1309_v36 }
  0x8e   : >> { %v299_v28 = vrot.slane %v1265_v8, %v1289_v25 }
  0x90   : >> { %884 = vperm.xlu1 %1025, %v1877_v7  }
  0x93   : >> { %v1250_v56 = vpop.permute.xlu1 %226 }
  0x94   : >> { %v248_v34 = vmul.f32 %v247_v16, %v1250_v56 }
  0x97   : >> { %v1254_v59 = vpop.permute.xlu1 %231 }
  0x98   : >> { %1878 = vst [vmem:[#allocation10_spill] sm:$0xff] %v1254_v59 }
  0x9b   : >> { %v1258_v62 = vpop.permute.xlu1 %241 }
  0x9c   : >> { %v1267_v12 = vpop.permute.xlu0 %236 }
  0x9d   : >> { %v250_v17 = vmul.f32 %v247_v16, %v1267_v12 }
  0xa0   : >> { %v1272_v15 = vpop.permute.xlu1 %253 }
  0xa1   : >> { %v1279_v19 = vpop.permute.xlu0 %257  ;;  %v272_v29 = vmul.f32 %v271_v18, %v1272_v15 }
  0xa2   : >> { %1880 = vst [vmem:[#allocation12_spill] sm:$0xff] %v1279_v19  ;;  %v273_v58 = vmul.f32 %v271_v18, %v1279_v19 }
  0xa3   : >> { %v276_v38 = vadd.f32 %v272_v29, %v248_v34  ;;  %v476_v29 = vrot.slane %v1147_v10, 1 }
  0xa4   : >> { %v1281_v20 = vpop.permute.xlu1 %261 }
  0xa5   : >> { %v274_v21 = vmul.f32 %v271_v18, %v1281_v20 }
  0xa6   : >> { %v1286_v24 = vpop.permute.xlu0 %281 }
  0xa7   : >> { %v278_v22 = vadd.f32 %v274_v21, %v250_v17  ;;  %v300_v35 = vmul.f32 %v299_v28, %v1286_v24 }
  0xa8   : >> { %v1284_v23 = vpop.permute.xlu1 %265 }
  0xa9   : >> { %v304_v43 = vadd.f32 %v300_v35, %v276_v38  ;;  %v275_v21 = vmul.f32 %v271_v18, %v1284_v23  ;;  %v1340_v38 = vsub.s32 5, %v1256_v60 }
  0xaa   : >> { %v1291_v26 = vpop.permute.xlu0 %293 }
  0xab   : >> { %1881 = vst [vmem:[#allocation13_spill] sm:$0xff] %v1291_v26  ;;  %v303_v34 = vmul.f32 %v299_v28, %v1291_v26 }
  0xad   : >> { %v1293_v27 = vpop.permute.xlu1 %285 }
  0xae   : >> { %1882 = vst [vmem:[#allocation14_spill] sm:$0xff] %v1293_v27  ;;  %v301_v35 = vmul.f32 %v299_v28, %v1293_v27 }
  0xaf   : >> { %v1303_v32 = vpop.permute.xlu0 %313 }
  0xb0   : >> { %1883 = vst [vmem:[#allocation15_spill] sm:$0xff] %v1303_v32  ;;  %v329_v18 = vmul.f32 %v327_v39, %v1303_v32 }
  0xb1   : >> { %v1298_v30 = vpop.permute.xlu1 %289 }
  0xb2   : >> { %v302_v33 = vmul.f32 %v299_v28, %v1298_v30  ;;  %v477_v28 = vsel %vm196_vm1, %v1150_v11, %v476_v29 }
  0xb4   : >> { %v306_v37 = vadd.f32 %v302_v33, %v278_v22  ;;  %v1315_v42 = vpop.permute.xlu0 %337  ;;  %v249_v22 = vmul.f32 %v247_v16, %v1254_v59  ;;  %v251_v33 = vmul.f32 %v247_v16, %v1258_v62  ;;  %v478_v16 = vrot.slane %v1144_v9, 7 }
  0xb5   : >> { %v356_v47 = vmul.f32 %v355_v45, %v1315_v42 }
  0xb6   : >> { %v1313_v41 = vpop.permute.xlu1 %309  ;;  %v606_v29 = vsel %vm196_vm1, %v478_v16, %v1150_v11 }
  0xb7   : >> { %v328_v44 = vmul.f32 %v327_v39, %v1313_v41 }
  0xb8   : >> { %v1323_v49 = vpop.permute.xlu0 %349 }
  0xb9   : >> { %v332_v46 = vadd.f32 %v328_v44, %v304_v43  ;;  %1884 = vst [vmem:[#allocation16_spill] sm:$0xff] %v1323_v49  ;;  %v359_v4 = vmul.f32 %v355_v45, %v1323_v49 }
  0xba   : >> { %v1321_v48 = vpop.permute.xlu1 %317 }
  0xbb   : >> { %v360_v50 = vadd.f32 %v356_v47, %v332_v46  ;;  %v330_v51 = vmul.f32 %v327_v39, %v1321_v48  ;;  %v279_v46 = vadd.f32 %v275_v21, %v251_v33  ;;  %v1358_v21 = vrot.slane %v1265_v8, %v1340_v38 }
  0xbc   : >> { %v1363_v33 = vsub.s32 6, %v1256_v60 }
  0xbd   : >> { %v334_v52 = vadd.f32 %v330_v51, %v306_v37  ;;  %v1328_v55 = vpop.permute.xlu0 %369  ;;  %v277_v37 = vadd.f32 %v273_v58, %v249_v22  ;;  %v607_v51 = vrot.slane %v1206_v40, 6  ;;  %v307_v58 = vadd.f32 %v303_v34, %v279_v46 }
  0xbe   : >> { %v1326_v54 = vpop.permute.xlu1 %321  ;;  %1886 = vst [vmem:[#allocation18_spill] sm:$0xff] %v1328_v55  ;;  %v1889_v46 = vrot.slane %v1150_v11, 1  ;;  %v385_v11 = vmul.f32 %v1358_v21, %v1328_v55 }
  0xbf   : >> { %1885 = vst [vmem:[#allocation17_spill] sm:$0xff] %v1326_v54  ;;  %v331_v47 = vmul.f32 %v327_v39, %v1326_v54  ;;  %v305_v22 = vadd.f32 %v301_v35, %v277_v37  ;;  %v730_v35 = vrot.slane %v1206_v40, 7  ;;  %v479_v37 = vsel %vm199_vm2, %v478_v16, %v477_v28 }
  0xc0   : >> { %v608_v40 = vsel %vm199_vm2, %v607_v51, %v606_v29  ;;  %v1386_v16 = vrot.slane %v1265_v8, %v1363_v33  ;;  %v1406_v29 = vrot.slane %v1265_v8, %v438_v3 }
  0xc1   : >> { %v494_v17 = vpop.permute.xlu0 %493  ;;  %v333_v1 = vadd.f32 %v329_v18, %v305_v22  ;;  %v335_v2 = vadd.f32 %v331_v47, %v307_v58  ;;  %v623_v51 = vsel %vm220_vm4, %v608_v40, %v1227_v53 }
  0xc2   : >> { %1892 = vst [vmem:[#allocation23_spill] sm:$0xff] %v1406_v29 }
  0xc3   : >> { %v1331_v61 = vpop.permute.xlu1 %341 }
  0xc4   : >> { %1887 = vst [vmem:[#allocation19_spill] sm:$0xff] %v1331_v61  ;;  %v357_v13 = vmul.f32 %v355_v45, %v1331_v61 }
  0xc5   : >> { %v1344_v44 = vpop.permute.xlu0 %743 }
  0xc6   : >> { %v361_v18 = vadd.f32 %v357_v13, %v333_v1  ;;  %v1395_v13 = vrot.slane %v1252_v57, %v1261_v63 }
  0xc7   : >> { %v1342_v43 = vpop.permute.xlu1 %345 }
  0xc8   : >> { %v358_v10 = vmul.f32 %v355_v45, %v1342_v43 }
  0xc9   : >> { %v1360_v39 = vpop.permute.xlu0 %377 }
  0xca   : >> { %v1354_v0 = vadd.f32 %v358_v10, %v334_v52  ;;  %1888 = vst [vmem:[#allocation20_spill] sm:$0xff] %v1360_v39  ;;  %v729_v10 = vsel %vm196_vm1, %v1144_v9, %v1889_v46  ;;  %v387_v47 = vmul.f32 %v1358_v21, %v1360_v39  ;;  %v363_v9 = vadd.f32 %v359_v4, %v335_v2 }
  0xcb   : >> { %v731_v1 = vsel %vm199_vm2, %v730_v35, %v729_v10  ;;  %v389_v4 = vadd.f32 %v385_v11, %v361_v18 }
  0xcc   : >> { %v1367_v34 = vpop.permute.xlu1 %365  ;;  %v1402_v22 = vadd.f32 %v387_v47, %v363_v9 }
  0xcd   : >> { %v384_v52 = vmul.f32 %v1358_v21, %v1367_v34 }
  0xce   : >> { %v1390_v60 = vpop.permute.xlu0 %397  ;;  %1891 = vst [vmem:[#allocation22_spill] sm:$0xff] %v1402_v22 }
  0xcf   : >> { %v1382_v58 = vadd.f32 %v384_v52, %v360_v50  ;;  %1890 = vst [vmem:[#allocation21_spill] sm:$0xff] %v1390_v60  ;;  %v413_v50 = vmul.f32 %v1386_v16, %v1390_v60 }
  0xd0   : >> { %v487_v28 = vpop.permute.xlu1 %486 }
  0xd1   : >> { %v499_v45 = vsel %vm220_vm4, %v479_v37, %v487_v28  ;;  %v1429_v46 = vadd.f32 %v413_v50, %v389_v4 }
  0xd2   : >> { %v500_v2 = vsel %vm222_vm6, %v499_v45, %v494_v17 }
  0xd3   : >> { %v1409_v35 = vrot.slane %v500_v2, %v1261_v63  ;;  %v1412_v57 = vrot.slane %v500_v2, %v1270_v14  ;;  %v1415_v52 = vrot.slane %v500_v2, %v1289_v25  ;;  %v1418_v37 = vrot.slane %v500_v2, %v1301_v31  ;;  %1893 = vst [vmem:[#allocation24_spill] sm:$0xff] %v1429_v46  ;;  %v1439_v9 = vpop.permute.xlu0 %421 }
  0xd4   : >> { %v1421_v53 = vrot.slane %v500_v2, %v1309_v36  ;;  %v1424_v17 = vrot.slane %v500_v2, %v1340_v38  ;;  %v1427_v8 = vrot.slane %v500_v2, %v1363_v33  ;;  %v737_v10 = vpop.permute.xlu1 %736  ;;  %1894 = vst [vmem:[#allocation25_spill] sm:$0xff] %v1439_v9  ;;  %v1452_v7 = vrot.slane %v500_v2, %v438_v3 }
  0xd5   : >> { %v506_v18 = vmul.f32 %v1409_v35, %v1254_v59  ;;  %v514_v47 = vmul.f32 %v1412_v57, %v1279_v19  ;;  %v526_v40 = vmul.f32 %v1415_v52, %v1293_v27  ;;  %v538_v11 = vmul.f32 %v1418_v37, %v1303_v32 }
  0xd6   : >> { %v550_v28 = vmul.f32 %v1421_v53, %v1331_v61  ;;  %v562_v45 = vmul.f32 %v1424_v17, %v1328_v55  ;;  %v574_v50 = vmul.f32 %v1427_v8, %v1390_v60  ;;  %v749_v4 = vsel %vm220_vm4, %v731_v1, %v737_v10  ;;  %1895 = vst [vmem:[#allocation26_spill] sm:$0xff] %v1452_v7 }
  0xd7   : >> { %v518_v5 = vadd.f32 %v514_v47, %v506_v18  ;;  %v1450_v6 = vsel %vm222_vm6, %v749_v4, %v1344_v44  ;;  %v1456_v46 = vmul.f32 %v1406_v29, %v1439_v9  ;;  %v1479_v47 = vmul.f32 %v1452_v7, %v1439_v9 }
  0xd8   : >> { %v1460_v32 = vrot.slane %v1450_v6, %v1261_v63  ;;  %v1464_v60 = vrot.slane %v1450_v6, %v1270_v14  ;;  %v1468_v1 = vrot.slane %v1450_v6, %v1289_v25  ;;  %v1472_v44 = vrot.slane %v1450_v6, %v1301_v31  ;;  %v618_v2 = vpop.permute.xlu1 %617 }
  0xd9   : >> { %1896 = vst [vmem:[#allocation27_spill] sm:$0xff] %v1456_v46  ;;  %v530_v10 = vadd.f32 %v526_v40, %v518_v5  ;;  %v1475_v18 = vrot.slane %v1450_v6, %v438_v3  ;;  %1898 = vst [vmem:[#allocation29_spill] sm:$0xff] %v1479_v47  ;;  %v624_v4 = vsel %vm222_vm6, %v623_v51, %v618_v2  ;;  %v434_v46 = vpop.permute.xlu0 %433 }
  0xda   : >> { %v1483_v55 = vrot.slane %v624_v4, %v1261_v63  ;;  %v1486_v19 = vrot.slane %v624_v4, %v1270_v14  ;;  %v1489_v61 = vrot.slane %v624_v4, %v1289_v25  ;;  %v1492_v5 = vrot.slane %v624_v4, %v1301_v31 }
  0xdb   : >> { %1897 = vst [vmem:[#allocation28_spill] sm:$0xff] %v1475_v18  ;;  %v542_v40 = vadd.f32 %v538_v11, %v530_v10  ;;  %v1496_v27 = vmul.f32 %v1475_v18, %v1439_v9  ;;  %v1499_v51 = vrot.slane %v624_v4, %v1309_v36  ;;  %v1501_v2 = vrot.slane %v624_v4, %v438_v3 }
  0xdc   : >> { %v1504_v47 = vmul.f32 %v1406_v29, %v434_v46  ;;  %v1507_v14 = vmul.f32 %v1452_v7, %v434_v46  ;;  %v1510_v25 = vmul.f32 %v1475_v18, %v434_v46  ;;  %v639_v31 = vmul.f32 %v1486_v19, %v1281_v20  ;;  %v374_v11 = vpop.permute.xlu1 %373 }
  0xdd   : >> { %1899 = vst [vmem:[#allocation30_spill] sm:$0xff] %v1496_v27  ;;  %1900 = vst [vmem:[#allocation31_spill] sm:$0xff] %v1501_v2  ;;  %v554_v10 = vadd.f32 %v550_v28, %v542_v40  ;;  %v1515_v27 = vmul.f32 %v1501_v2, %v434_v46  ;;  %v651_v3 = vmul.f32 %v1489_v61, %v1298_v30 }
  0xde   : >> { %1901 = vst [vmem:[#allocation32_spill] sm:$0xff] %v1504_v47  ;;  %1902 = vst [vmem:[#allocation33_spill] sm:$0xff] %v1507_v14  ;;  %v663_v47 = vmul.f32 %v1492_v5, %v1321_v48  ;;  %v675_v14 = vmul.f32 %v1499_v51, %v1342_v43  ;;  %v1524_v9 = vrot.slane %v624_v4, %v1340_v38 }
  0xdf   : >> { %1903 = vst [vmem:[#allocation34_spill] sm:$0xff] %v1510_v25  ;;  %1904 = vst [vmem:[#allocation35_spill] sm:$0xff] %v1515_v27  ;;  %v386_v25 = vmul.f32 %v1358_v21, %v374_v11  ;;  %v507_v28 = vmul.f32 %v1409_v35, %v1267_v12  ;;  %v566_v40 = vadd.f32 %v562_v45, %v554_v10  ;;  %v1543_v10 = vpop.permute.xlu0 %453 }
  0xe0   : >> { %v515_v46 = vmul.f32 %v1412_v57, %v1281_v20  ;;  %v527_v27 = vmul.f32 %v1415_v52, %v1298_v30  ;;  %v539_v18 = vmul.f32 %v1418_v37, %v1321_v48  ;;  %v551_v7 = vmul.f32 %v1421_v53, %v1342_v43  ;;  %1905 = vst [vmem:[#allocation36_spill] sm:$0xff] %v1543_v10 }
  0xe1   : >> { %v1536_v2 = vadd.f32 %v386_v25, %v1354_v0  ;;  %v563_v21 = vmul.f32 %v1424_v17, %v374_v11  ;;  %v631_v45 = vmul.f32 %v1483_v55, %v1267_v12  ;;  %v1545_v29 = vadd.f32 %v574_v50, %v566_v40  ;;  %v394_v0 = vpop.permute.xlu1 %393 }
  0xe2   : >> { %v519_v59 = vadd.f32 %v515_v46, %v507_v28  ;;  %v687_v63 = vmul.f32 %v1524_v9, %v374_v11  ;;  %v757_v39 = vmul.f32 %v1460_v32, %v1267_v12  ;;  %v765_v49 = vmul.f32 %v1464_v60, %v1281_v20 }
  0xe3   : >> { %v643_v25 = vadd.f32 %v639_v31, %v631_v45  ;;  %v777_v26 = vmul.f32 %v1468_v1, %v1298_v30  ;;  %v789_v22 = vmul.f32 %v1472_v44, %v1321_v48  ;;  %v1558_v50 = vrot.slane %v1450_v6, %v1309_v36 }
  0xe4   : >> { %v531_v54 = vadd.f32 %v527_v27, %v519_v59  ;;  %v1562_v28 = vrot.slane %v1450_v6, %v1340_v38  ;;  %v1566_v12 = vmul.f32 %v1395_v13, %v1543_v10  ;;  %v769_v31 = vadd.f32 %v765_v49, %v757_v39 }
  0xe5   : >> { %v655_v20 = vadd.f32 %v651_v3, %v643_v25  ;;  %v629_v30 = vmul.f32 %v1483_v55, %v1250_v56  ;;  %v637_v59 = vmul.f32 %v1486_v19, %v1272_v15  ;;  %v801_v36 = vmul.f32 %v1558_v50, %v1342_v43  ;;  %v402_v40 = vpop.permute.xlu1 %401 }
  0xe6   : >> { %1906 = vst [vmem:[#allocation37_spill] sm:$0xff] %v1566_v12  ;;  %v543_v27 = vadd.f32 %v539_v18, %v531_v54  ;;  %v813_v48 = vmul.f32 %v1562_v28, %v374_v11  ;;  %v661_v38 = vmul.f32 %v1492_v5, %v1313_v41  ;;  %v781_v45 = vadd.f32 %v777_v26, %v769_v31 }
  0xe7   : >> { %v667_v46 = vadd.f32 %v663_v47, %v655_v20  ;;  %v641_v3 = vadd.f32 %v637_v59, %v629_v30  ;;  %v685_v49 = vmul.f32 %v1524_v9, %v1367_v34  ;;  %v1580_v25 = vrot.slane %v624_v4, %v1363_v33 }
  0xe8   : >> { %v555_v39 = vadd.f32 %v551_v7, %v543_v27  ;;  %v412_v54 = vmul.f32 %v1386_v16, %v394_v0  ;;  %v505_v43 = vmul.f32 %v1409_v35, %v1250_v56  ;;  %v793_v11 = vadd.f32 %v789_v22, %v781_v45 }
  0xe9   : >> { %v679_v18 = vadd.f32 %v675_v14, %v667_v46  ;;  %v513_v12 = vmul.f32 %v1412_v57, %v1272_v15  ;;  %v525_v26 = vmul.f32 %v1415_v52, %v1286_v24  ;;  %v537_v7 = vmul.f32 %v1418_v37, %v1313_v41  ;;  %v1596_v31 = vpop.permute.xlu1 %405 }
  0xea   : >> { %v567_v47 = vadd.f32 %v563_v21, %v555_v39  ;;  %v1590_v20 = vadd.f32 %v412_v54, %v1382_v58  ;;  %v549_v4 = vmul.f32 %v1421_v53, %v1315_v42  ;;  %v805_v22 = vadd.f32 %v801_v36, %v793_v11 }
  0xeb   : >> { %v691_v14 = vadd.f32 %v687_v63, %v679_v18  ;;  %v517_v30 = vadd.f32 %v513_v12, %v505_v43  ;;  %v561_v59 = vmul.f32 %v1424_v17, %v1367_v34  ;;  %v573_v27 = vmul.f32 %v1427_v8, %v394_v0 }
  0xec   : >> { %v649_v58 = vmul.f32 %v1489_v61, %v1286_v24  ;;  %v673_v21 = vmul.f32 %v1499_v51, %v1315_v42  ;;  %v697_v46 = vmul.f32 %v1580_v25, %v394_v0  ;;  %v817_v45 = vadd.f32 %v813_v48, %v805_v22 }
  0xed   : >> { %v529_v39 = vadd.f32 %v525_v26, %v517_v30  ;;  %v755_v63 = vmul.f32 %v1460_v32, %v1250_v56  ;;  %v763_v12 = vmul.f32 %v1464_v60, %v1272_v15  ;;  %v775_v54 = vmul.f32 %v1468_v1, %v1286_v24 }
  0xee   : >> { %v653_v36 = vadd.f32 %v649_v58, %v641_v3  ;;  %v787_v43 = vmul.f32 %v1472_v44, %v1313_v41  ;;  %v799_v18 = vmul.f32 %v1558_v50, %v1315_v42  ;;  %v811_v48 = vmul.f32 %v1562_v28, %v1367_v34  ;;  %v1622_v15 = vpop.permute.xlu1 %425 }
  0xef   : >> { %v541_v11 = vadd.f32 %v537_v7, %v529_v39  ;;  %v767_v10 = vadd.f32 %v763_v12, %v755_v63  ;;  %v1620_v56 = vrot.slane %v1450_v6, %v1363_v33  ;;  %v414_v24 = vmul.f32 %v1386_v16, %v402_v40 }
  0xf0   : >> { %v665_v3 = vadd.f32 %v661_v38, %v653_v36  ;;  %v575_v26 = vmul.f32 %v1427_v8, %v402_v40  ;;  %v699_v41 = vmul.f32 %v1580_v25, %v402_v40  ;;  %v516_v12 = vmul.f32 %v1412_v57, %v1284_v23 }
  0xf1   : >> { %v553_v22 = vadd.f32 %v549_v4, %v541_v11  ;;  %v779_v42 = vadd.f32 %v775_v54, %v767_v10  ;;  %v823_v7 = vmul.f32 %v1620_v56, %v394_v0  ;;  %v825_v30 = vmul.f32 %v1620_v56, %v402_v40  ;;  %v1908_v54 = vld [vmem:[#allocation22_spill] sm:$0xff]  ;;  %v1909_v11 = vld [vmem:[#allocation13_spill] sm:$0xff] }
  0xf2   : >> { %v677_v34 = vadd.f32 %v673_v21, %v665_v3  ;;  %v1630_v58 = vadd.f32 %v414_v24, %v1536_v2  ;;  %v1632_v6 = vadd.f32 %v575_v26, %v567_v47  ;;  %v1634_v33 = vadd.f32 %v699_v41, %v691_v14  ;;  %v1640_v10 = vpop.permute.xlu1 %429  ;;  %v1907_v21 = vld [vmem:[#allocation17_spill] sm:$0xff]  ;;  %v1911_v26 = vld [vmem:[#allocation20_spill] sm:$0xff] }
  0xf3   : >> { %v565_v38 = vadd.f32 %v561_v59, %v553_v22  ;;  %v791_v39 = vadd.f32 %v787_v43, %v779_v42  ;;  %v1636_v63 = vadd.f32 %v825_v30, %v817_v45  ;;  %v632_v4 = vmul.f32 %v1483_v55, %v1258_v62 }
  0xf4   : >> { %v689_v0 = vadd.f32 %v685_v49, %v677_v34  ;;  %v640_v40 = vmul.f32 %v1486_v19, %v1284_v23  ;;  %v664_v2 = vmul.f32 %v1492_v5, %v1907_v21  ;;  %v415_v47 = vmul.f32 %v1386_v16, %v1596_v31 }
  0xf5   : >> { %v1648_v14 = vadd.f32 %v573_v27, %v565_v38  ;;  %v803_v59 = vadd.f32 %v799_v18, %v791_v39  ;;  %v508_v45 = vmul.f32 %v1409_v35, %v1258_v62  ;;  %v528_v3 = vmul.f32 %v1415_v52, %v1909_v11  ;;  %v1910_v18 = vld [vmem:[#allocation16_spill] sm:$0xff] }
  0xf6   : >> { %v1654_v36 = vadd.f32 %v697_v46, %v689_v0  ;;  %v644_v49 = vadd.f32 %v640_v40, %v632_v4  ;;  %v1657_v43 = vadd.f32 %v415_v47, %v1908_v54  ;;  %v540_v27 = vmul.f32 %v1418_v37, %v1907_v21  ;;  %v496_v0 = vpop.permute.xlu0 %495  ;;  %v1914_v54 = vld [vmem:[#allocation14_spill] sm:$0xff] }
  0xf7   : >> { %v815_v24 = vadd.f32 %v811_v48, %v803_v59  ;;  %v520_v16 = vadd.f32 %v516_v12, %v508_v45  ;;  %v552_v35 = vmul.f32 %v1421_v53, %v1910_v18  ;;  %v564_v57 = vmul.f32 %v1424_v17, %v1911_v26  ;;  %v1673_v48 = vpop.permute.xlu1 %449 }
  0xf8   : >> { %v576_v46 = vmul.f32 %v1427_v8, %v1596_v31  ;;  %v652_v41 = vmul.f32 %v1489_v61, %v1909_v11  ;;  %v676_v52 = vmul.f32 %v1499_v51, %v1910_v18  ;;  %v688_v53 = vmul.f32 %v1524_v9, %v1911_v26 }
  0xf9   : >> { %v1675_v22 = vadd.f32 %v823_v7, %v815_v24  ;;  %v532_v37 = vadd.f32 %v528_v3, %v520_v16  ;;  %v700_v17 = vmul.f32 %v1580_v25, %v1596_v31  ;;  %v758_v8 = vmul.f32 %v1460_v32, %v1258_v62  ;;  %v1915_v3 = vld [vmem:[#allocation19_spill] sm:$0xff] }
  0xfa   : >> { %v656_v42 = vadd.f32 %v652_v41, %v644_v49  ;;  %v766_v30 = vmul.f32 %v1464_v60, %v1284_v23  ;;  %v778_v34 = vmul.f32 %v1468_v1, %v1909_v11  ;;  %v790_v7 = vmul.f32 %v1472_v44, %v1907_v21  ;;  %v1912_v23 = vld [vmem:[#allocation11_spill] sm:$0xff]  ;;  %v1913_v49 = vld [vmem:[#allocation10_spill] sm:$0xff] }
  0xfb   : >> { %v544_v38 = vadd.f32 %v540_v27, %v532_v37  ;;  %v802_v39 = vmul.f32 %v1558_v50, %v1910_v18  ;;  %v814_v4 = vmul.f32 %v1562_v28, %v1911_v26  ;;  %v826_v62 = vmul.f32 %v1620_v56, %v1596_v31  ;;  %v1698_v45 = vpop.permute.xlu1 %457  ;;  %v1916_v27 = vld [vmem:[#allocation23_spill] sm:$0xff]  ;;  %v1917_v18 = vld [vmem:[#allocation26_spill] sm:$0xff]  ;;  %v1918_v37 = vld [vmem:[#allocation12_spill] sm:$0xff] }
  0xfc   : >> { %v668_v40 = vadd.f32 %v664_v2, %v656_v42  ;;  %v770_v47 = vadd.f32 %v766_v30, %v758_v8  ;;  %v1696_v59 = vrot.slane %v496_v0, %v1912_v23  ;;  %v630_v21 = vmul.f32 %v1483_v55, %v1913_v49  ;;  %v1919_v42 = vld [vmem:[#allocation15_spill] sm:$0xff]  ;;  %v1920_v8 = vld [vmem:[#allocation18_spill] sm:$0xff] }
  0xfd   : >> { %v556_v12 = vadd.f32 %v552_v35, %v544_v38  ;;  %v650_v11 = vmul.f32 %v1489_v61, %v1914_v54  ;;  %v674_v24 = vmul.f32 %v1499_v51, %v1915_v3  ;;  %v441_v31 = vmul.f32 %v1916_v27, %v1622_v15 }
  0xfe   : >> { %v680_v2 = vadd.f32 %v676_v52, %v668_v40  ;;  %v782_v16 = vadd.f32 %v778_v34, %v770_v47  ;;  %v586_v26 = vmul.f32 %v1917_v18, %v1622_v15  ;;  %v638_v35 = vmul.f32 %v1486_v19, %v1918_v37  ;;  %v1921_v52 = vld [vmem:[#allocation24_spill] sm:$0xff]  ;;  %v1922_v40 = vld [vmem:[#allocation21_spill] sm:$0xff]  ;;  %v1923_v47 = vld [vmem:[#allocation31_spill] sm:$0xff] }
  0xff   : >> { %v568_v41 = vadd.f32 %v564_v57, %v556_v12  ;;  %v662_v55 = vmul.f32 %v1492_v5, %v1919_v42  ;;  %v686_v61 = vmul.f32 %v1524_v9, %v1920_v8  ;;  %v1717_v34 = vadd.f32 %v441_v31, %v1921_v52  ;;  %v1925_v52 = vld [vmem:[#allocation27_spill] sm:$0xff] }
 0x100   : >> { %v692_v30 = vadd.f32 %v688_v53, %v680_v2  ;;  %v794_v51 = vadd.f32 %v790_v7, %v782_v16  ;;  %v1720_v38 = vadd.f32 %v586_v26, %v1545_v29  ;;  %v642_v57 = vadd.f32 %v638_v35, %v630_v21  ;;  %v746_v29 = vpop.permute.xlu0 %745  ;;  %v1734_v2 = vpop.permute.xlu1 %461 }
 0x101   : >> { %v1722_v0 = vadd.f32 %v576_v46, %v568_v41  ;;  %v698_v19 = vmul.f32 %v1580_v25, %v1922_v40  ;;  %v710_v5 = vmul.f32 %v1923_v47, %v1622_v15  ;;  %v756_v53 = vmul.f32 %v1460_v32, %v1913_v49 }
 0x102   : >> { %v1728_v12 = vadd.f32 %v700_v17, %v692_v30  ;;  %v806_v9 = vadd.f32 %v802_v39, %v794_v51  ;;  %v764_v7 = vmul.f32 %v1464_v60, %v1918_v37  ;;  %v654_v46 = vadd.f32 %v650_v11, %v642_v57  ;;  %v1924_v11 = vld [vmem:[#allocation28_spill] sm:$0xff] }
 0x103   : >> { %v776_v21 = vmul.f32 %v1468_v1, %v1914_v54  ;;  %v788_v25 = vmul.f32 %v1472_v44, %v1919_v42  ;;  %v800_v17 = vmul.f32 %v1558_v50, %v1915_v3  ;;  %v812_v32 = vmul.f32 %v1562_v28, %v1920_v8 }
 0x104   : >> { %v818_v39 = vadd.f32 %v814_v4, %v806_v9  ;;  %v768_v16 = vadd.f32 %v764_v7, %v756_v53  ;;  %v824_v60 = vmul.f32 %v1620_v56, %v1922_v40  ;;  %v666_v49 = vadd.f32 %v662_v55, %v654_v46  ;;  %v620_v37 = vpop.permute.xlu1 %619  ;;  %v1926_v40 = vld [vmem:[#allocation29_spill] sm:$0xff] }
 0x105   : >> { %v836_v31 = vmul.f32 %v1924_v11, %v1622_v15  ;;  %v846_v1 = vrot.slane %v746_v29, %v1912_v23  ;;  %v442_v44 = vmul.f32 %v1916_v27, %v1640_v10  ;;  %v587_v4 = vmul.f32 %v1917_v18, %v1640_v10  ;;  %v1927_v53 = vld [vmem:[#allocation25_spill] sm:$0xff] }
 0x106   : >> { %v1751_v54 = vadd.f32 %v826_v62, %v818_v39  ;;  %v780_v50 = vadd.f32 %v776_v21, %v768_v16  ;;  %v711_v28 = vmul.f32 %v1923_v47, %v1640_v10  ;;  %v678_v3 = vadd.f32 %v674_v24, %v666_v49 }
 0x107   : >> { %v446_v56 = vadd.f32 %v442_v44, %v1630_v58  ;;  %v837_v15 = vmul.f32 %v1924_v11, %v1640_v10  ;;  %v468_v26 = vmul.f32 %v1395_v13, %v1673_v48  ;;  %v591_v62 = vadd.f32 %v587_v4, %v1632_v6 }
 0x108   : >> { %v792_v41 = vadd.f32 %v788_v25, %v780_v50  ;;  %v715_v27 = vadd.f32 %v711_v28, %v1634_v33  ;;  %v597_v18 = vmul.f32 %v1696_v59, %v1673_v48  ;;  %v690_v35 = vadd.f32 %v686_v61, %v678_v3  ;;  %v1929_v50 = vld [vmem:[#allocation36_spill] sm:$0xff] }
 0x109   : >> { %v841_v24 = vadd.f32 %v837_v15, %v1636_v63  ;;  %v847_v58 = vmul.f32 %v846_v1, %v1673_v48  ;;  %v470_v10 = vmul.f32 %v1395_v13, %v1698_v45  ;;  %v599_v55 = vmul.f32 %v1696_v59, %v1698_v45 }
 0x10a   : >> { %v804_v42 = vadd.f32 %v800_v17, %v792_v41  ;;  %v849_v6 = vmul.f32 %v846_v1, %v1698_v45  ;;  %v471_v33 = vmul.f32 %v1395_v13, %v1734_v2  ;;  %v702_v8 = vadd.f32 %v698_v19, %v690_v35  ;;  %v1928_v19 = vld [vmem:[#allocation30_spill] sm:$0xff]  ;;  %v1931_v41 = vld [vmem:[#allocation32_spill] sm:$0xff]  ;;  %v1933_v35 = vld [vmem:[#allocation35_spill] sm:$0xff] }
 0x10b   : >> { %v600_v61 = vmul.f32 %v1696_v59, %v1734_v2  ;;  %v850_v63 = vmul.f32 %v846_v1, %v1734_v2  ;;  %v720_v30 = vrot.slane %v620_v37, %v1912_v23  ;;  %v444_v57 = vadd.f32 %v1925_v52, %v1590_v20  ;;  %v870_v23 = vpop.permute.xlu1 %869 }
 0x10c   : >> { %v816_v51 = vadd.f32 %v812_v32, %v804_v42  ;;  %v589_v9 = vadd.f32 %v1926_v40, %v1648_v14  ;;  %v709_v7 = vmul.f32 %v1923_v47, %v1927_v53  ;;  %v714_v29 = vadd.f32 %v710_v5, %v702_v8 }
 0x10d   : >> { %v721_v13 = vmul.f32 %v720_v30, %v1673_v48  ;;  %v839_v46 = vadd.f32 %v1928_v19, %v1675_v22  ;;  %v723_v21 = vmul.f32 %v720_v30, %v1698_v45  ;;  %v472_v17 = vadd.f32 %v468_v26, %v444_v57 }
 0x10e   : >> { %v828_v25 = vadd.f32 %v824_v60, %v816_v51  ;;  %v601_v39 = vadd.f32 %v597_v18, %v589_v9  ;;  %v713_v20 = vadd.f32 %v709_v7, %v1654_v36  ;;  %v474_v32 = vadd.f32 %v470_v10, %v446_v56  ;;  %v1930_v36 = vld [vmem:[#allocation37_spill] sm:$0xff] }
 0x10f   : >> { %v851_v16 = vadd.f32 %v847_v58, %v839_v46  ;;  %v603_v14 = vadd.f32 %v599_v55, %v591_v62  ;;  %v727_v49 = vadd.f32 %v723_v21, %v715_v27  ;;  %v853_v48 = vadd.f32 %v849_v6, %v841_v24  ;;  %v880_v27 = vpop.permute.xlu1 %879 }
 0x110   : >> { %v840_v11 = vadd.f32 %v836_v31, %v828_v25  ;;  %v725_v47 = vadd.f32 %v721_v13, %v713_v20  ;;  %v855_v5 = vmax.f32 %v472_v17, %v601_v39  ;;  %v598_v22 = vmul.f32 %v1696_v59, %v1929_v50 }
 0x111   : >> { %v857_v44 = vmax.f32 %v474_v32, %v603_v14  ;;  %v722_v45 = vmul.f32 %v720_v30, %v1929_v50  ;;  %v848_v60 = vmul.f32 %v846_v1, %v1929_v50  ;;  %v861_v28 = vmax.f32 %v727_v49, %v853_v48  ;;  %v1932_v1 = vld [vmem:[#allocation33_spill] sm:$0xff] }
 0x112   : >> { %v859_v4 = vmax.f32 %v725_v47, %v851_v16  ;;  %v473_v3 = vadd.f32 %v1930_v36, %v1717_v34  ;;  %v724_v56 = vmul.f32 %v720_v30, %v1734_v2  ;;  %v602_v31 = vadd.f32 %v598_v22, %v1720_v38  ;;  %v1934_v38 = vld [vmem:[#allocation34_spill] sm:$0xff] }
 0x113   : >> { %v726_v15 = vadd.f32 %v722_v45, %v714_v29  ;;  %v852_v26 = vadd.f32 %v848_v60, %v840_v11  ;;  %v447_v62 = vadd.f32 %v1931_v41, %v1657_v43  ;;  %v865_v18 = vmax.f32 %v857_v44, %v861_v28  ;;  %v875_v43 = vpop.permute.xlu0 %874 }
 0x114   : >> { %v863_v59 = vmax.f32 %v855_v5, %v859_v4  ;;  %v592_v37 = vadd.f32 %v1932_v1, %v1722_v0  ;;  %v716_v34 = vadd.f32 %v1933_v35, %v1728_v12  ;;  %v856_v2 = vmax.f32 %v473_v3, %v602_v31 }
 0x115   : >> { %v860_v24 = vmax.f32 %v726_v15, %v852_v26  ;;  %v475_v58 = vadd.f32 %v471_v33, %v447_v62  ;;  %v842_v10 = vadd.f32 %v1934_v38, %v1751_v54  ;;  %v889_v55 = vadd.f32 %v880_v27, %v865_v18  ;;  %v885_v33 = vpop.permute.xlu1 %884 }
 0x116   : >> { %v887_v42 = vadd.f32 %v870_v23, %v863_v59  ;;  %v604_v6 = vadd.f32 %v600_v61, %v592_v37  ;;  %v728_v8 = vadd.f32 %v724_v56, %v716_v34 }
 0x117   : >> { %v864_v30 = vmax.f32 %v856_v2, %v860_v24  ;;  %v854_v51 = vadd.f32 %v850_v63, %v842_v10  ;;  %v893_v0 = vmax.f32 %v889_v55, 0.0 }
 0x118   : >> { %v891_v52 = vmax.f32 %v887_v42, 0.0  ;;  %v858_v57 = vmax.f32 %v475_v58, %v604_v6 }
 0x119   : >> { %v888_v40 = vadd.f32 %v875_v43, %v864_v30  ;;  %v862_v12 = vmax.f32 %v728_v8, %v854_v51  ;;  %900 = vst.msk [vmem:[%s896_s17 + $0x10] sm:$0xff] %vm897_vm7, %v893_v0 }
 0x11a   : >> { %898 = vst.msk [vmem:[%s896_s17] sm:$0xff] %vm897_vm7, %v891_v52 }
 0x11b   : >> { %v892_v54 = vmax.f32 %v888_v40, 0.0  ;;  %v866_v9 = vmax.f32 %v858_v57, %v862_v12  ;;  %183 = sbr.rel (!%p181_p4) target bundleno = 18 (0x12), region = 71 }
 0x11d   : >> { %899 = vst.msk [vmem:[%s896_s17 + $0x8] sm:$0xff] %vm897_vm7, %v892_v54  ;;  %v890_v61 = vadd.f32 %v885_v33, %v866_v9 }
 0x11f   : >> { %v894_v53 = vmax.f32 %v890_v61, 0.0 }
 0x121   : >> { %901 = vst.msk [vmem:[%s896_s17 + $0x18] sm:$0xff] %vm897_vm7, %v894_v53 }
 0x122 PF: > { %s13_s12 = sadd.s32 1, %s1037_s12  }
 0x123   : > { %p10_p5 = scmp.ge.s32.totalorder %s13_s12, 4  }
 0x125   :  { %12 = sbr.rel (!%p10_p5) target bundleno = 1 (0x1), region = 82 }

// kernel: cnn_forward.5
= control target key start
LH: loop header
LB: loop body
LE: loop exit
PB: predicated region body
PF: predicated region fallthrough
CT: control target
= control target key end

     0   :  { %s1753_s12 = smov 0   ;;  %s2125_s0 = inlined_call_operand.vmem [shape: f32[2,114,64,57], index: 0, kind: input, shape index: {}]   ;;  %s2126_s1 = inlined_call_operand.vmem [shape: f32[32,288], index: 1, kind: input, shape index: {}]   ;;  %s2127_s2 = inlined_call_operand.vmem [shape: f32[32,1], index: 2, kind: input, shape index: {}]   ;;  %s2128_s3 = inlined_call_operand.vmem [shape: f32[2,56,32,56], index: 3, kind: output, shape index: {}]  }
   0x1 LB: > { %s1160_s13 = sadd.s32 4294967295, %s1725_s12   ;;  %p1164_p0 = scmp.ge.s32.totalorder %s1725_s12, 1  ;;  %s1725_s12 = sphi %s1753_s12, %s13_s12  }
   0x2   : > { %p137_p1 = scmp.lt.s32.totalorder %s1725_s12, 3 }
   0x4   : > { %p138_p2 = pnand %p1164_p0, %p137_p1 }
   0x5   : > { %p161_p3 = scmp.lt.s32.totalorder (!%p138_p2), %s1160_s13, 1  ;;  %v1764_v0 = vld [vmem:[%s2126_s1] sm:$0xff] (!%p138_p2)  ;;  %v1769_v1 = vld [vmem:[%s2126_s1 + $0x8] sm:$0xff] (!%p138_p2)  ;;  %v1774_v2 = vld [vmem:[%s2126_s1 + $0x10] sm:$0xff] (!%p138_p2)  ;;  %s1851_s29 = smov (!%p138_p2), 0  }
   0x6   : > { %141 = sbr.rel (%p138_p2) target bundleno = 458 (0x1ca), region = 32  ;;  %v1779_v3 = vld [vmem:[%s2126_s1 + $0x18] sm:$0xff] (!%p138_p2)  ;;  %v1784_v4 = vld [vmem:[%s2126_s1 + $0x20] sm:$0xff] (!%p138_p2)  ;;  %v1789_v5 = vld [vmem:[%s2126_s1 + $0x28] sm:$0xff] (!%p138_p2) }
   0x7   : > { %v1794_v6 = vld [vmem:[%s2126_s1 + $0x30] sm:$0xff] (!%p138_p2)  ;;  %v1799_v7 = vld [vmem:[%s2126_s1 + $0x38] sm:$0xff] (!%p138_p2)  ;;  %v1804_v8 = vld [vmem:[%s2126_s1 + $0x40] sm:$0xff] (!%p138_p2) }
   0x8   : > { %v1809_v9 = vld [vmem:[%s2126_s1 + $0x48] sm:$0xff] (!%p138_p2)  ;;  %v1814_v10 = vld [vmem:[%s2126_s1 + $0x50] sm:$0xff] (!%p138_p2)  ;;  %v1819_v11 = vld [vmem:[%s2126_s1 + $0x58] sm:$0xff] (!%p138_p2) }
   0x9   : > { %v1824_v12 = vld [vmem:[%s2127_s2] sm:$0xff] (!%p138_p2)  ;;  %v1829_v13 = vld [vmem:[%s2127_s2 + $0x8] sm:$0xff] (!%p138_p2)  ;;  %v1834_v14 = vld [vmem:[%s2127_s2 + $0x10] sm:$0xff] (!%p138_p2) }
   0xa   : > { %v1839_v15 = vld [vmem:[%s2127_s2 + $0x18] sm:$0xff] (!%p138_p2) }
   0xd   : > { %s2130_s13 = smov (!%p161_p3, %s1160_s13), 1 }
   0xe   : > { %s1613_s11 = smul.u32 7296, %s2130_s13 }
   0xf   : > { %s1614_s20 = smul.u32 1792, %s2130_s13 }
  0x10   : > { %s1844_s25 = scalar_lea.vmem %s2125_s0, %s1613_s11 }
  0x11   : > { %s1849_s28 = scalar_lea.vmem %s2128_s3, %s1614_s20 }
  0x12 LB: >> { %353 = vmatprep.mubr.f32.mxu0 %v1769_v1  ;;  %s1188_s13 = sshll.u32 %s1729_s29, 7  ;;  %vm276_vm0 = vcmask 261120   ;;  %s1731_s4 = smov 127   ;;  %vm1091_vm1 = vcmask 457728   ;;  %s1729_s29 = sphi %s1851_s29, %s192_s29  }
  0x13   : >> { %s1859_s30 = scalar_lea.vmem %s1844_s25, %s1188_s13  ;;  %1405 = vmatprep.mubr.msk.f32.mxu1 %vm276_vm0, %v1774_v2  ;;  %s1185_s5 = sshll.u32 %s1729_s29, 5 }
  0x14   : >> { %v212_v16 = vld [vmem:[%s1859_s30 + $0x80] sm:$0xff]  ;;  %v213_v17 = vld [vmem:[%s1859_s30 + $0x88] sm:$0xff]  ;;  %v214_v18 = vld [vmem:[%s1859_s30 + $0x90] sm:$0xff]  ;;  %s1090_s6 = scalar_lea.vmem %s1849_s28, %s1185_s5  ;;  %s192_s29 = sadd.s32 1, %s1729_s29  }
  0x15   : >> { %v1633_v19 = vpack.i.bf16 %v213_v17, %v212_v16  ;;  %v1864_v20 = vpack.c.bf16 %v213_v17, %v212_v16  ;;  %v215_v21 = vld [vmem:[%s1859_s30 + $0x98] sm:$0xff]  ;;  %v196_v22 = vld [vmem:[%s1859_s30] sm:$0xff]  ;;  %v197_v23 = vld [vmem:[%s1859_s30 + $0x8] sm:$0xff]  ;;  %p189_p4 = scmp.ge.s32.totalorder %s192_s29, 56  }
  0x16   : >> { %v1643_v24 = vpack.i.bf16 %v197_v23, %v196_v22  ;;  %v204_v25 = vld [vmem:[%s1859_s30 + $0x40] sm:$0xff]  ;;  %v1872_v26 = vpack.c.bf16 %v215_v21, %v214_v18  ;;  %v1638_v27 = vpack.i.bf16 %v215_v21, %v214_v18  ;;  %v198_v28 = vld [vmem:[%s1859_s30 + $0x10] sm:$0xff]  ;;  %v199_v29 = vld [vmem:[%s1859_s30 + $0x18] sm:$0xff]  ;;  %v1455_v45 = vpack.c.bf16 %v197_v23, %v196_v22 }
  0x17   : >> { %1634 = vrot.lane.b32.xlu0 %v1633_v19, %s1731_s4  ;;  %v205_v30 = vld [vmem:[%s1859_s30 + $0x48] sm:$0xff]  ;;  %v206_v32 = vld [vmem:[%s1859_s30 + $0x50] sm:$0xff]  ;;  %v200_v33 = vld [vmem:[%s1859_s30 + $0x20] sm:$0xff]  ;;  %v1653_v41 = vpack.i.bf16 %v199_v29, %v198_v28  ;;  %v1459_v58 = vpack.c.bf16 %v199_v29, %v198_v28 }
  0x18   : >> { %1644 = vrot.lane.b32.xlu1 %v1643_v24, %s1731_s4  ;;  %v1648_v31 = vpack.i.bf16 %v205_v30, %v204_v25  ;;  %v201_v34 = vld [vmem:[%s1859_s30 + $0x28] sm:$0xff]  ;;  %v207_v35 = vld [vmem:[%s1859_s30 + $0x58] sm:$0xff]  ;;  %v202_v37 = vld [vmem:[%s1859_s30 + $0x30] sm:$0xff]  ;;  %v1926_v16 = vpack.c.bf16 %v205_v30, %v204_v25 }
  0x19   : >> { %v1883_v36 = vpack.c.bf16 %v201_v34, %v200_v33  ;;  %v203_v38 = vld [vmem:[%s1859_s30 + $0x38] sm:$0xff]  ;;  %v208_v40 = vld [vmem:[%s1859_s30 + $0x60] sm:$0xff]  ;;  %v209_v42 = vld [vmem:[%s1859_s30 + $0x68] sm:$0xff]  ;;  %v1658_v46 = vpack.i.bf16 %v207_v35, %v206_v32  ;;  %v1663_v55 = vpack.i.bf16 %v201_v34, %v200_v33  ;;  %v1934_v21 = vpack.c.bf16 %v207_v35, %v206_v32 }
  0x1a   : >> { %v1887_v39 = vpack.c.bf16 %v203_v38, %v202_v37  ;;  %v1893_v43 = vld [vmem:[%s1859_s30 + $0xc0] sm:$0xff]  ;;  %v1896_v44 = vld [vmem:[%s1859_s30 + $0xc8] sm:$0xff]  ;;  %v1899_v47 = vpack.c.bf16 %v209_v42, %v208_v40  ;;  %v210_v49 = vld [vmem:[%s1859_s30 + $0x70] sm:$0xff]  ;;  %v1668_v60 = vpack.i.bf16 %v203_v38, %v202_v37  ;;  %v1678_v18 = vpack.i.bf16 %v209_v42, %v208_v40 }
  0x1b   : >> { %1639 = vrot.lane.b32.xlu0 %v1638_v27, %s1731_s4  ;;  %v1551_v48 = vpack.c.bf16 %v1896_v44, %v1893_v43  ;;  %v211_v50 = vld [vmem:[%s1859_s30 + $0x78] sm:$0xff]  ;;  %v1908_v52 = vld [vmem:[%s1859_s30 + $0xd0] sm:$0xff]  ;;  %v216_v56 = vld [vmem:[%s1859_s30 + $0xa0] sm:$0xff]  ;;  %v1693_v23 = vpack.i.bf16 %v1896_v44, %v1893_v43  ;;  %v1732_v34 = vmov 0  }
  0x1c   : >> { %1649 = vrot.lane.b32.xlu1 %v1648_v31, %s1731_s4  ;;  %v1905_v51 = vpack.c.bf16 %v211_v50, %v210_v49  ;;  %v1911_v53 = vld [vmem:[%s1859_s30 + $0xd8] sm:$0xff]  ;;  %1454 = vmatprep.subr.bf16.mxu0 %v1899_v47  ;;  %v217_v57 = vld [vmem:[%s1859_s30 + $0xa8] sm:$0xff]  ;;  %v218_v62 = vld [vmem:[%s1859_s30 + $0xb0] sm:$0xff]  ;;  %v1688_v22 = vpack.i.bf16 %v211_v50, %v210_v49 }
  0x1d   : >> { %v1555_v54 = vpack.c.bf16 %v1911_v53, %v1908_v52  ;;  %1456 = vmatpush3.bf16.msra.mxu0 %v1455_v45  ;;  %v1920_v59 = vpack.c.bf16 %v217_v57, %v216_v56  ;;  %v1673_v61 = vpack.i.bf16 %v217_v57, %v216_v56  ;;  %v219_v63 = vld [vmem:[%s1859_s30 + $0xb8] sm:$0xff]  ;;  %v1698_v24 = vpack.i.bf16 %v1911_v53, %v1908_v52  ;;  %v224_v25 = vld [vmem:[%s1859_s30 + $0xe0] sm:$0xff]  ;;  %v225_v27 = vld [vmem:[%s1859_s30 + $0xe8] sm:$0xff] }
  0x1e   : >> { %1458 = vmatprep.subr.bf16.mxu0 %v1905_v51  ;;  %v1929_v17 = vpack.c.bf16 %v219_v63, %v218_v62  ;;  %v1683_v19 = vpack.i.bf16 %v219_v63, %v218_v62  ;;  %v226_v28 = vld [vmem:[%s1859_s30 + $0xf0] sm:$0xff]  ;;  %v227_v29 = vld [vmem:[%s1859_s30 + $0xf8] sm:$0xff]  ;;  %v1703_v30 = vpack.i.bf16 %v225_v27, %v224_v25  ;;  %v1953_v32 = vpack.c.bf16 %v225_v27, %v224_v25 }
  0x1f   : >> { %1654 = vrot.lane.b32.xlu0 %v1653_v41, %s1731_s4  ;;  %v1708_v31 = vpack.i.bf16 %v227_v29, %v226_v28  ;;  %v1955_v33 = vpack.c.bf16 %v227_v29, %v226_v28  ;;  %1714 = vset.pattern.permute.xlu1 %v1732_v34 }
  0x20   : >> { %1659 = vrot.lane.b32.xlu1 %v1658_v46, %s1731_s4  ;;  %1713 = vset.pattern.permute.xlu0 %v1732_v34 }
  0x21   : >> { %1460 = vmatpush3.bf16.msra.mxu0 %v1459_v58 }
  0x22   : >> { %1462 = vmatprep.subr.bf16.mxu0 %v1920_v59 }
  0x23   : >> { %1664 = vrot.lane.b32.xlu0 %v1663_v55, %s1731_s4 }
  0x24   : >> { %1669 = vrot.lane.b32.xlu1 %v1668_v60, %s1731_s4 }
  0x25   : >> { %1464 = vmatpush3.bf16.msra.mxu0 %v1926_v16 }
  0x26   : >> { %1466 = vmatprep.subr.bf16.mxu0 %v1929_v17 }
  0x27   : >> { %1674 = vrot.lane.b32.xlu0 %v1673_v61, %s1731_s4 }
  0x28   : >> { %1679 = vrot.lane.b32.xlu1 %v1678_v18, %s1731_s4 }
  0x29   : >> { %1468 = vmatpush3.bf16.msra.mxu0 %v1934_v21 }
  0x2b   : >> { %1684 = vrot.lane.b32.xlu0 %v1683_v19, %s1731_s4 }
  0x2c   : >> { %1689 = vrot.lane.b32.xlu1 %v1688_v22, %s1731_s4 }
  0x2f   : >> { %1694 = vrot.lane.b32.xlu0 %v1693_v23, %s1731_s4 }
  0x30   : >> { %1699 = vrot.lane.b32.xlu1 %v1698_v24, %s1731_s4 }
  0x33   : >> { %1704 = vrot.lane.b32.xlu0 %v1703_v30, %s1731_s4 }
  0x34   : >> { %1709 = vrot.lane.b32.xlu1 %v1708_v31, %s1731_s4 }
  0x37   : >> { %1063 = vperm.xlu0 %1713, %v1824_v12  }
  0x38   : >> { %1068 = vperm.xlu1 %1714, %v1829_v13  }
  0x3b   : >> { %1078 = vperm.xlu0 %1713, %v1839_v15  }
  0x3c   : >> { %1073 = vperm.xlu1 %1714, %v1834_v14  }
  0x89   : >> { %v1635_v35 = vpop.permute.xlu0 %1634 }
  0x8a   : >> { %v1637_v37 = vunpack.i.h.bf16 %v1635_v35  ;;  %v1636_v38 = vunpack.i.l.bf16 %v1635_v35  ;;  %v1645_v40 = vpop.permute.xlu1 %1644 }
  0x8b   : >> { %v1647_v41 = vunpack.i.h.bf16 %v1645_v40  ;;  %v1646_v42 = vunpack.i.l.bf16 %v1645_v40 }
  0x8c   : >> { %v1961_v45 = vpack.c.bf16 %v1637_v37, %v1636_v38 }
  0x8d   : >> { %v1640_v46 = vpop.permute.xlu0 %1639  ;;  %v1963_v49 = vpack.c.bf16 %v1647_v41, %v1646_v42 }
  0x8e   : >> { %v1642_v50 = vunpack.i.h.bf16 %v1640_v46  ;;  %v1641_v55 = vunpack.i.l.bf16 %v1640_v46  ;;  %1486 = vmatprep.subr.bf16.mxu1 %v1961_v45  ;;  %v1650_v56 = vpop.permute.xlu1 %1649 }
  0x8f   : >> { %1488 = vmatpush3.bf16.msra.mxu1 %v1961_v45  ;;  %v1652_v57 = vunpack.i.h.bf16 %v1650_v56  ;;  %v1651_v58 = vunpack.i.l.bf16 %v1650_v56  ;;  %1470 = vmatprep.subr.bf16.mxu0 %v1963_v49 }
  0x90   : >> { %v1968_v60 = vpack.c.bf16 %v1642_v50, %v1641_v55  ;;  %1472 = vmatpush3.bf16.msra.mxu0 %v1864_v20 }
  0x91   : >> { %v1655_v61 = vpop.permute.xlu0 %1654  ;;  %v1971_v62 = vpack.c.bf16 %v1652_v57, %v1651_v58 }
  0x92   : >> { %v1657_v63 = vunpack.i.h.bf16 %v1655_v61  ;;  %v1656_v18 = vunpack.i.l.bf16 %v1655_v61  ;;  %1490 = vmatprep.subr.bf16.mxu1 %v1968_v60  ;;  %v1660_v19 = vpop.permute.xlu1 %1659 }
  0x93   : >> { %1492 = vmatpush3.bf16.msra.mxu1 %v1968_v60  ;;  %v1662_v22 = vunpack.i.h.bf16 %v1660_v19  ;;  %v1661_v23 = vunpack.i.l.bf16 %v1660_v19 }
  0x94   : >> { %v1975_v24 = vpack.c.bf16 %v1657_v63, %v1656_v18  ;;  %1494 = vmatprep.subr.bf16.mxu1 %v1971_v62 }
  0x95   : >> { %v1978_v25 = vpack.c.bf16 %v1662_v22, %v1661_v23  ;;  %v1665_v27 = vpop.permute.xlu0 %1664 }
  0x96   : >> { %1474 = vmatprep.subr.bf16.mxu0 %v1975_v24  ;;  %1406 = vmatmul.mubr.msk.f32.vlgmr.msra.gmra.mrb[0].mxu1 %vm276_vm0, %v1789_v5  ;;  %v1670_v28 = vpop.permute.xlu1 %1669  ;;  %v1667_v34 = vunpack.i.h.bf16 %v1665_v27  ;;  %v1666_v35 = vunpack.i.l.bf16 %v1665_v27 }
  0x97   : >> { %1476 = vmatpush3.bf16.msra.mxu0 %v1872_v26  ;;  %1496 = vmatpush3.bf16.msra.mxu1 %v1883_v36  ;;  %v1672_v46 = vunpack.i.h.bf16 %v1670_v28  ;;  %v1671_v50 = vunpack.i.l.bf16 %v1670_v28 }
  0x98   : >> { %1478 = vmatprep.subr.bf16.mxu0 %v1971_v62  ;;  %1498 = vmatprep.subr.bf16.mxu1 %v1978_v25 }
  0x99   : >> { %v1675_v29 = vpop.permute.xlu0 %1674  ;;  %1408 = vmatprep.mubr.msk.f32.mxu1 %vm276_vm0, %v1804_v8  ;;  %v1513_v61 = vpack.c.bf16 %v1672_v46, %v1671_v50 }
  0x9a   : >> { %v1677_v30 = vunpack.i.h.bf16 %v1675_v29  ;;  %v1676_v31 = vunpack.i.l.bf16 %v1675_v29  ;;  %1409 = vmatmul.mubr.msk.f32.gmra.mrb[2].mxu1 %vm276_vm0, %v1819_v11  ;;  %v1680_v40 = vpop.permute.xlu1 %1679 }
  0x9b   : >> { %1480 = vmatpush3.bf16.msra.mxu0 %v1883_v36  ;;  %1500 = vmatpush3.bf16.msra.mxu1 %v1887_v39  ;;  %v1509_v36 = vpack.c.bf16 %v1667_v34, %v1666_v35  ;;  %v1682_v63 = vunpack.i.h.bf16 %v1680_v40  ;;  %v1681_v18 = vunpack.i.l.bf16 %v1680_v40 }
  0x9c   : >> { %1482 = vmatprep.subr.bf16.mxu0 %v1978_v25  ;;  %1502 = vmatprep.subr.bf16.mxu1 %v1961_v45  ;;  %v1995_v37 = vpack.c.bf16 %v1677_v30, %v1676_v31 }
  0x9d   : >> { %v1685_v38 = vpop.permute.xlu0 %1684  ;;  %571 = vmatprep.mubr.f32.mxu1 %v1769_v1  ;;  %v1517_v22 = vpack.c.bf16 %v1682_v63, %v1681_v18 }
  0x9e   : >> { %v1687_v41 = vunpack.i.h.bf16 %v1685_v38  ;;  %v1686_v42 = vunpack.i.l.bf16 %v1685_v38 }
  0x9f   : >> { %1484 = vmatpush3.bf16.msra.mxu0 %v1887_v39  ;;  %1504 = vmatpush3.bf16.msra.mxu1 %v1899_v47  ;;  %v1690_v39 = vpop.permute.xlu1 %1689 }
  0xa0   : >> { %1506 = vmatprep.subr.bf16.mxu1 %v1968_v60  ;;  %1526 = vmatprep.subr.bf16.mxu0 %v1995_v37  ;;  %v2002_v55 = vpack.c.bf16 %v1687_v41, %v1686_v42  ;;  %v1692_v23 = vunpack.i.h.bf16 %v1690_v39  ;;  %v1691_v27 = vunpack.i.l.bf16 %v1690_v39 }
  0xa1   : >> { %v1695_v56 = vpop.permute.xlu0 %1694 }
  0xa2   : >> { %354 = vmatmul.mubr.f32.vlgmr.msra.gmra.mrb[0].mxu0 %v1764_v0  ;;  %v1697_v57 = vunpack.i.h.bf16 %v1695_v56  ;;  %v1696_v58 = vunpack.i.l.bf16 %v1695_v56  ;;  %v1521_v29 = vpack.c.bf16 %v1692_v23, %v1691_v27 }
  0xa3   : >> { %1508 = vmatpush3.bf16.msra.mxu1 %v1905_v51  ;;  %358 = vmatprep.mubr.f32.mxu0 %v1784_v4  ;;  %v1700_v28 = vpop.permute.xlu1 %1699 }
  0xa4   : >> { %1510 = vmatprep.subr.bf16.mxu1 %v1509_v36  ;;  %1528 = vmatpush3.bf16.msra.mxu0 %v1995_v37  ;;  %v1565_v19 = vpack.c.bf16 %v1697_v57, %v1696_v58  ;;  %v1702_v30 = vunpack.i.h.bf16 %v1700_v28  ;;  %v1701_v31 = vunpack.i.l.bf16 %v1700_v28 }
  0xa5   : >> { %1530 = vmatprep.subr.bf16.mxu0 %v2002_v55 }
  0xa6   : >> { %359 = vmatmul.mubr.f32.gmra.mrb[2].mxu0 %v1779_v3  ;;  %v1569_v34 = vpack.c.bf16 %v1702_v30, %v1701_v31 }
  0xa7   : >> { %1512 = vmatpush3.bf16.msra.mxu1 %v1920_v59  ;;  %363 = vmatprep.mubr.f32.mxu0 %v1799_v7 }
  0xa8   : >> { %1514 = vmatprep.subr.bf16.mxu1 %v1513_v61  ;;  %1532 = vmatpush3.bf16.msra.mxu0 %v2002_v55 }
  0xa9   : >> { %1566 = vmatprep.subr.bf16.mxu0 %v1565_v19 }
  0xaa   : >> { %364 = vmatmul.mubr.f32.gmra.mrb[4].mxu0 %v1794_v6 }
  0xab   : >> { %1516 = vmatpush3.bf16.msra.mxu1 %v1929_v17  ;;  %368 = vmatprep.mubr.f32.mxu0 %v1814_v10 }
  0xac   : >> { %1518 = vmatprep.subr.bf16.mxu1 %v1517_v22 }
  0xae   : >> { %369 = vmatmul.mubr.f32.gmra.mrb[6].mxu0 %v1809_v9 }
  0xaf   : >> { %1520 = vmatpush3.bf16.msra.mxu1 %v1963_v49  ;;  %1419 = vmatprep.mubr.msk.f32.mxu0 %vm276_vm0, %v1774_v2 }
  0xb0   : >> { %1522 = vmatprep.subr.bf16.mxu1 %v1521_v29 }
  0xb2   : >> { %1420 = vmatmul.mubr.msk.f32.vlgmr.msra.gmra.mrb[8].mxu0 %vm276_vm0, %v1789_v5 }
  0xb3   : >> { %1568 = vmatpush3.bf16.msra.mxu0 %v1565_v19  ;;  %1524 = vmatpush3.bf16.msra.mxu1 %v1975_v24 }
  0xb4   : >> { %1422 = vmatprep.mubr.msk.f32.mxu0 %vm276_vm0, %v1804_v8  ;;  %1570 = vmatprep.subr.bf16.mxu0 %v1569_v34 }
  0xb5   : >> { %1534 = vmatprep.subr.bf16.mxu1 %v1920_v59 }
  0xb6   : >> { %572 = vmatmul.mubr.f32.vlgmr.msra.gmra.mrb[4].mxu1 %v1764_v0  ;;  %1423 = vmatmul.mubr.msk.f32.gmra.mrb[10].mxu0 %vm276_vm0, %v1819_v11 }
  0xb7   : >> { %1572 = vmatpush3.bf16.msra.mxu0 %v1569_v34  ;;  %1536 = vmatpush3.bf16.msra.mxu1 %v1926_v16  ;;  %v1710_v16 = vpop.permute.xlu1 %1709 }
  0xb8   : >> { %1574 = vmatprep.subr.bf16.mxu0 %v1961_v45  ;;  %576 = vmatprep.mubr.f32.mxu1 %v1784_v4  ;;  %v1712_v44 = vunpack.i.h.bf16 %v1710_v16 }
  0xb9   : >> { %1433 = vmatprep.mubr.msk.f32.mxu0 %vm276_vm0, %v1774_v2  ;;  %1538 = vmatprep.subr.bf16.mxu1 %v1929_v17 }
  0xba   : >> { %577 = vmatmul.mubr.f32.gmra.mrb[6].mxu1 %v1779_v3  ;;  %1434 = vmatmul.mubr.msk.f32.vlgmr.msra.gmra.mrb[12].mxu0 %vm276_vm0, %v1789_v5 }
  0xbb   : >> { %1576 = vmatpush3.bf16.msra.mxu0 %v1899_v47  ;;  %1540 = vmatpush3.bf16.msra.mxu1 %v1934_v21 }
  0xbc   : >> { %1578 = vmatprep.subr.bf16.mxu0 %v1968_v60  ;;  %581 = vmatprep.mubr.f32.mxu1 %v1799_v7 }
  0xbd   : >> { %1542 = vmatprep.subr.bf16.mxu1 %v1953_v32  ;;  %1436 = vmatprep.mubr.msk.f32.mxu0 %vm276_vm0, %v1804_v8 }
  0xbe   : >> { %582 = vmatmul.mubr.f32.gmra.mrb[8].mxu1 %v1794_v6  ;;  %1437 = vmatmul.mubr.msk.f32.gmra.mrb[14].mxu0 %vm276_vm0, %v1819_v11 }
  0xbf   : >> { %1580 = vmatpush3.bf16.msra.mxu0 %v1905_v51  ;;  %1544 = vmatpush3.bf16.msra.mxu1 %v1864_v20  ;;  %v1705_v20 = vpop.permute.xlu0 %1704 }
  0xc0   : >> { %1582 = vmatprep.subr.bf16.mxu0 %v1565_v19  ;;  %586 = vmatprep.mubr.f32.mxu1 %v1814_v10 }
  0xc1   : >> { %1546 = vmatprep.subr.bf16.mxu1 %v1955_v33  ;;  %943 = vmatprep.mubr.f32.mxu0 %v1769_v1 }
  0xc2   : >> { %587 = vmatmul.mubr.f32.gmra.mrb[10].mxu1 %v1809_v9 }
  0xc3   : >> { %1584 = vmatpush3.bf16.msra.mxu0 %v1920_v59  ;;  %1548 = vmatpush3.bf16.msra.mxu1 %v1872_v26  ;;  %v1707_v26 = vunpack.i.h.bf16 %v1705_v20  ;;  %v1706_v59 = vunpack.i.l.bf16 %v1705_v20 }
  0xc4   : >> { %1586 = vmatprep.subr.bf16.mxu0 %v1569_v34  ;;  %1550 = vmatprep.subr.bf16.mxu1 %v1971_v62 }
  0xc5   : >> { %757 = vmatprep.mubr.f32.mxu1 %v1769_v1  ;;  %v1605_v43 = vpack.c.bf16 %v1707_v26, %v1706_v59 }
  0xc7   : >> { %1588 = vmatpush3.bf16.msra.mxu0 %v1929_v17  ;;  %1552 = vmatpush3.bf16.msra.mxu1 %v1551_v48  ;;  %v1711_v48 = vunpack.i.l.bf16 %v1710_v16 }
  0xc8   : >> { %1590 = vmatprep.subr.bf16.mxu0 %v1517_v22  ;;  %1554 = vmatprep.subr.bf16.mxu1 %v1978_v25 }
  0xc9   : >> { %v1609_v52 = vpack.c.bf16 %v1712_v44, %v1711_v48 }
  0xcb   : >> { %1592 = vmatpush3.bf16.msra.mxu0 %v1953_v32  ;;  %1556 = vmatpush3.bf16.msra.mxu1 %v1555_v54 }
  0xcc   : >> { %1594 = vmatprep.subr.bf16.mxu0 %v1521_v29  ;;  %1558 = vmatprep.subr.bf16.mxu1 %v1961_v45 }
  0xcf   : >> { %1596 = vmatpush3.bf16.msra.mxu0 %v1955_v33  ;;  %1560 = vmatpush3.bf16.msra.mxu1 %v1899_v47 }
  0xd0   : >> { %1598 = vmatprep.subr.bf16.mxu0 %v1995_v37  ;;  %1562 = vmatprep.subr.bf16.mxu1 %v1968_v60 }
  0xd3   : >> { %1600 = vmatpush3.bf16.msra.mxu0 %v1971_v62  ;;  %1564 = vmatpush3.bf16.msra.mxu1 %v1905_v51 }
  0xd4   : >> { %1602 = vmatprep.subr.bf16.mxu0 %v2002_v55  ;;  %1606 = vmatprep.subr.bf16.mxu1 %v1605_v43 }
  0xd6   : >> { %758 = vmatmul.mubr.f32.vlgmr.msra.gmra.mrb[12].mxu1 %v1764_v0 }
  0xd7   : >> { %1604 = vmatpush3.bf16.msra.mxu0 %v1978_v25  ;;  %1608 = vmatpush3.bf16.msra.mxu1 %v1605_v43 }
  0xd8   : >> { %762 = vmatprep.mubr.f32.mxu1 %v1784_v4  ;;  %1610 = vmatprep.subr.bf16.mxu1 %v1609_v52 }
  0xda   : >> { %763 = vmatmul.mubr.f32.gmra.mrb[14].mxu1 %v1779_v3  ;;  %944 = vmatmul.mubr.f32.vlgmr.msra.gmra.mrb[16].mxu0 %v1764_v0 }
  0xdb   : >> { %767 = vmatprep.mubr.f32.mxu1 %v1799_v7  ;;  %948 = vmatprep.mubr.f32.mxu0 %v1784_v4 }
  0xdc   : >> { %1612 = vmatpush3.bf16.msra.mxu1 %v1609_v52 }
  0xde   : >> { %768 = vmatmul.mubr.f32.gmra.mrb[16].mxu1 %v1794_v6  ;;  %949 = vmatmul.mubr.f32.gmra.mrb[18].mxu0 %v1779_v3 }
  0xdf   : >> { %772 = vmatprep.mubr.f32.mxu1 %v1814_v10  ;;  %953 = vmatprep.mubr.f32.mxu0 %v1799_v7 }
  0xe2   : >> { %773 = vmatmul.mubr.f32.gmra.mrb[18].mxu1 %v1809_v9  ;;  %954 = vmatmul.mubr.f32.gmra.mrb[20].mxu0 %v1794_v6 }
  0xe3   : >> { %1447 = vmatprep.mubr.msk.f32.mxu1 %vm276_vm0, %v1774_v2  ;;  %958 = vmatprep.mubr.f32.mxu0 %v1814_v10 }
  0xe6   : >> { %1448 = vmatmul.mubr.msk.f32.vlgmr.msra.gmra.mrb[20].mxu1 %vm276_vm0, %v1789_v5  ;;  %959 = vmatmul.mubr.f32.gmra.mrb[22].mxu0 %v1809_v9 }
  0xe7   : >> { %1450 = vmatprep.mubr.msk.f32.mxu1 %vm276_vm0, %v1804_v8 }
  0xea   : >> { %1451 = vmatmul.mubr.msk.f32.gmra.mrb[22].mxu1 %vm276_vm0, %v1819_v11 }
 0x169   : >> { %v1407_v47 = vpop.f32.mrb[0].mxu1 }
 0x16a   : >> { %v440_v51 = vpop.f32.mrb[1].mxu1 }
 0x16d   : >> { %v1410_v53 = vpop.f32.mrb[2].mxu1 }
 0x16e   : >> { %v450_v54 = vpop.f32.mrb[3].mxu1 }
 0x175   : >> { %v1221_v17 = vpop.f32.mrb[0].mxu0 }
 0x176   : >> { %v1222_v21 = vpop.f32.mrb[1].mxu0 }
 0x177   : >> { %v1223_v32 = vadd.f32 %v1222_v21, %v1221_v17 }
 0x179   : >> { %v2098_v33 = vadd.f32 %v1223_v32, %v440_v51  ;;  %v1224_v45 = vpop.f32.mrb[2].mxu0 }
 0x17a   : >> { %v1225_v49 = vpop.f32.mrb[3].mxu0 }
 0x17b   : >> { %v1226_v60 = vadd.f32 %v1225_v49, %v1224_v45 }
 0x17d   : >> { %v2100_v62 = vadd.f32 %v1407_v47, %v1226_v60  ;;  %v1227_v24 = vpop.f32.mrb[4].mxu0 }
 0x17e   : >> { %v1228_v25 = vpop.f32.mrb[5].mxu0 }
 0x17f   : >> { %v1229_v35 = vadd.f32 %v1228_v25, %v1227_v24 }
 0x181   : >> { %v1230_v37 = vpop.f32.mrb[6].mxu0  ;;  %v2102_v38 = vadd.f32 %v1229_v35, %v450_v54 }
 0x182   : >> { %v1231_v40 = vpop.f32.mrb[7].mxu0 }
 0x183   : >> { %v1232_v41 = vadd.f32 %v1231_v40, %v1230_v37 }
 0x185   : >> { %v2104_v42 = vadd.f32 %v1410_v53, %v1232_v41  ;;  %v1421_v36 = vpop.f32.mrb[8].mxu0 }
 0x186   : >> { %v658_v46 = vpop.f32.mrb[9].mxu0 }
 0x189   : >> { %v1273_v50 = vpop.f32.mrb[4].mxu1  ;;  %v1424_v55 = vpop.f32.mrb[10].mxu0 }
 0x18a   : >> { %v1274_v56 = vpop.f32.mrb[5].mxu1  ;;  %v668_v57 = vpop.f32.mrb[11].mxu0 }
 0x18b   : >> { %v1275_v58 = vadd.f32 %v1274_v56, %v1273_v50 }
 0x18d   : >> { %v2106_v39 = vadd.f32 %v1275_v58, %v658_v46  ;;  %v1276_v61 = vpop.f32.mrb[6].mxu1  ;;  %v1435_v63 = vpop.f32.mrb[12].mxu0 }
 0x18e   : >> { %v1277_v18 = vpop.f32.mrb[7].mxu1  ;;  %v844_v19 = vpop.f32.mrb[13].mxu0 }
 0x18f   : >> { %v1278_v22 = vadd.f32 %v1277_v18, %v1276_v61  ;;  %v1049_v23 = vmax.f32 %v2098_v33, %v2106_v39 }
 0x191   : >> { %v664_v27 = vadd.f32 %v1421_v36, %v1278_v22  ;;  %v1279_v28 = vpop.f32.mrb[8].mxu1  ;;  %v1438_v29 = vpop.f32.mrb[14].mxu0 }
 0x192   : >> { %v1280_v30 = vpop.f32.mrb[9].mxu1  ;;  %v854_v31 = vpop.f32.mrb[15].mxu0 }
 0x193   : >> { %v1281_v34 = vadd.f32 %v1280_v30, %v1279_v28  ;;  %v1050_v20 = vmax.f32 %v2100_v62, %v664_v27  ;;  %v1064_v28 = vpop.permute.xlu0 %1063 }
 0x195   : >> { %v669_v26 = vadd.f32 %v1281_v34, %v668_v57  ;;  %v1282_v59 = vpop.f32.mrb[10].mxu1 }
 0x196   : >> { %v1283_v16 = vpop.f32.mrb[11].mxu1 }
 0x197   : >> { %v1284_v43 = vadd.f32 %v1283_v16, %v1282_v59  ;;  %v1051_v44 = vmax.f32 %v2102_v38, %v669_v26 }
 0x199   : >> { %v674_v48 = vadd.f32 %v1424_v55, %v1284_v43 }
 0x19b   : >> { %v1052_v52 = vmax.f32 %v2104_v42, %v674_v48 }
 0x1a9   : >> { %v1325_v47 = vpop.f32.mrb[12].mxu1 }
 0x1aa   : >> { %v1326_v51 = vpop.f32.mrb[13].mxu1 }
 0x1ab   : >> { %v1327_v53 = vadd.f32 %v1326_v51, %v1325_v47 }
 0x1ad   : >> { %v845_v54 = vadd.f32 %v1327_v53, %v844_v19  ;;  %v1328_v17 = vpop.f32.mrb[14].mxu1  ;;  %v1377_v21 = vpop.f32.mrb[16].mxu0 }
 0x1ae   : >> { %v1329_v32 = vpop.f32.mrb[15].mxu1  ;;  %v1378_v33 = vpop.f32.mrb[17].mxu0 }
 0x1af   : >> { %v1330_v45 = vadd.f32 %v1329_v32, %v1328_v17  ;;  %v1379_v49 = vadd.f32 %v1378_v33, %v1377_v21  ;;  %v1079_v32 = vpop.permute.xlu0 %1078 }
 0x1b1   : >> { %v850_v60 = vadd.f32 %v1435_v63, %v1330_v45  ;;  %v1331_v62 = vpop.f32.mrb[16].mxu1  ;;  %v1380_v24 = vpop.f32.mrb[18].mxu0 }
 0x1b2   : >> { %v1332_v25 = vpop.f32.mrb[17].mxu1  ;;  %v1381_v35 = vpop.f32.mrb[19].mxu0 }
 0x1b3   : >> { %v1333_v37 = vadd.f32 %v1332_v25, %v1331_v62  ;;  %v1382_v38 = vadd.f32 %v1381_v35, %v1380_v24 }
 0x1b5   : >> { %v855_v40 = vadd.f32 %v1333_v37, %v854_v31  ;;  %v1334_v41 = vpop.f32.mrb[18].mxu1  ;;  %v1383_v42 = vpop.f32.mrb[20].mxu0 }
 0x1b6   : >> { %v1335_v36 = vpop.f32.mrb[19].mxu1  ;;  %v1384_v46 = vpop.f32.mrb[21].mxu0 }
 0x1b7   : >> { %v1336_v50 = vadd.f32 %v1335_v36, %v1334_v41  ;;  %v1385_v55 = vadd.f32 %v1384_v46, %v1383_v42  ;;  %v1069_v31 = vpop.permute.xlu1 %1068 }
 0x1b9   : >> { %v860_v56 = vadd.f32 %v1438_v29, %v1336_v50  ;;  %v1449_v57 = vpop.f32.mrb[20].mxu1  ;;  %v1386_v58 = vpop.f32.mrb[22].mxu0 }
 0x1ba   : >> { %v1036_v39 = vadd.f32 %v1449_v57, %v1382_v38  ;;  %v1030_v61 = vpop.f32.mrb[21].mxu1  ;;  %v1387_v63 = vpop.f32.mrb[23].mxu0 }
 0x1bb   : >> { %v1031_v18 = vadd.f32 %v1379_v49, %v1030_v61  ;;  %v1388_v19 = vadd.f32 %v1387_v63, %v1386_v58  ;;  %v1074_v45 = vpop.permute.xlu1 %1073 }
 0x1bc   : >> { %v1054_v22 = vmax.f32 %v850_v60, %v1036_v39 }
 0x1bd   : >> { %v1053_v27 = vmax.f32 %v845_v54, %v1031_v18  ;;  %v1452_v30 = vpop.f32.mrb[22].mxu1 }
 0x1be   : >> { %v1058_v34 = vmax.f32 %v1050_v20, %v1054_v22  ;;  %v1046_v26 = vadd.f32 %v1452_v30, %v1388_v19  ;;  %v1040_v59 = vpop.f32.mrb[23].mxu1 }
 0x1bf   : >> { %v1057_v16 = vmax.f32 %v1049_v23, %v1053_v27  ;;  %v1041_v43 = vadd.f32 %v1385_v55, %v1040_v59 }
 0x1c0   : >> { %v1082_v29 = vadd.f32 %v1069_v31, %v1058_v34  ;;  %v1056_v48 = vmax.f32 %v860_v56, %v1046_v26 }
 0x1c1   : >> { %v1081_v47 = vadd.f32 %v1064_v28, %v1057_v16  ;;  %v1055_v51 = vmax.f32 %v855_v40, %v1041_v43 }
 0x1c2   : >> { %v1086_v53 = vmax.f32 %v1082_v29, 0.0  ;;  %v1060_v17 = vmax.f32 %v1052_v52, %v1056_v48 }
 0x1c3   : >> { %v1085_v21 = vmax.f32 %v1081_v47, 0.0  ;;  %v1059_v54 = vmax.f32 %v1051_v44, %v1055_v51  ;;  %191 = sbr.rel (!%p189_p4) target bundleno = 18 (0x12), region = 71 }
 0x1c4   : >> { %1093 = vst.msk [vmem:[%s1090_s6 + $0x8] sm:$0xff] %vm1091_vm1, %v1086_v53  ;;  %v1084_v33 = vadd.f32 %v1079_v32, %v1060_v17 }
 0x1c5   : >> { %1092 = vst.msk [vmem:[%s1090_s6] sm:$0xff] %vm1091_vm1, %v1085_v21  ;;  %v1083_v20 = vadd.f32 %v1074_v45, %v1059_v54 }
 0x1c6   : >> { %v1088_v23 = vmax.f32 %v1084_v33, 0.0 }
 0x1c7   : >> { %v1087_v49 = vmax.f32 %v1083_v20, 0.0 }
 0x1c8   : >> { %1095 = vst.msk [vmem:[%s1090_s6 + $0x18] sm:$0xff] %vm1091_vm1, %v1088_v23 }
 0x1c9   : >> { %1094 = vst.msk [vmem:[%s1090_s6 + $0x10] sm:$0xff] %vm1091_vm1, %v1087_v49 }
 0x1ca PF: > { %s13_s12 = sadd.s32 1, %s1725_s12  }
 0x1cb   : > { %p10_p5 = scmp.ge.s32.totalorder %s13_s12, 4  }
 0x1cd   :  { %12 = sbr.rel (!%p10_p5) target bundleno = 1 (0x1), region = 82 }

// kernel: cnn_forward.6
= control target key start
LH: loop header
LB: loop body
LE: loop exit
PB: predicated region body
PF: predicated region fallthrough
CT: control target
= control target key end

     0   :  { %s4264_s9 = smov 0   ;;  %s4266_s10 = smov 0   ;;  %s5725_s0 = inlined_call_operand.vmem [shape: f32[2,100352], index: 0, kind: input, shape index: {}]   ;;  %s5726_s1 = inlined_call_operand.vmem [shape: f32[56,100352], index: 1, kind: input, shape index: {}]   ;;  %s5727_s2 = inlined_call_operand.vmem [shape: f32[2,2,56], index: 2, kind: output, shape index: {}]  }
   0x1   :  { %s4268_s11 = smov 0   ;;  %s4270_s12 = smov 0  }
   0x2   :  { %s4272_s13 = smov 0   ;;  %s4274_s14 = smov 0  }
   0x3   :  { %s4276_s15 = smov 0  }
   0x4 LB: > { %s21_s16 = sadd.s32 1, %s4237_s13  ;;  %s24_s17 = sadd.s32 1, %s4241_s14  ;;  %s4245_s15 = sphi %s4276_s15, %s12_s15   ;;  %s4241_s14 = sphi %s4274_s14, %s5733_s14   ;;  %s4237_s13 = sphi %s4272_s13, %s5732_s13   ;;  %s4233_s12 = sphi %s4270_s12, %s5731_s12   ;;  %s4229_s11 = sphi %s4268_s11, %s5730_s11   ;;  %s4225_s10 = sphi %s4266_s10, %s5729_s10   ;;  %s4221_s9 = sphi %s4264_s9, %s5728_s9  }
   0x5   : > { %p22_p0 = scmp.ge.s32.totalorder %s21_s16, 7  ;;  %p72_p1 = scmp.ne.s32.totalorder %s4225_s10, %s4221_s9 }
   0x6   : > { %p73_p2 = scmp.eq.s32.totalorder %s4245_s15, 0  ;;  %s58_s18 = smul.u32 7, %s4241_s14 }
   0x7   : > { %s5735_s16 = smov (%p22_p0, %s21_s16), 0  ;;  %s5737_s17 = smov (!%p22_p0, %s24_s17), %s4241_s14 }
   0x8   : > { %p26_p3 = scmp.ge.s32.totalorder %s5737_s17, 2  ;;  %p74_p4 = por %p73_p2, %p72_p1 }
   0x9   : > { %s59_s19 = sadd.s32 %s4237_s13, %s58_s18  ;;  %s65_s23 = sadd.s32 1, %s4225_s10 }
   0xa   : > { %s5739_s17 = smov (%p26_p3, %s5737_s17), 0  ;;  %p3772_p6 = scmp.ge.s32.totalorder %s4245_s15, 14 }
   0xb   : > { %s60_s20 = smul.u32 7, %s5739_s17 }
   0xc   : > { %124 = sbr.rel (%p3772_p6) target bundleno = 220 (0xdc), region = 16 }
   0xd   : > { %s61_s21 = sadd.s32 %s60_s20, %s5735_s16 }
   0xe   : > { %s62_s22 = ssub.s32 %s59_s19, %s61_s21 }
   0xf   : > { %p63_p5 = scmp.eq.s32.totalorder %s62_s22, 0 }
  0x11   : > { %s4315_s24 = scalar_select %p63_p5, %s4225_s10, %s65_s23  }
  0x13   : > { %140 = sbr.rel (!%p74_p4) target bundleno = 220 (0xdc), region = 24  ;;  %s142_s25 = sand.u32 (%p74_p4), 1, %s4225_s10  }
  0x14   : > { %s3780_s26 = smul.u32 (%p74_p4), 448, %s59_s19 }
  0x15   : > { %s4117_s27 = smul.u32 (%p74_p4), 3136, %s142_s25 }
  0x16   : > { %s4322_s30 = scalar_lea.vmem (%p74_p4), %s5726_s1, %s3780_s26 }
  0x17   : > { %v162_v0 = vld [vmem:[%s4322_s30] sm:$0xff] (%p74_p4)  ;;  %v164_v1 = vld [vmem:[%s4322_s30 + $0x8] sm:$0xff] (%p74_p4)  ;;  %v166_v2 = vld [vmem:[%s4322_s30 + $0x10] sm:$0xff] (%p74_p4)  ;;  %s4327_s3 = scalar_lea.vmem (%p74_p4), [#allocation2], %s4117_s27 }
  0x18   : > { %163 = vst [vmem:[%s4327_s3] sm:$0xff] (%p74_p4), %v162_v0  ;;  %165 = vst [vmem:[%s4327_s3 + $0x8] sm:$0xff] (%p74_p4), %v164_v1  ;;  %v168_v3 = vld [vmem:[%s4322_s30 + $0x18] sm:$0xff] (%p74_p4)  ;;  %v170_v4 = vld [vmem:[%s4322_s30 + $0x20] sm:$0xff] (%p74_p4) }
  0x19   : > { %167 = vst [vmem:[%s4327_s3 + $0x10] sm:$0xff] (%p74_p4), %v166_v2  ;;  %v172_v5 = vld [vmem:[%s4322_s30 + $0x28] sm:$0xff] (%p74_p4)  ;;  %169 = vst [vmem:[%s4327_s3 + $0x18] sm:$0xff] (%p74_p4), %v168_v3  ;;  %v174_v6 = vld [vmem:[%s4322_s30 + $0x30] sm:$0xff] (%p74_p4) }
  0x1a   : > { %171 = vst [vmem:[%s4327_s3 + $0x20] sm:$0xff] %v170_v4  ;;  %173 = vst [vmem:[%s4327_s3 + $0x28] sm:$0xff] %v172_v5  ;;  %v176_v7 = vld [vmem:[%s4322_s30 + $0x38] sm:$0xff]  ;;  %v178_v8 = vld [vmem:[%s4322_s30 + $0x40] sm:$0xff] }
  0x1b   : > { %175 = vst [vmem:[%s4327_s3 + $0x30] sm:$0xff] %v174_v6  ;;  %177 = vst [vmem:[%s4327_s3 + $0x38] sm:$0xff] %v176_v7  ;;  %v180_v9 = vld [vmem:[%s4322_s30 + $0x48] sm:$0xff]  ;;  %v182_v10 = vld [vmem:[%s4322_s30 + $0x50] sm:$0xff] }
  0x1c   : > { %179 = vst [vmem:[%s4327_s3 + $0x40] sm:$0xff] %v178_v8  ;;  %v184_v11 = vld [vmem:[%s4322_s30 + $0x58] sm:$0xff]  ;;  %181 = vst [vmem:[%s4327_s3 + $0x48] sm:$0xff] %v180_v9  ;;  %v186_v12 = vld [vmem:[%s4322_s30 + $0x60] sm:$0xff] }
  0x1d   : > { %183 = vst [vmem:[%s4327_s3 + $0x50] sm:$0xff] %v182_v10  ;;  %185 = vst [vmem:[%s4327_s3 + $0x58] sm:$0xff] %v184_v11  ;;  %v188_v13 = vld [vmem:[%s4322_s30 + $0x68] sm:$0xff]  ;;  %v190_v14 = vld [vmem:[%s4322_s30 + $0x70] sm:$0xff] }
  0x1e   : > { %187 = vst [vmem:[%s4327_s3 + $0x60] sm:$0xff] %v186_v12  ;;  %189 = vst [vmem:[%s4327_s3 + $0x68] sm:$0xff] %v188_v13  ;;  %v192_v15 = vld [vmem:[%s4322_s30 + $0x78] sm:$0xff]  ;;  %v194_v16 = vld [vmem:[%s4322_s30 + $0x80] sm:$0xff] }
  0x1f   : > { %191 = vst [vmem:[%s4327_s3 + $0x70] sm:$0xff] %v190_v14  ;;  %v196_v17 = vld [vmem:[%s4322_s30 + $0x88] sm:$0xff]  ;;  %193 = vst [vmem:[%s4327_s3 + $0x78] sm:$0xff] %v192_v15  ;;  %v198_v18 = vld [vmem:[%s4322_s30 + $0x90] sm:$0xff] }
  0x20   : > { %195 = vst [vmem:[%s4327_s3 + $0x80] sm:$0xff] %v194_v16  ;;  %197 = vst [vmem:[%s4327_s3 + $0x88] sm:$0xff] %v196_v17  ;;  %v200_v19 = vld [vmem:[%s4322_s30 + $0x98] sm:$0xff]  ;;  %v202_v20 = vld [vmem:[%s4322_s30 + $0xa0] sm:$0xff] }
  0x21   : > { %199 = vst [vmem:[%s4327_s3 + $0x90] sm:$0xff] %v198_v18  ;;  %201 = vst [vmem:[%s4327_s3 + $0x98] sm:$0xff] %v200_v19  ;;  %v204_v21 = vld [vmem:[%s4322_s30 + $0xa8] sm:$0xff]  ;;  %v206_v22 = vld [vmem:[%s4322_s30 + $0xb0] sm:$0xff] }
  0x22   : > { %203 = vst [vmem:[%s4327_s3 + $0xa0] sm:$0xff] %v202_v20  ;;  %v208_v23 = vld [vmem:[%s4322_s30 + $0xb8] sm:$0xff]  ;;  %205 = vst [vmem:[%s4327_s3 + $0xa8] sm:$0xff] %v204_v21  ;;  %v210_v24 = vld [vmem:[%s4322_s30 + $0xc0] sm:$0xff] }
  0x23   : > { %207 = vst [vmem:[%s4327_s3 + $0xb0] sm:$0xff] %v206_v22  ;;  %209 = vst [vmem:[%s4327_s3 + $0xb8] sm:$0xff] %v208_v23  ;;  %v212_v25 = vld [vmem:[%s4322_s30 + $0xc8] sm:$0xff]  ;;  %v214_v26 = vld [vmem:[%s4322_s30 + $0xd0] sm:$0xff] }
  0x24   : > { %211 = vst [vmem:[%s4327_s3 + $0xc0] sm:$0xff] %v210_v24  ;;  %213 = vst [vmem:[%s4327_s3 + $0xc8] sm:$0xff] %v212_v25  ;;  %v216_v27 = vld [vmem:[%s4322_s30 + $0xd8] sm:$0xff]  ;;  %v218_v28 = vld [vmem:[%s4322_s30 + $0xe0] sm:$0xff] }
  0x25   : > { %215 = vst [vmem:[%s4327_s3 + $0xd0] sm:$0xff] %v214_v26  ;;  %v220_v29 = vld [vmem:[%s4322_s30 + $0xe8] sm:$0xff]  ;;  %217 = vst [vmem:[%s4327_s3 + $0xd8] sm:$0xff] %v216_v27  ;;  %v222_v30 = vld [vmem:[%s4322_s30 + $0xf0] sm:$0xff] }
  0x26   : > { %219 = vst [vmem:[%s4327_s3 + $0xe0] sm:$0xff] %v218_v28  ;;  %221 = vst [vmem:[%s4327_s3 + $0xe8] sm:$0xff] %v220_v29  ;;  %v224_v31 = vld [vmem:[%s4322_s30 + $0xf8] sm:$0xff]  ;;  %v226_v32 = vld [vmem:[%s4322_s30 + $0x100] sm:$0xff] }
  0x27   : > { %223 = vst [vmem:[%s4327_s3 + $0xf0] sm:$0xff] %v222_v30  ;;  %225 = vst [vmem:[%s4327_s3 + $0xf8] sm:$0xff] %v224_v31  ;;  %v228_v33 = vld [vmem:[%s4322_s30 + $0x108] sm:$0xff]  ;;  %v230_v34 = vld [vmem:[%s4322_s30 + $0x110] sm:$0xff] }
  0x28   : > { %227 = vst [vmem:[%s4327_s3 + $0x100] sm:$0xff] %v226_v32  ;;  %v232_v35 = vld [vmem:[%s4322_s30 + $0x118] sm:$0xff]  ;;  %229 = vst [vmem:[%s4327_s3 + $0x108] sm:$0xff] %v228_v33  ;;  %v234_v36 = vld [vmem:[%s4322_s30 + $0x120] sm:$0xff] }
  0x29   : > { %231 = vst [vmem:[%s4327_s3 + $0x110] sm:$0xff] %v230_v34  ;;  %233 = vst [vmem:[%s4327_s3 + $0x118] sm:$0xff] %v232_v35  ;;  %v236_v37 = vld [vmem:[%s4322_s30 + $0x128] sm:$0xff]  ;;  %v238_v38 = vld [vmem:[%s4322_s30 + $0x130] sm:$0xff] }
  0x2a   : > { %235 = vst [vmem:[%s4327_s3 + $0x120] sm:$0xff] %v234_v36  ;;  %237 = vst [vmem:[%s4327_s3 + $0x128] sm:$0xff] %v236_v37  ;;  %v240_v39 = vld [vmem:[%s4322_s30 + $0x138] sm:$0xff]  ;;  %v242_v40 = vld [vmem:[%s4322_s30 + $0x140] sm:$0xff] }
  0x2b   : > { %239 = vst [vmem:[%s4327_s3 + $0x130] sm:$0xff] %v238_v38  ;;  %v244_v41 = vld [vmem:[%s4322_s30 + $0x148] sm:$0xff]  ;;  %241 = vst [vmem:[%s4327_s3 + $0x138] sm:$0xff] %v240_v39  ;;  %v246_v42 = vld [vmem:[%s4322_s30 + $0x150] sm:$0xff] }
  0x2c   : > { %243 = vst [vmem:[%s4327_s3 + $0x140] sm:$0xff] %v242_v40  ;;  %245 = vst [vmem:[%s4327_s3 + $0x148] sm:$0xff] %v244_v41  ;;  %v248_v43 = vld [vmem:[%s4322_s30 + $0x158] sm:$0xff]  ;;  %v250_v44 = vld [vmem:[%s4322_s30 + $0x160] sm:$0xff] }
  0x2d   : > { %247 = vst [vmem:[%s4327_s3 + $0x150] sm:$0xff] %v246_v42  ;;  %249 = vst [vmem:[%s4327_s3 + $0x158] sm:$0xff] %v248_v43  ;;  %v252_v45 = vld [vmem:[%s4322_s30 + $0x168] sm:$0xff]  ;;  %v254_v46 = vld [vmem:[%s4322_s30 + $0x170] sm:$0xff] }
  0x2e   : > { %251 = vst [vmem:[%s4327_s3 + $0x160] sm:$0xff] %v250_v44  ;;  %v256_v47 = vld [vmem:[%s4322_s30 + $0x178] sm:$0xff]  ;;  %253 = vst [vmem:[%s4327_s3 + $0x168] sm:$0xff] %v252_v45  ;;  %v258_v48 = vld [vmem:[%s4322_s30 + $0x180] sm:$0xff] }
  0x2f   : > { %255 = vst [vmem:[%s4327_s3 + $0x170] sm:$0xff] %v254_v46  ;;  %257 = vst [vmem:[%s4327_s3 + $0x178] sm:$0xff] %v256_v47  ;;  %v260_v49 = vld [vmem:[%s4322_s30 + $0x188] sm:$0xff]  ;;  %v262_v50 = vld [vmem:[%s4322_s30 + $0x190] sm:$0xff] }
  0x30   : > { %259 = vst [vmem:[%s4327_s3 + $0x180] sm:$0xff] %v258_v48  ;;  %261 = vst [vmem:[%s4327_s3 + $0x188] sm:$0xff] %v260_v49  ;;  %v264_v51 = vld [vmem:[%s4322_s30 + $0x198] sm:$0xff]  ;;  %v266_v52 = vld [vmem:[%s4322_s30 + $0x1a0] sm:$0xff] }
  0x31   : > { %263 = vst [vmem:[%s4327_s3 + $0x190] sm:$0xff] %v262_v50  ;;  %v268_v53 = vld [vmem:[%s4322_s30 + $0x1a8] sm:$0xff]  ;;  %265 = vst [vmem:[%s4327_s3 + $0x198] sm:$0xff] %v264_v51  ;;  %v270_v54 = vld [vmem:[%s4322_s30 + $0x1b0] sm:$0xff] }
  0x32   : > { %267 = vst [vmem:[%s4327_s3 + $0x1a0] sm:$0xff] %v266_v52  ;;  %269 = vst [vmem:[%s4327_s3 + $0x1a8] sm:$0xff] %v268_v53  ;;  %v272_v55 = vld [vmem:[%s4322_s30 + $0x1b8] sm:$0xff]  ;;  %v274_v56 = vld [vmem:[%s4322_s30 + $0x1880] sm:$0xff] }
  0x33   : > { %271 = vst [vmem:[%s4327_s3 + $0x1b0] sm:$0xff] %v270_v54  ;;  %273 = vst [vmem:[%s4327_s3 + $0x1b8] sm:$0xff] %v272_v55  ;;  %v276_v57 = vld [vmem:[%s4322_s30 + $0x1888] sm:$0xff]  ;;  %v278_v58 = vld [vmem:[%s4322_s30 + $0x1890] sm:$0xff] }
  0x34   : > { %275 = vst [vmem:[%s4327_s3 + $0x1c0] sm:$0xff] %v274_v56  ;;  %v280_v59 = vld [vmem:[%s4322_s30 + $0x1898] sm:$0xff]  ;;  %277 = vst [vmem:[%s4327_s3 + $0x1c8] sm:$0xff] %v276_v57  ;;  %v282_v60 = vld [vmem:[%s4322_s30 + $0x18a0] sm:$0xff] }
  0x35   : > { %279 = vst [vmem:[%s4327_s3 + $0x1d0] sm:$0xff] %v278_v58  ;;  %281 = vst [vmem:[%s4327_s3 + $0x1d8] sm:$0xff] %v280_v59  ;;  %v284_v61 = vld [vmem:[%s4322_s30 + $0x18a8] sm:$0xff]  ;;  %v286_v62 = vld [vmem:[%s4322_s30 + $0x18b0] sm:$0xff] }
  0x36   : > { %283 = vst [vmem:[%s4327_s3 + $0x1e0] sm:$0xff] %v282_v60  ;;  %285 = vst [vmem:[%s4327_s3 + $0x1e8] sm:$0xff] %v284_v61  ;;  %v288_v63 = vld [vmem:[%s4322_s30 + $0x18b8] sm:$0xff]  ;;  %v290_v0 = vld [vmem:[%s4322_s30 + $0x18c0] sm:$0xff] }
  0x37   : > { %287 = vst [vmem:[%s4327_s3 + $0x1f0] sm:$0xff] %v286_v62  ;;  %v292_v1 = vld [vmem:[%s4322_s30 + $0x18c8] sm:$0xff]  ;;  %289 = vst [vmem:[%s4327_s3 + $0x1f8] sm:$0xff] %v288_v63  ;;  %v294_v2 = vld [vmem:[%s4322_s30 + $0x18d0] sm:$0xff] }
  0x38   : > { %291 = vst [vmem:[%s4327_s3 + $0x200] sm:$0xff] %v290_v0  ;;  %293 = vst [vmem:[%s4327_s3 + $0x208] sm:$0xff] %v292_v1  ;;  %v296_v3 = vld [vmem:[%s4322_s30 + $0x18d8] sm:$0xff]  ;;  %v298_v4 = vld [vmem:[%s4322_s30 + $0x18e0] sm:$0xff] }
  0x39   : > { %295 = vst [vmem:[%s4327_s3 + $0x210] sm:$0xff] %v294_v2  ;;  %297 = vst [vmem:[%s4327_s3 + $0x218] sm:$0xff] %v296_v3  ;;  %v300_v5 = vld [vmem:[%s4322_s30 + $0x18e8] sm:$0xff]  ;;  %v302_v6 = vld [vmem:[%s4322_s30 + $0x18f0] sm:$0xff] }
  0x3a   : > { %299 = vst [vmem:[%s4327_s3 + $0x220] sm:$0xff] %v298_v4  ;;  %v304_v7 = vld [vmem:[%s4322_s30 + $0x18f8] sm:$0xff]  ;;  %301 = vst [vmem:[%s4327_s3 + $0x228] sm:$0xff] %v300_v5  ;;  %v306_v8 = vld [vmem:[%s4322_s30 + $0x1900] sm:$0xff] }
  0x3b   : > { %303 = vst [vmem:[%s4327_s3 + $0x230] sm:$0xff] %v302_v6  ;;  %305 = vst [vmem:[%s4327_s3 + $0x238] sm:$0xff] %v304_v7  ;;  %v308_v9 = vld [vmem:[%s4322_s30 + $0x1908] sm:$0xff]  ;;  %v310_v10 = vld [vmem:[%s4322_s30 + $0x1910] sm:$0xff] }
  0x3c   : > { %307 = vst [vmem:[%s4327_s3 + $0x240] sm:$0xff] %v306_v8  ;;  %309 = vst [vmem:[%s4327_s3 + $0x248] sm:$0xff] %v308_v9  ;;  %v312_v11 = vld [vmem:[%s4322_s30 + $0x1918] sm:$0xff]  ;;  %v314_v12 = vld [vmem:[%s4322_s30 + $0x1920] sm:$0xff] }
  0x3d   : > { %311 = vst [vmem:[%s4327_s3 + $0x250] sm:$0xff] %v310_v10  ;;  %v316_v13 = vld [vmem:[%s4322_s30 + $0x1928] sm:$0xff]  ;;  %313 = vst [vmem:[%s4327_s3 + $0x258] sm:$0xff] %v312_v11  ;;  %v318_v14 = vld [vmem:[%s4322_s30 + $0x1930] sm:$0xff] }
  0x3e   : > { %315 = vst [vmem:[%s4327_s3 + $0x260] sm:$0xff] %v314_v12  ;;  %317 = vst [vmem:[%s4327_s3 + $0x268] sm:$0xff] %v316_v13  ;;  %v320_v15 = vld [vmem:[%s4322_s30 + $0x1938] sm:$0xff]  ;;  %v322_v16 = vld [vmem:[%s4322_s30 + $0x1940] sm:$0xff] }
  0x3f   : > { %319 = vst [vmem:[%s4327_s3 + $0x270] sm:$0xff] %v318_v14  ;;  %321 = vst [vmem:[%s4327_s3 + $0x278] sm:$0xff] %v320_v15  ;;  %v324_v17 = vld [vmem:[%s4322_s30 + $0x1948] sm:$0xff]  ;;  %v326_v18 = vld [vmem:[%s4322_s30 + $0x1950] sm:$0xff] }
  0x40   : > { %323 = vst [vmem:[%s4327_s3 + $0x280] sm:$0xff] %v322_v16  ;;  %v328_v19 = vld [vmem:[%s4322_s30 + $0x1958] sm:$0xff]  ;;  %325 = vst [vmem:[%s4327_s3 + $0x288] sm:$0xff] %v324_v17  ;;  %v330_v20 = vld [vmem:[%s4322_s30 + $0x1960] sm:$0xff] }
  0x41   : > { %327 = vst [vmem:[%s4327_s3 + $0x290] sm:$0xff] %v326_v18  ;;  %329 = vst [vmem:[%s4327_s3 + $0x298] sm:$0xff] %v328_v19  ;;  %v332_v21 = vld [vmem:[%s4322_s30 + $0x1968] sm:$0xff]  ;;  %v334_v22 = vld [vmem:[%s4322_s30 + $0x1970] sm:$0xff] }
  0x42   : > { %331 = vst [vmem:[%s4327_s3 + $0x2a0] sm:$0xff] %v330_v20  ;;  %333 = vst [vmem:[%s4327_s3 + $0x2a8] sm:$0xff] %v332_v21  ;;  %v336_v23 = vld [vmem:[%s4322_s30 + $0x1978] sm:$0xff]  ;;  %v338_v24 = vld [vmem:[%s4322_s30 + $0x1980] sm:$0xff] }
  0x43   : > { %335 = vst [vmem:[%s4327_s3 + $0x2b0] sm:$0xff] %v334_v22  ;;  %v340_v25 = vld [vmem:[%s4322_s30 + $0x1988] sm:$0xff]  ;;  %337 = vst [vmem:[%s4327_s3 + $0x2b8] sm:$0xff] %v336_v23  ;;  %v342_v26 = vld [vmem:[%s4322_s30 + $0x1990] sm:$0xff] }
  0x44   : > { %339 = vst [vmem:[%s4327_s3 + $0x2c0] sm:$0xff] %v338_v24  ;;  %341 = vst [vmem:[%s4327_s3 + $0x2c8] sm:$0xff] %v340_v25  ;;  %v344_v27 = vld [vmem:[%s4322_s30 + $0x1998] sm:$0xff]  ;;  %v346_v28 = vld [vmem:[%s4322_s30 + $0x19a0] sm:$0xff] }
  0x45   : > { %343 = vst [vmem:[%s4327_s3 + $0x2d0] sm:$0xff] %v342_v26  ;;  %345 = vst [vmem:[%s4327_s3 + $0x2d8] sm:$0xff] %v344_v27  ;;  %v348_v29 = vld [vmem:[%s4322_s30 + $0x19a8] sm:$0xff]  ;;  %v350_v30 = vld [vmem:[%s4322_s30 + $0x19b0] sm:$0xff] }
  0x46   : > { %347 = vst [vmem:[%s4327_s3 + $0x2e0] sm:$0xff] %v346_v28  ;;  %v352_v31 = vld [vmem:[%s4322_s30 + $0x19b8] sm:$0xff]  ;;  %349 = vst [vmem:[%s4327_s3 + $0x2e8] sm:$0xff] %v348_v29  ;;  %v354_v32 = vld [vmem:[%s4322_s30 + $0x19c0] sm:$0xff] }
  0x47   : > { %351 = vst [vmem:[%s4327_s3 + $0x2f0] sm:$0xff] %v350_v30  ;;  %353 = vst [vmem:[%s4327_s3 + $0x2f8] sm:$0xff] %v352_v31  ;;  %v356_v33 = vld [vmem:[%s4322_s30 + $0x19c8] sm:$0xff]  ;;  %v358_v34 = vld [vmem:[%s4322_s30 + $0x19d0] sm:$0xff] }
  0x48   : > { %355 = vst [vmem:[%s4327_s3 + $0x300] sm:$0xff] %v354_v32  ;;  %357 = vst [vmem:[%s4327_s3 + $0x308] sm:$0xff] %v356_v33  ;;  %v360_v35 = vld [vmem:[%s4322_s30 + $0x19d8] sm:$0xff]  ;;  %v362_v36 = vld [vmem:[%s4322_s30 + $0x19e0] sm:$0xff] }
  0x49   : > { %359 = vst [vmem:[%s4327_s3 + $0x310] sm:$0xff] %v358_v34  ;;  %v364_v37 = vld [vmem:[%s4322_s30 + $0x19e8] sm:$0xff]  ;;  %361 = vst [vmem:[%s4327_s3 + $0x318] sm:$0xff] %v360_v35  ;;  %v366_v38 = vld [vmem:[%s4322_s30 + $0x19f0] sm:$0xff] }
  0x4a   : > { %363 = vst [vmem:[%s4327_s3 + $0x320] sm:$0xff] %v362_v36  ;;  %365 = vst [vmem:[%s4327_s3 + $0x328] sm:$0xff] %v364_v37  ;;  %v368_v39 = vld [vmem:[%s4322_s30 + $0x19f8] sm:$0xff]  ;;  %v370_v40 = vld [vmem:[%s4322_s30 + $0x1a00] sm:$0xff] }
  0x4b   : > { %367 = vst [vmem:[%s4327_s3 + $0x330] sm:$0xff] %v366_v38  ;;  %369 = vst [vmem:[%s4327_s3 + $0x338] sm:$0xff] %v368_v39  ;;  %v372_v41 = vld [vmem:[%s4322_s30 + $0x1a08] sm:$0xff]  ;;  %v374_v42 = vld [vmem:[%s4322_s30 + $0x1a10] sm:$0xff] }
  0x4c   : > { %371 = vst [vmem:[%s4327_s3 + $0x340] sm:$0xff] %v370_v40  ;;  %v376_v43 = vld [vmem:[%s4322_s30 + $0x1a18] sm:$0xff]  ;;  %373 = vst [vmem:[%s4327_s3 + $0x348] sm:$0xff] %v372_v41  ;;  %v378_v44 = vld [vmem:[%s4322_s30 + $0x1a20] sm:$0xff] }
  0x4d   : > { %375 = vst [vmem:[%s4327_s3 + $0x350] sm:$0xff] %v374_v42  ;;  %377 = vst [vmem:[%s4327_s3 + $0x358] sm:$0xff] %v376_v43  ;;  %v380_v45 = vld [vmem:[%s4322_s30 + $0x1a28] sm:$0xff]  ;;  %v382_v46 = vld [vmem:[%s4322_s30 + $0x1a30] sm:$0xff] }
  0x4e   : > { %379 = vst [vmem:[%s4327_s3 + $0x360] sm:$0xff] %v378_v44  ;;  %381 = vst [vmem:[%s4327_s3 + $0x368] sm:$0xff] %v380_v45  ;;  %v384_v47 = vld [vmem:[%s4322_s30 + $0x1a38] sm:$0xff]  ;;  %v386_v48 = vld [vmem:[%s4322_s30 + $0x3100] sm:$0xff] }
  0x4f   : > { %383 = vst [vmem:[%s4327_s3 + $0x370] sm:$0xff] %v382_v46  ;;  %v388_v49 = vld [vmem:[%s4322_s30 + $0x3108] sm:$0xff]  ;;  %385 = vst [vmem:[%s4327_s3 + $0x378] sm:$0xff] %v384_v47  ;;  %v390_v50 = vld [vmem:[%s4322_s30 + $0x3110] sm:$0xff] }
  0x50   : > { %387 = vst [vmem:[%s4327_s3 + $0x380] sm:$0xff] %v386_v48  ;;  %389 = vst [vmem:[%s4327_s3 + $0x388] sm:$0xff] %v388_v49  ;;  %v392_v51 = vld [vmem:[%s4322_s30 + $0x3118] sm:$0xff]  ;;  %v394_v52 = vld [vmem:[%s4322_s30 + $0x3120] sm:$0xff] }
  0x51   : > { %391 = vst [vmem:[%s4327_s3 + $0x390] sm:$0xff] %v390_v50  ;;  %393 = vst [vmem:[%s4327_s3 + $0x398] sm:$0xff] %v392_v51  ;;  %v396_v53 = vld [vmem:[%s4322_s30 + $0x3128] sm:$0xff]  ;;  %v398_v54 = vld [vmem:[%s4322_s30 + $0x3130] sm:$0xff] }
  0x52   : > { %395 = vst [vmem:[%s4327_s3 + $0x3a0] sm:$0xff] %v394_v52  ;;  %v400_v55 = vld [vmem:[%s4322_s30 + $0x3138] sm:$0xff]  ;;  %397 = vst [vmem:[%s4327_s3 + $0x3a8] sm:$0xff] %v396_v53  ;;  %v402_v56 = vld [vmem:[%s4322_s30 + $0x3140] sm:$0xff] }
  0x53   : > { %399 = vst [vmem:[%s4327_s3 + $0x3b0] sm:$0xff] %v398_v54  ;;  %401 = vst [vmem:[%s4327_s3 + $0x3b8] sm:$0xff] %v400_v55  ;;  %v404_v57 = vld [vmem:[%s4322_s30 + $0x3148] sm:$0xff]  ;;  %v406_v58 = vld [vmem:[%s4322_s30 + $0x3150] sm:$0xff] }
  0x54   : > { %403 = vst [vmem:[%s4327_s3 + $0x3c0] sm:$0xff] %v402_v56  ;;  %405 = vst [vmem:[%s4327_s3 + $0x3c8] sm:$0xff] %v404_v57  ;;  %v408_v59 = vld [vmem:[%s4322_s30 + $0x3158] sm:$0xff]  ;;  %v410_v60 = vld [vmem:[%s4322_s30 + $0x3160] sm:$0xff] }
  0x55   : > { %407 = vst [vmem:[%s4327_s3 + $0x3d0] sm:$0xff] %v406_v58  ;;  %v412_v61 = vld [vmem:[%s4322_s30 + $0x3168] sm:$0xff]  ;;  %409 = vst [vmem:[%s4327_s3 + $0x3d8] sm:$0xff] %v408_v59  ;;  %v414_v62 = vld [vmem:[%s4322_s30 + $0x3170] sm:$0xff] }
  0x56   : > { %411 = vst [vmem:[%s4327_s3 + $0x3e0] sm:$0xff] %v410_v60  ;;  %413 = vst [vmem:[%s4327_s3 + $0x3e8] sm:$0xff] %v412_v61  ;;  %v416_v63 = vld [vmem:[%s4322_s30 + $0x3178] sm:$0xff]  ;;  %v418_v0 = vld [vmem:[%s4322_s30 + $0x3180] sm:$0xff] }
  0x57   : > { %415 = vst [vmem:[%s4327_s3 + $0x3f0] sm:$0xff] %v414_v62  ;;  %417 = vst [vmem:[%s4327_s3 + $0x3f8] sm:$0xff] %v416_v63  ;;  %v420_v1 = vld [vmem:[%s4322_s30 + $0x3188] sm:$0xff]  ;;  %v422_v2 = vld [vmem:[%s4322_s30 + $0x3190] sm:$0xff] }
  0x58   : > { %419 = vst [vmem:[%s4327_s3 + $0x400] sm:$0xff] %v418_v0  ;;  %v424_v3 = vld [vmem:[%s4322_s30 + $0x3198] sm:$0xff]  ;;  %421 = vst [vmem:[%s4327_s3 + $0x408] sm:$0xff] %v420_v1  ;;  %v426_v4 = vld [vmem:[%s4322_s30 + $0x31a0] sm:$0xff] }
  0x59   : > { %423 = vst [vmem:[%s4327_s3 + $0x410] sm:$0xff] %v422_v2  ;;  %425 = vst [vmem:[%s4327_s3 + $0x418] sm:$0xff] %v424_v3  ;;  %v428_v5 = vld [vmem:[%s4322_s30 + $0x31a8] sm:$0xff]  ;;  %v430_v6 = vld [vmem:[%s4322_s30 + $0x31b0] sm:$0xff] }
  0x5a   : > { %427 = vst [vmem:[%s4327_s3 + $0x420] sm:$0xff] %v426_v4  ;;  %429 = vst [vmem:[%s4327_s3 + $0x428] sm:$0xff] %v428_v5  ;;  %v432_v7 = vld [vmem:[%s4322_s30 + $0x31b8] sm:$0xff]  ;;  %v434_v8 = vld [vmem:[%s4322_s30 + $0x31c0] sm:$0xff] }
  0x5b   : > { %431 = vst [vmem:[%s4327_s3 + $0x430] sm:$0xff] %v430_v6  ;;  %v436_v9 = vld [vmem:[%s4322_s30 + $0x31c8] sm:$0xff]  ;;  %433 = vst [vmem:[%s4327_s3 + $0x438] sm:$0xff] %v432_v7  ;;  %v438_v10 = vld [vmem:[%s4322_s30 + $0x31d0] sm:$0xff] }
  0x5c   : > { %435 = vst [vmem:[%s4327_s3 + $0x440] sm:$0xff] %v434_v8  ;;  %437 = vst [vmem:[%s4327_s3 + $0x448] sm:$0xff] %v436_v9  ;;  %v440_v11 = vld [vmem:[%s4322_s30 + $0x31d8] sm:$0xff]  ;;  %v442_v12 = vld [vmem:[%s4322_s30 + $0x31e0] sm:$0xff] }
  0x5d   : > { %439 = vst [vmem:[%s4327_s3 + $0x450] sm:$0xff] %v438_v10  ;;  %441 = vst [vmem:[%s4327_s3 + $0x458] sm:$0xff] %v440_v11  ;;  %v444_v13 = vld [vmem:[%s4322_s30 + $0x31e8] sm:$0xff]  ;;  %v446_v14 = vld [vmem:[%s4322_s30 + $0x31f0] sm:$0xff] }
  0x5e   : > { %443 = vst [vmem:[%s4327_s3 + $0x460] sm:$0xff] %v442_v12  ;;  %v448_v15 = vld [vmem:[%s4322_s30 + $0x31f8] sm:$0xff]  ;;  %445 = vst [vmem:[%s4327_s3 + $0x468] sm:$0xff] %v444_v13  ;;  %v450_v16 = vld [vmem:[%s4322_s30 + $0x3200] sm:$0xff] }
  0x5f   : > { %447 = vst [vmem:[%s4327_s3 + $0x470] sm:$0xff] %v446_v14  ;;  %449 = vst [vmem:[%s4327_s3 + $0x478] sm:$0xff] %v448_v15  ;;  %v452_v17 = vld [vmem:[%s4322_s30 + $0x3208] sm:$0xff]  ;;  %v454_v18 = vld [vmem:[%s4322_s30 + $0x3210] sm:$0xff] }
  0x60   : > { %451 = vst [vmem:[%s4327_s3 + $0x480] sm:$0xff] %v450_v16  ;;  %453 = vst [vmem:[%s4327_s3 + $0x488] sm:$0xff] %v452_v17  ;;  %v456_v19 = vld [vmem:[%s4322_s30 + $0x3218] sm:$0xff]  ;;  %v458_v20 = vld [vmem:[%s4322_s30 + $0x3220] sm:$0xff] }
  0x61   : > { %455 = vst [vmem:[%s4327_s3 + $0x490] sm:$0xff] %v454_v18  ;;  %v460_v21 = vld [vmem:[%s4322_s30 + $0x3228] sm:$0xff]  ;;  %457 = vst [vmem:[%s4327_s3 + $0x498] sm:$0xff] %v456_v19  ;;  %v462_v22 = vld [vmem:[%s4322_s30 + $0x3230] sm:$0xff] }
  0x62   : > { %459 = vst [vmem:[%s4327_s3 + $0x4a0] sm:$0xff] %v458_v20  ;;  %461 = vst [vmem:[%s4327_s3 + $0x4a8] sm:$0xff] %v460_v21  ;;  %v464_v23 = vld [vmem:[%s4322_s30 + $0x3238] sm:$0xff]  ;;  %v466_v24 = vld [vmem:[%s4322_s30 + $0x3240] sm:$0xff] }
  0x63   : > { %463 = vst [vmem:[%s4327_s3 + $0x4b0] sm:$0xff] %v462_v22  ;;  %465 = vst [vmem:[%s4327_s3 + $0x4b8] sm:$0xff] %v464_v23  ;;  %v468_v25 = vld [vmem:[%s4322_s30 + $0x3248] sm:$0xff]  ;;  %v470_v26 = vld [vmem:[%s4322_s30 + $0x3250] sm:$0xff] }
  0x64   : > { %467 = vst [vmem:[%s4327_s3 + $0x4c0] sm:$0xff] %v466_v24  ;;  %v472_v27 = vld [vmem:[%s4322_s30 + $0x3258] sm:$0xff]  ;;  %469 = vst [vmem:[%s4327_s3 + $0x4c8] sm:$0xff] %v468_v25  ;;  %v474_v28 = vld [vmem:[%s4322_s30 + $0x3260] sm:$0xff] }
  0x65   : > { %471 = vst [vmem:[%s4327_s3 + $0x4d0] sm:$0xff] %v470_v26  ;;  %473 = vst [vmem:[%s4327_s3 + $0x4d8] sm:$0xff] %v472_v27  ;;  %v476_v29 = vld [vmem:[%s4322_s30 + $0x3268] sm:$0xff]  ;;  %v478_v30 = vld [vmem:[%s4322_s30 + $0x3270] sm:$0xff] }
  0x66   : > { %475 = vst [vmem:[%s4327_s3 + $0x4e0] sm:$0xff] %v474_v28  ;;  %477 = vst [vmem:[%s4327_s3 + $0x4e8] sm:$0xff] %v476_v29  ;;  %v480_v31 = vld [vmem:[%s4322_s30 + $0x3278] sm:$0xff]  ;;  %v482_v32 = vld [vmem:[%s4322_s30 + $0x3280] sm:$0xff] }
  0x67   : > { %479 = vst [vmem:[%s4327_s3 + $0x4f0] sm:$0xff] %v478_v30  ;;  %v484_v33 = vld [vmem:[%s4322_s30 + $0x3288] sm:$0xff]  ;;  %481 = vst [vmem:[%s4327_s3 + $0x4f8] sm:$0xff] %v480_v31  ;;  %v486_v34 = vld [vmem:[%s4322_s30 + $0x3290] sm:$0xff] }
  0x68   : > { %483 = vst [vmem:[%s4327_s3 + $0x500] sm:$0xff] %v482_v32  ;;  %485 = vst [vmem:[%s4327_s3 + $0x508] sm:$0xff] %v484_v33  ;;  %v488_v35 = vld [vmem:[%s4322_s30 + $0x3298] sm:$0xff]  ;;  %v490_v36 = vld [vmem:[%s4322_s30 + $0x32a0] sm:$0xff] }
  0x69   : > { %487 = vst [vmem:[%s4327_s3 + $0x510] sm:$0xff] %v486_v34  ;;  %489 = vst [vmem:[%s4327_s3 + $0x518] sm:$0xff] %v488_v35  ;;  %v492_v37 = vld [vmem:[%s4322_s30 + $0x32a8] sm:$0xff]  ;;  %v494_v38 = vld [vmem:[%s4322_s30 + $0x32b0] sm:$0xff] }
  0x6a   : > { %491 = vst [vmem:[%s4327_s3 + $0x520] sm:$0xff] %v490_v36  ;;  %v496_v39 = vld [vmem:[%s4322_s30 + $0x32b8] sm:$0xff]  ;;  %493 = vst [vmem:[%s4327_s3 + $0x528] sm:$0xff] %v492_v37  ;;  %v498_v40 = vld [vmem:[%s4322_s30 + $0x4980] sm:$0xff] }
  0x6b   : > { %495 = vst [vmem:[%s4327_s3 + $0x530] sm:$0xff] %v494_v38  ;;  %497 = vst [vmem:[%s4327_s3 + $0x538] sm:$0xff] %v496_v39  ;;  %v500_v41 = vld [vmem:[%s4322_s30 + $0x4988] sm:$0xff]  ;;  %v502_v42 = vld [vmem:[%s4322_s30 + $0x4990] sm:$0xff] }
  0x6c   : > { %499 = vst [vmem:[%s4327_s3 + $0x540] sm:$0xff] %v498_v40  ;;  %501 = vst [vmem:[%s4327_s3 + $0x548] sm:$0xff] %v500_v41  ;;  %v504_v43 = vld [vmem:[%s4322_s30 + $0x4998] sm:$0xff]  ;;  %v506_v44 = vld [vmem:[%s4322_s30 + $0x49a0] sm:$0xff] }
  0x6d   : > { %503 = vst [vmem:[%s4327_s3 + $0x550] sm:$0xff] %v502_v42  ;;  %v508_v45 = vld [vmem:[%s4322_s30 + $0x49a8] sm:$0xff]  ;;  %505 = vst [vmem:[%s4327_s3 + $0x558] sm:$0xff] %v504_v43  ;;  %v510_v46 = vld [vmem:[%s4322_s30 + $0x49b0] sm:$0xff] }
  0x6e   : > { %507 = vst [vmem:[%s4327_s3 + $0x560] sm:$0xff] %v506_v44  ;;  %509 = vst [vmem:[%s4327_s3 + $0x568] sm:$0xff] %v508_v45  ;;  %v512_v47 = vld [vmem:[%s4322_s30 + $0x49b8] sm:$0xff]  ;;  %v514_v48 = vld [vmem:[%s4322_s30 + $0x49c0] sm:$0xff] }
  0x6f   : > { %511 = vst [vmem:[%s4327_s3 + $0x570] sm:$0xff] %v510_v46  ;;  %513 = vst [vmem:[%s4327_s3 + $0x578] sm:$0xff] %v512_v47  ;;  %v516_v49 = vld [vmem:[%s4322_s30 + $0x49c8] sm:$0xff]  ;;  %v518_v50 = vld [vmem:[%s4322_s30 + $0x49d0] sm:$0xff] }
  0x70   : > { %515 = vst [vmem:[%s4327_s3 + $0x580] sm:$0xff] %v514_v48  ;;  %v520_v51 = vld [vmem:[%s4322_s30 + $0x49d8] sm:$0xff]  ;;  %517 = vst [vmem:[%s4327_s3 + $0x588] sm:$0xff] %v516_v49  ;;  %v522_v52 = vld [vmem:[%s4322_s30 + $0x49e0] sm:$0xff] }
  0x71   : > { %519 = vst [vmem:[%s4327_s3 + $0x590] sm:$0xff] %v518_v50  ;;  %521 = vst [vmem:[%s4327_s3 + $0x598] sm:$0xff] %v520_v51  ;;  %v524_v53 = vld [vmem:[%s4322_s30 + $0x49e8] sm:$0xff]  ;;  %v526_v54 = vld [vmem:[%s4322_s30 + $0x49f0] sm:$0xff] }
  0x72   : > { %523 = vst [vmem:[%s4327_s3 + $0x5a0] sm:$0xff] %v522_v52  ;;  %525 = vst [vmem:[%s4327_s3 + $0x5a8] sm:$0xff] %v524_v53  ;;  %v528_v55 = vld [vmem:[%s4322_s30 + $0x49f8] sm:$0xff]  ;;  %v530_v56 = vld [vmem:[%s4322_s30 + $0x4a00] sm:$0xff] }
  0x73   : > { %527 = vst [vmem:[%s4327_s3 + $0x5b0] sm:$0xff] %v526_v54  ;;  %v532_v57 = vld [vmem:[%s4322_s30 + $0x4a08] sm:$0xff]  ;;  %529 = vst [vmem:[%s4327_s3 + $0x5b8] sm:$0xff] %v528_v55  ;;  %v534_v58 = vld [vmem:[%s4322_s30 + $0x4a10] sm:$0xff] }
  0x74   : > { %531 = vst [vmem:[%s4327_s3 + $0x5c0] sm:$0xff] %v530_v56  ;;  %533 = vst [vmem:[%s4327_s3 + $0x5c8] sm:$0xff] %v532_v57  ;;  %v536_v59 = vld [vmem:[%s4322_s30 + $0x4a18] sm:$0xff]  ;;  %v538_v60 = vld [vmem:[%s4322_s30 + $0x4a20] sm:$0xff] }
  0x75   : > { %535 = vst [vmem:[%s4327_s3 + $0x5d0] sm:$0xff] %v534_v58  ;;  %537 = vst [vmem:[%s4327_s3 + $0x5d8] sm:$0xff] %v536_v59  ;;  %v540_v61 = vld [vmem:[%s4322_s30 + $0x4a28] sm:$0xff]  ;;  %v542_v62 = vld [vmem:[%s4322_s30 + $0x4a30] sm:$0xff] }
  0x76   : > { %539 = vst [vmem:[%s4327_s3 + $0x5e0] sm:$0xff] %v538_v60  ;;  %v544_v63 = vld [vmem:[%s4322_s30 + $0x4a38] sm:$0xff]  ;;  %541 = vst [vmem:[%s4327_s3 + $0x5e8] sm:$0xff] %v540_v61  ;;  %v546_v0 = vld [vmem:[%s4322_s30 + $0x4a40] sm:$0xff] }
  0x77   : > { %543 = vst [vmem:[%s4327_s3 + $0x5f0] sm:$0xff] %v542_v62  ;;  %545 = vst [vmem:[%s4327_s3 + $0x5f8] sm:$0xff] %v544_v63  ;;  %v548_v1 = vld [vmem:[%s4322_s30 + $0x4a48] sm:$0xff]  ;;  %v550_v2 = vld [vmem:[%s4322_s30 + $0x4a50] sm:$0xff] }
  0x78   : > { %547 = vst [vmem:[%s4327_s3 + $0x600] sm:$0xff] %v546_v0  ;;  %549 = vst [vmem:[%s4327_s3 + $0x608] sm:$0xff] %v548_v1  ;;  %v552_v3 = vld [vmem:[%s4322_s30 + $0x4a58] sm:$0xff]  ;;  %v554_v4 = vld [vmem:[%s4322_s30 + $0x4a60] sm:$0xff] }
  0x79   : > { %551 = vst [vmem:[%s4327_s3 + $0x610] sm:$0xff] %v550_v2  ;;  %v556_v5 = vld [vmem:[%s4322_s30 + $0x4a68] sm:$0xff]  ;;  %553 = vst [vmem:[%s4327_s3 + $0x618] sm:$0xff] %v552_v3  ;;  %v558_v6 = vld [vmem:[%s4322_s30 + $0x4a70] sm:$0xff] }
  0x7a   : > { %555 = vst [vmem:[%s4327_s3 + $0x620] sm:$0xff] %v554_v4  ;;  %557 = vst [vmem:[%s4327_s3 + $0x628] sm:$0xff] %v556_v5  ;;  %v560_v7 = vld [vmem:[%s4322_s30 + $0x4a78] sm:$0xff]  ;;  %v562_v8 = vld [vmem:[%s4322_s30 + $0x4a80] sm:$0xff] }
  0x7b   : > { %559 = vst [vmem:[%s4327_s3 + $0x630] sm:$0xff] %v558_v6  ;;  %561 = vst [vmem:[%s4327_s3 + $0x638] sm:$0xff] %v560_v7  ;;  %v564_v9 = vld [vmem:[%s4322_s30 + $0x4a88] sm:$0xff]  ;;  %v566_v10 = vld [vmem:[%s4322_s30 + $0x4a90] sm:$0xff] }
  0x7c   : > { %563 = vst [vmem:[%s4327_s3 + $0x640] sm:$0xff] %v562_v8  ;;  %v568_v11 = vld [vmem:[%s4322_s30 + $0x4a98] sm:$0xff]  ;;  %565 = vst [vmem:[%s4327_s3 + $0x648] sm:$0xff] %v564_v9  ;;  %v570_v12 = vld [vmem:[%s4322_s30 + $0x4aa0] sm:$0xff] }
  0x7d   : > { %567 = vst [vmem:[%s4327_s3 + $0x650] sm:$0xff] %v566_v10  ;;  %569 = vst [vmem:[%s4327_s3 + $0x658] sm:$0xff] %v568_v11  ;;  %v572_v13 = vld [vmem:[%s4322_s30 + $0x4aa8] sm:$0xff]  ;;  %v574_v14 = vld [vmem:[%s4322_s30 + $0x4ab0] sm:$0xff] }
  0x7e   : > { %571 = vst [vmem:[%s4327_s3 + $0x660] sm:$0xff] %v570_v12  ;;  %573 = vst [vmem:[%s4327_s3 + $0x668] sm:$0xff] %v572_v13  ;;  %v576_v15 = vld [vmem:[%s4322_s30 + $0x4ab8] sm:$0xff]  ;;  %v578_v16 = vld [vmem:[%s4322_s30 + $0x4ac0] sm:$0xff] }
  0x7f   : > { %575 = vst [vmem:[%s4327_s3 + $0x670] sm:$0xff] %v574_v14  ;;  %v580_v17 = vld [vmem:[%s4322_s30 + $0x4ac8] sm:$0xff]  ;;  %577 = vst [vmem:[%s4327_s3 + $0x678] sm:$0xff] %v576_v15  ;;  %v582_v18 = vld [vmem:[%s4322_s30 + $0x4ad0] sm:$0xff] }
  0x80   : > { %579 = vst [vmem:[%s4327_s3 + $0x680] sm:$0xff] %v578_v16  ;;  %581 = vst [vmem:[%s4327_s3 + $0x688] sm:$0xff] %v580_v17  ;;  %v584_v19 = vld [vmem:[%s4322_s30 + $0x4ad8] sm:$0xff]  ;;  %v586_v20 = vld [vmem:[%s4322_s30 + $0x4ae0] sm:$0xff] }
  0x81   : > { %583 = vst [vmem:[%s4327_s3 + $0x690] sm:$0xff] %v582_v18  ;;  %585 = vst [vmem:[%s4327_s3 + $0x698] sm:$0xff] %v584_v19  ;;  %v588_v21 = vld [vmem:[%s4322_s30 + $0x4ae8] sm:$0xff]  ;;  %v590_v22 = vld [vmem:[%s4322_s30 + $0x4af0] sm:$0xff] }
  0x82   : > { %587 = vst [vmem:[%s4327_s3 + $0x6a0] sm:$0xff] %v586_v20  ;;  %v592_v23 = vld [vmem:[%s4322_s30 + $0x4af8] sm:$0xff]  ;;  %589 = vst [vmem:[%s4327_s3 + $0x6a8] sm:$0xff] %v588_v21  ;;  %v594_v24 = vld [vmem:[%s4322_s30 + $0x4b00] sm:$0xff] }
  0x83   : > { %591 = vst [vmem:[%s4327_s3 + $0x6b0] sm:$0xff] %v590_v22  ;;  %593 = vst [vmem:[%s4327_s3 + $0x6b8] sm:$0xff] %v592_v23  ;;  %v596_v25 = vld [vmem:[%s4322_s30 + $0x4b08] sm:$0xff]  ;;  %v598_v26 = vld [vmem:[%s4322_s30 + $0x4b10] sm:$0xff] }
  0x84   : > { %595 = vst [vmem:[%s4327_s3 + $0x6c0] sm:$0xff] %v594_v24  ;;  %597 = vst [vmem:[%s4327_s3 + $0x6c8] sm:$0xff] %v596_v25  ;;  %v600_v27 = vld [vmem:[%s4322_s30 + $0x4b18] sm:$0xff]  ;;  %v602_v28 = vld [vmem:[%s4322_s30 + $0x4b20] sm:$0xff] }
  0x85   : > { %599 = vst [vmem:[%s4327_s3 + $0x6d0] sm:$0xff] %v598_v26  ;;  %v604_v29 = vld [vmem:[%s4322_s30 + $0x4b28] sm:$0xff]  ;;  %601 = vst [vmem:[%s4327_s3 + $0x6d8] sm:$0xff] %v600_v27  ;;  %v606_v30 = vld [vmem:[%s4322_s30 + $0x4b30] sm:$0xff] }
  0x86   : > { %603 = vst [vmem:[%s4327_s3 + $0x6e0] sm:$0xff] %v602_v28  ;;  %605 = vst [vmem:[%s4327_s3 + $0x6e8] sm:$0xff] %v604_v29  ;;  %v608_v31 = vld [vmem:[%s4322_s30 + $0x4b38] sm:$0xff]  ;;  %v610_v32 = vld [vmem:[%s4322_s30 + $0x6200] sm:$0xff] }
  0x87   : > { %607 = vst [vmem:[%s4327_s3 + $0x6f0] sm:$0xff] %v606_v30  ;;  %609 = vst [vmem:[%s4327_s3 + $0x6f8] sm:$0xff] %v608_v31  ;;  %v612_v33 = vld [vmem:[%s4322_s30 + $0x6208] sm:$0xff]  ;;  %v614_v34 = vld [vmem:[%s4322_s30 + $0x6210] sm:$0xff] }
  0x88   : > { %611 = vst [vmem:[%s4327_s3 + $0x700] sm:$0xff] %v610_v32  ;;  %v616_v35 = vld [vmem:[%s4322_s30 + $0x6218] sm:$0xff]  ;;  %613 = vst [vmem:[%s4327_s3 + $0x708] sm:$0xff] %v612_v33  ;;  %v618_v36 = vld [vmem:[%s4322_s30 + $0x6220] sm:$0xff] }
  0x89   : > { %615 = vst [vmem:[%s4327_s3 + $0x710] sm:$0xff] %v614_v34  ;;  %617 = vst [vmem:[%s4327_s3 + $0x718] sm:$0xff] %v616_v35  ;;  %v620_v37 = vld [vmem:[%s4322_s30 + $0x6228] sm:$0xff]  ;;  %v622_v38 = vld [vmem:[%s4322_s30 + $0x6230] sm:$0xff] }
  0x8a   : > { %619 = vst [vmem:[%s4327_s3 + $0x720] sm:$0xff] %v618_v36  ;;  %621 = vst [vmem:[%s4327_s3 + $0x728] sm:$0xff] %v620_v37  ;;  %v624_v39 = vld [vmem:[%s4322_s30 + $0x6238] sm:$0xff]  ;;  %v626_v40 = vld [vmem:[%s4322_s30 + $0x6240] sm:$0xff] }
  0x8b   : > { %623 = vst [vmem:[%s4327_s3 + $0x730] sm:$0xff] %v622_v38  ;;  %v628_v41 = vld [vmem:[%s4322_s30 + $0x6248] sm:$0xff]  ;;  %625 = vst [vmem:[%s4327_s3 + $0x738] sm:$0xff] %v624_v39  ;;  %v630_v42 = vld [vmem:[%s4322_s30 + $0x6250] sm:$0xff] }
  0x8c   : > { %627 = vst [vmem:[%s4327_s3 + $0x740] sm:$0xff] %v626_v40  ;;  %629 = vst [vmem:[%s4327_s3 + $0x748] sm:$0xff] %v628_v41  ;;  %v632_v43 = vld [vmem:[%s4322_s30 + $0x6258] sm:$0xff]  ;;  %v634_v44 = vld [vmem:[%s4322_s30 + $0x6260] sm:$0xff] }
  0x8d   : > { %631 = vst [vmem:[%s4327_s3 + $0x750] sm:$0xff] %v630_v42  ;;  %633 = vst [vmem:[%s4327_s3 + $0x758] sm:$0xff] %v632_v43  ;;  %v636_v45 = vld [vmem:[%s4322_s30 + $0x6268] sm:$0xff]  ;;  %v638_v46 = vld [vmem:[%s4322_s30 + $0x6270] sm:$0xff] }
  0x8e   : > { %635 = vst [vmem:[%s4327_s3 + $0x760] sm:$0xff] %v634_v44  ;;  %v640_v47 = vld [vmem:[%s4322_s30 + $0x6278] sm:$0xff]  ;;  %637 = vst [vmem:[%s4327_s3 + $0x768] sm:$0xff] %v636_v45  ;;  %v642_v48 = vld [vmem:[%s4322_s30 + $0x6280] sm:$0xff] }
  0x8f   : > { %639 = vst [vmem:[%s4327_s3 + $0x770] sm:$0xff] %v638_v46  ;;  %641 = vst [vmem:[%s4327_s3 + $0x778] sm:$0xff] %v640_v47  ;;  %v644_v49 = vld [vmem:[%s4322_s30 + $0x6288] sm:$0xff]  ;;  %v646_v50 = vld [vmem:[%s4322_s30 + $0x6290] sm:$0xff] }
  0x90   : > { %643 = vst [vmem:[%s4327_s3 + $0x780] sm:$0xff] %v642_v48  ;;  %645 = vst [vmem:[%s4327_s3 + $0x788] sm:$0xff] %v644_v49  ;;  %v648_v51 = vld [vmem:[%s4322_s30 + $0x6298] sm:$0xff]  ;;  %v650_v52 = vld [vmem:[%s4322_s30 + $0x62a0] sm:$0xff] }
  0x91   : > { %647 = vst [vmem:[%s4327_s3 + $0x790] sm:$0xff] %v646_v50  ;;  %v652_v53 = vld [vmem:[%s4322_s30 + $0x62a8] sm:$0xff]  ;;  %649 = vst [vmem:[%s4327_s3 + $0x798] sm:$0xff] %v648_v51  ;;  %v654_v54 = vld [vmem:[%s4322_s30 + $0x62b0] sm:$0xff] }
  0x92   : > { %651 = vst [vmem:[%s4327_s3 + $0x7a0] sm:$0xff] %v650_v52  ;;  %653 = vst [vmem:[%s4327_s3 + $0x7a8] sm:$0xff] %v652_v53  ;;  %v656_v55 = vld [vmem:[%s4322_s30 + $0x62b8] sm:$0xff]  ;;  %v658_v56 = vld [vmem:[%s4322_s30 + $0x62c0] sm:$0xff] }
  0x93   : > { %655 = vst [vmem:[%s4327_s3 + $0x7b0] sm:$0xff] %v654_v54  ;;  %657 = vst [vmem:[%s4327_s3 + $0x7b8] sm:$0xff] %v656_v55  ;;  %v660_v57 = vld [vmem:[%s4322_s30 + $0x62c8] sm:$0xff]  ;;  %v662_v58 = vld [vmem:[%s4322_s30 + $0x62d0] sm:$0xff] }
  0x94   : > { %659 = vst [vmem:[%s4327_s3 + $0x7c0] sm:$0xff] %v658_v56  ;;  %v664_v59 = vld [vmem:[%s4322_s30 + $0x62d8] sm:$0xff]  ;;  %661 = vst [vmem:[%s4327_s3 + $0x7c8] sm:$0xff] %v660_v57  ;;  %v666_v60 = vld [vmem:[%s4322_s30 + $0x62e0] sm:$0xff] }
  0x95   : > { %663 = vst [vmem:[%s4327_s3 + $0x7d0] sm:$0xff] %v662_v58  ;;  %665 = vst [vmem:[%s4327_s3 + $0x7d8] sm:$0xff] %v664_v59  ;;  %v668_v61 = vld [vmem:[%s4322_s30 + $0x62e8] sm:$0xff]  ;;  %v670_v62 = vld [vmem:[%s4322_s30 + $0x62f0] sm:$0xff] }
  0x96   : > { %667 = vst [vmem:[%s4327_s3 + $0x7e0] sm:$0xff] %v666_v60  ;;  %669 = vst [vmem:[%s4327_s3 + $0x7e8] sm:$0xff] %v668_v61  ;;  %v672_v63 = vld [vmem:[%s4322_s30 + $0x62f8] sm:$0xff]  ;;  %v674_v0 = vld [vmem:[%s4322_s30 + $0x6300] sm:$0xff] }
  0x97   : > { %671 = vst [vmem:[%s4327_s3 + $0x7f0] sm:$0xff] %v670_v62  ;;  %v676_v1 = vld [vmem:[%s4322_s30 + $0x6308] sm:$0xff]  ;;  %673 = vst [vmem:[%s4327_s3 + $0x7f8] sm:$0xff] %v672_v63  ;;  %v678_v2 = vld [vmem:[%s4322_s30 + $0x6310] sm:$0xff] }
  0x98   : > { %675 = vst [vmem:[%s4327_s3 + $0x800] sm:$0xff] %v674_v0  ;;  %677 = vst [vmem:[%s4327_s3 + $0x808] sm:$0xff] %v676_v1  ;;  %v680_v3 = vld [vmem:[%s4322_s30 + $0x6318] sm:$0xff]  ;;  %v682_v4 = vld [vmem:[%s4322_s30 + $0x6320] sm:$0xff] }
  0x99   : > { %679 = vst [vmem:[%s4327_s3 + $0x810] sm:$0xff] %v678_v2  ;;  %681 = vst [vmem:[%s4327_s3 + $0x818] sm:$0xff] %v680_v3  ;;  %v684_v5 = vld [vmem:[%s4322_s30 + $0x6328] sm:$0xff]  ;;  %v686_v6 = vld [vmem:[%s4322_s30 + $0x6330] sm:$0xff] }
  0x9a   : > { %683 = vst [vmem:[%s4327_s3 + $0x820] sm:$0xff] %v682_v4  ;;  %v688_v7 = vld [vmem:[%s4322_s30 + $0x6338] sm:$0xff]  ;;  %685 = vst [vmem:[%s4327_s3 + $0x828] sm:$0xff] %v684_v5  ;;  %v690_v8 = vld [vmem:[%s4322_s30 + $0x6340] sm:$0xff] }
  0x9b   : > { %687 = vst [vmem:[%s4327_s3 + $0x830] sm:$0xff] %v686_v6  ;;  %689 = vst [vmem:[%s4327_s3 + $0x838] sm:$0xff] %v688_v7  ;;  %v692_v9 = vld [vmem:[%s4322_s30 + $0x6348] sm:$0xff]  ;;  %v694_v10 = vld [vmem:[%s4322_s30 + $0x6350] sm:$0xff] }
  0x9c   : > { %691 = vst [vmem:[%s4327_s3 + $0x840] sm:$0xff] %v690_v8  ;;  %693 = vst [vmem:[%s4327_s3 + $0x848] sm:$0xff] %v692_v9  ;;  %v696_v11 = vld [vmem:[%s4322_s30 + $0x6358] sm:$0xff]  ;;  %v698_v12 = vld [vmem:[%s4322_s30 + $0x6360] sm:$0xff] }
  0x9d   : > { %695 = vst [vmem:[%s4327_s3 + $0x850] sm:$0xff] %v694_v10  ;;  %v700_v13 = vld [vmem:[%s4322_s30 + $0x6368] sm:$0xff]  ;;  %697 = vst [vmem:[%s4327_s3 + $0x858] sm:$0xff] %v696_v11  ;;  %v702_v14 = vld [vmem:[%s4322_s30 + $0x6370] sm:$0xff] }
  0x9e   : > { %699 = vst [vmem:[%s4327_s3 + $0x860] sm:$0xff] %v698_v12  ;;  %701 = vst [vmem:[%s4327_s3 + $0x868] sm:$0xff] %v700_v13  ;;  %v704_v15 = vld [vmem:[%s4322_s30 + $0x6378] sm:$0xff]  ;;  %v706_v16 = vld [vmem:[%s4322_s30 + $0x6380] sm:$0xff] }
  0x9f   : > { %703 = vst [vmem:[%s4327_s3 + $0x870] sm:$0xff] %v702_v14  ;;  %705 = vst [vmem:[%s4327_s3 + $0x878] sm:$0xff] %v704_v15  ;;  %v708_v17 = vld [vmem:[%s4322_s30 + $0x6388] sm:$0xff]  ;;  %v710_v18 = vld [vmem:[%s4322_s30 + $0x6390] sm:$0xff] }
  0xa0   : > { %707 = vst [vmem:[%s4327_s3 + $0x880] sm:$0xff] %v706_v16  ;;  %v712_v19 = vld [vmem:[%s4322_s30 + $0x6398] sm:$0xff]  ;;  %709 = vst [vmem:[%s4327_s3 + $0x888] sm:$0xff] %v708_v17  ;;  %v714_v20 = vld [vmem:[%s4322_s30 + $0x63a0] sm:$0xff] }
  0xa1   : > { %711 = vst [vmem:[%s4327_s3 + $0x890] sm:$0xff] %v710_v18  ;;  %713 = vst [vmem:[%s4327_s3 + $0x898] sm:$0xff] %v712_v19  ;;  %v716_v21 = vld [vmem:[%s4322_s30 + $0x63a8] sm:$0xff]  ;;  %v718_v22 = vld [vmem:[%s4322_s30 + $0x63b0] sm:$0xff] }
  0xa2   : > { %715 = vst [vmem:[%s4327_s3 + $0x8a0] sm:$0xff] %v714_v20  ;;  %717 = vst [vmem:[%s4327_s3 + $0x8a8] sm:$0xff] %v716_v21  ;;  %v720_v23 = vld [vmem:[%s4322_s30 + $0x63b8] sm:$0xff]  ;;  %v722_v24 = vld [vmem:[%s4322_s30 + $0x7a80] sm:$0xff] }
  0xa3   : > { %719 = vst [vmem:[%s4327_s3 + $0x8b0] sm:$0xff] %v718_v22  ;;  %v724_v25 = vld [vmem:[%s4322_s30 + $0x7a88] sm:$0xff]  ;;  %721 = vst [vmem:[%s4327_s3 + $0x8b8] sm:$0xff] %v720_v23  ;;  %v726_v26 = vld [vmem:[%s4322_s30 + $0x7a90] sm:$0xff] }
  0xa4   : > { %723 = vst [vmem:[%s4327_s3 + $0x8c0] sm:$0xff] %v722_v24  ;;  %725 = vst [vmem:[%s4327_s3 + $0x8c8] sm:$0xff] %v724_v25  ;;  %v728_v27 = vld [vmem:[%s4322_s30 + $0x7a98] sm:$0xff]  ;;  %v730_v28 = vld [vmem:[%s4322_s30 + $0x7aa0] sm:$0xff] }
  0xa5   : > { %727 = vst [vmem:[%s4327_s3 + $0x8d0] sm:$0xff] %v726_v26  ;;  %729 = vst [vmem:[%s4327_s3 + $0x8d8] sm:$0xff] %v728_v27  ;;  %v732_v29 = vld [vmem:[%s4322_s30 + $0x7aa8] sm:$0xff]  ;;  %v734_v30 = vld [vmem:[%s4322_s30 + $0x7ab0] sm:$0xff] }
  0xa6   : > { %731 = vst [vmem:[%s4327_s3 + $0x8e0] sm:$0xff] %v730_v28  ;;  %v736_v31 = vld [vmem:[%s4322_s30 + $0x7ab8] sm:$0xff]  ;;  %733 = vst [vmem:[%s4327_s3 + $0x8e8] sm:$0xff] %v732_v29  ;;  %v738_v32 = vld [vmem:[%s4322_s30 + $0x7ac0] sm:$0xff] }
  0xa7   : > { %735 = vst [vmem:[%s4327_s3 + $0x8f0] sm:$0xff] %v734_v30  ;;  %737 = vst [vmem:[%s4327_s3 + $0x8f8] sm:$0xff] %v736_v31  ;;  %v740_v33 = vld [vmem:[%s4322_s30 + $0x7ac8] sm:$0xff]  ;;  %v742_v34 = vld [vmem:[%s4322_s30 + $0x7ad0] sm:$0xff] }
  0xa8   : > { %739 = vst [vmem:[%s4327_s3 + $0x900] sm:$0xff] %v738_v32  ;;  %741 = vst [vmem:[%s4327_s3 + $0x908] sm:$0xff] %v740_v33  ;;  %v744_v35 = vld [vmem:[%s4322_s30 + $0x7ad8] sm:$0xff]  ;;  %v746_v36 = vld [vmem:[%s4322_s30 + $0x7ae0] sm:$0xff] }
  0xa9   : > { %743 = vst [vmem:[%s4327_s3 + $0x910] sm:$0xff] %v742_v34  ;;  %v748_v37 = vld [vmem:[%s4322_s30 + $0x7ae8] sm:$0xff]  ;;  %745 = vst [vmem:[%s4327_s3 + $0x918] sm:$0xff] %v744_v35  ;;  %v750_v38 = vld [vmem:[%s4322_s30 + $0x7af0] sm:$0xff] }
  0xaa   : > { %747 = vst [vmem:[%s4327_s3 + $0x920] sm:$0xff] %v746_v36  ;;  %749 = vst [vmem:[%s4327_s3 + $0x928] sm:$0xff] %v748_v37  ;;  %v752_v39 = vld [vmem:[%s4322_s30 + $0x7af8] sm:$0xff]  ;;  %v754_v40 = vld [vmem:[%s4322_s30 + $0x7b00] sm:$0xff] }
  0xab   : > { %751 = vst [vmem:[%s4327_s3 + $0x930] sm:$0xff] %v750_v38  ;;  %753 = vst [vmem:[%s4327_s3 + $0x938] sm:$0xff] %v752_v39  ;;  %v756_v41 = vld [vmem:[%s4322_s30 + $0x7b08] sm:$0xff]  ;;  %v758_v42 = vld [vmem:[%s4322_s30 + $0x7b10] sm:$0xff] }
  0xac   : > { %755 = vst [vmem:[%s4327_s3 + $0x940] sm:$0xff] %v754_v40  ;;  %v760_v43 = vld [vmem:[%s4322_s30 + $0x7b18] sm:$0xff]  ;;  %757 = vst [vmem:[%s4327_s3 + $0x948] sm:$0xff] %v756_v41  ;;  %v762_v44 = vld [vmem:[%s4322_s30 + $0x7b20] sm:$0xff] }
  0xad   : > { %759 = vst [vmem:[%s4327_s3 + $0x950] sm:$0xff] %v758_v42  ;;  %761 = vst [vmem:[%s4327_s3 + $0x958] sm:$0xff] %v760_v43  ;;  %v764_v45 = vld [vmem:[%s4322_s30 + $0x7b28] sm:$0xff]  ;;  %v766_v46 = vld [vmem:[%s4322_s30 + $0x7b30] sm:$0xff] }
  0xae   : > { %763 = vst [vmem:[%s4327_s3 + $0x960] sm:$0xff] %v762_v44  ;;  %765 = vst [vmem:[%s4327_s3 + $0x968] sm:$0xff] %v764_v45  ;;  %v768_v47 = vld [vmem:[%s4322_s30 + $0x7b38] sm:$0xff]  ;;  %v770_v48 = vld [vmem:[%s4322_s30 + $0x7b40] sm:$0xff] }
  0xaf   : > { %767 = vst [vmem:[%s4327_s3 + $0x970] sm:$0xff] %v766_v46  ;;  %v772_v49 = vld [vmem:[%s4322_s30 + $0x7b48] sm:$0xff]  ;;  %769 = vst [vmem:[%s4327_s3 + $0x978] sm:$0xff] %v768_v47  ;;  %v774_v50 = vld [vmem:[%s4322_s30 + $0x7b50] sm:$0xff] }
  0xb0   : > { %771 = vst [vmem:[%s4327_s3 + $0x980] sm:$0xff] %v770_v48  ;;  %773 = vst [vmem:[%s4327_s3 + $0x988] sm:$0xff] %v772_v49  ;;  %v776_v51 = vld [vmem:[%s4322_s30 + $0x7b58] sm:$0xff]  ;;  %v778_v52 = vld [vmem:[%s4322_s30 + $0x7b60] sm:$0xff] }
  0xb1   : > { %775 = vst [vmem:[%s4327_s3 + $0x990] sm:$0xff] %v774_v50  ;;  %777 = vst [vmem:[%s4327_s3 + $0x998] sm:$0xff] %v776_v51  ;;  %v780_v53 = vld [vmem:[%s4322_s30 + $0x7b68] sm:$0xff]  ;;  %v782_v54 = vld [vmem:[%s4322_s30 + $0x7b70] sm:$0xff] }
  0xb2   : > { %779 = vst [vmem:[%s4327_s3 + $0x9a0] sm:$0xff] %v778_v52  ;;  %v784_v55 = vld [vmem:[%s4322_s30 + $0x7b78] sm:$0xff]  ;;  %781 = vst [vmem:[%s4327_s3 + $0x9a8] sm:$0xff] %v780_v53  ;;  %v786_v56 = vld [vmem:[%s4322_s30 + $0x7b80] sm:$0xff] }
  0xb3   : > { %783 = vst [vmem:[%s4327_s3 + $0x9b0] sm:$0xff] %v782_v54  ;;  %785 = vst [vmem:[%s4327_s3 + $0x9b8] sm:$0xff] %v784_v55  ;;  %v788_v57 = vld [vmem:[%s4322_s30 + $0x7b88] sm:$0xff]  ;;  %v790_v58 = vld [vmem:[%s4322_s30 + $0x7b90] sm:$0xff] }
  0xb4   : > { %787 = vst [vmem:[%s4327_s3 + $0x9c0] sm:$0xff] %v786_v56  ;;  %789 = vst [vmem:[%s4327_s3 + $0x9c8] sm:$0xff] %v788_v57  ;;  %v792_v59 = vld [vmem:[%s4322_s30 + $0x7b98] sm:$0xff]  ;;  %v794_v60 = vld [vmem:[%s4322_s30 + $0x7ba0] sm:$0xff] }
  0xb5   : > { %791 = vst [vmem:[%s4327_s3 + $0x9d0] sm:$0xff] %v790_v58  ;;  %v796_v61 = vld [vmem:[%s4322_s30 + $0x7ba8] sm:$0xff]  ;;  %793 = vst [vmem:[%s4327_s3 + $0x9d8] sm:$0xff] %v792_v59  ;;  %v798_v62 = vld [vmem:[%s4322_s30 + $0x7bb0] sm:$0xff] }
  0xb6   : > { %795 = vst [vmem:[%s4327_s3 + $0x9e0] sm:$0xff] %v794_v60  ;;  %797 = vst [vmem:[%s4327_s3 + $0x9e8] sm:$0xff] %v796_v61  ;;  %v800_v63 = vld [vmem:[%s4322_s30 + $0x7bb8] sm:$0xff]  ;;  %v802_v0 = vld [vmem:[%s4322_s30 + $0x7bc0] sm:$0xff] }
  0xb7   : > { %799 = vst [vmem:[%s4327_s3 + $0x9f0] sm:$0xff] %v798_v62  ;;  %801 = vst [vmem:[%s4327_s3 + $0x9f8] sm:$0xff] %v800_v63  ;;  %v804_v1 = vld [vmem:[%s4322_s30 + $0x7bc8] sm:$0xff]  ;;  %v806_v2 = vld [vmem:[%s4322_s30 + $0x7bd0] sm:$0xff] }
  0xb8   : > { %803 = vst [vmem:[%s4327_s3 + $0xa00] sm:$0xff] %v802_v0  ;;  %v808_v3 = vld [vmem:[%s4322_s30 + $0x7bd8] sm:$0xff]  ;;  %805 = vst [vmem:[%s4327_s3 + $0xa08] sm:$0xff] %v804_v1  ;;  %v810_v4 = vld [vmem:[%s4322_s30 + $0x7be0] sm:$0xff] }
  0xb9   : > { %807 = vst [vmem:[%s4327_s3 + $0xa10] sm:$0xff] %v806_v2  ;;  %809 = vst [vmem:[%s4327_s3 + $0xa18] sm:$0xff] %v808_v3  ;;  %v812_v5 = vld [vmem:[%s4322_s30 + $0x7be8] sm:$0xff]  ;;  %v814_v6 = vld [vmem:[%s4322_s30 + $0x7bf0] sm:$0xff] }
  0xba   : > { %811 = vst [vmem:[%s4327_s3 + $0xa20] sm:$0xff] %v810_v4  ;;  %813 = vst [vmem:[%s4327_s3 + $0xa28] sm:$0xff] %v812_v5  ;;  %v816_v7 = vld [vmem:[%s4322_s30 + $0x7bf8] sm:$0xff]  ;;  %v818_v8 = vld [vmem:[%s4322_s30 + $0x7c00] sm:$0xff] }
  0xbb   : > { %815 = vst [vmem:[%s4327_s3 + $0xa30] sm:$0xff] %v814_v6  ;;  %v820_v9 = vld [vmem:[%s4322_s30 + $0x7c08] sm:$0xff]  ;;  %817 = vst [vmem:[%s4327_s3 + $0xa38] sm:$0xff] %v816_v7  ;;  %v822_v10 = vld [vmem:[%s4322_s30 + $0x7c10] sm:$0xff] }
  0xbc   : > { %819 = vst [vmem:[%s4327_s3 + $0xa40] sm:$0xff] %v818_v8  ;;  %821 = vst [vmem:[%s4327_s3 + $0xa48] sm:$0xff] %v820_v9  ;;  %v824_v11 = vld [vmem:[%s4322_s30 + $0x7c18] sm:$0xff]  ;;  %v826_v12 = vld [vmem:[%s4322_s30 + $0x7c20] sm:$0xff] }
  0xbd   : > { %823 = vst [vmem:[%s4327_s3 + $0xa50] sm:$0xff] %v822_v10  ;;  %825 = vst [vmem:[%s4327_s3 + $0xa58] sm:$0xff] %v824_v11  ;;  %v828_v13 = vld [vmem:[%s4322_s30 + $0x7c28] sm:$0xff]  ;;  %v830_v14 = vld [vmem:[%s4322_s30 + $0x7c30] sm:$0xff] }
  0xbe   : > { %827 = vst [vmem:[%s4327_s3 + $0xa60] sm:$0xff] %v826_v12  ;;  %v832_v15 = vld [vmem:[%s4322_s30 + $0x7c38] sm:$0xff]  ;;  %829 = vst [vmem:[%s4327_s3 + $0xa68] sm:$0xff] %v828_v13  ;;  %v834_v16 = vld [vmem:[%s4322_s30 + $0x9300] sm:$0xff] }
  0xbf   : > { %831 = vst [vmem:[%s4327_s3 + $0xa70] sm:$0xff] %v830_v14  ;;  %833 = vst [vmem:[%s4327_s3 + $0xa78] sm:$0xff] %v832_v15  ;;  %v836_v17 = vld [vmem:[%s4322_s30 + $0x9308] sm:$0xff]  ;;  %v838_v18 = vld [vmem:[%s4322_s30 + $0x9310] sm:$0xff] }
  0xc0   : > { %835 = vst [vmem:[%s4327_s3 + $0xa80] sm:$0xff] %v834_v16  ;;  %837 = vst [vmem:[%s4327_s3 + $0xa88] sm:$0xff] %v836_v17  ;;  %v840_v19 = vld [vmem:[%s4322_s30 + $0x9318] sm:$0xff]  ;;  %v842_v20 = vld [vmem:[%s4322_s30 + $0x9320] sm:$0xff] }
  0xc1   : > { %839 = vst [vmem:[%s4327_s3 + $0xa90] sm:$0xff] %v838_v18  ;;  %v844_v21 = vld [vmem:[%s4322_s30 + $0x9328] sm:$0xff]  ;;  %841 = vst [vmem:[%s4327_s3 + $0xa98] sm:$0xff] %v840_v19  ;;  %v846_v22 = vld [vmem:[%s4322_s30 + $0x9330] sm:$0xff] }
  0xc2   : > { %843 = vst [vmem:[%s4327_s3 + $0xaa0] sm:$0xff] %v842_v20  ;;  %845 = vst [vmem:[%s4327_s3 + $0xaa8] sm:$0xff] %v844_v21  ;;  %v848_v23 = vld [vmem:[%s4322_s30 + $0x9338] sm:$0xff]  ;;  %v850_v24 = vld [vmem:[%s4322_s30 + $0x9340] sm:$0xff] }
  0xc3   : > { %847 = vst [vmem:[%s4327_s3 + $0xab0] sm:$0xff] %v846_v22  ;;  %849 = vst [vmem:[%s4327_s3 + $0xab8] sm:$0xff] %v848_v23  ;;  %v852_v25 = vld [vmem:[%s4322_s30 + $0x9348] sm:$0xff]  ;;  %v854_v26 = vld [vmem:[%s4322_s30 + $0x9350] sm:$0xff] }
  0xc4   : > { %851 = vst [vmem:[%s4327_s3 + $0xac0] sm:$0xff] %v850_v24  ;;  %v856_v27 = vld [vmem:[%s4322_s30 + $0x9358] sm:$0xff]  ;;  %853 = vst [vmem:[%s4327_s3 + $0xac8] sm:$0xff] %v852_v25  ;;  %v858_v28 = vld [vmem:[%s4322_s30 + $0x9360] sm:$0xff] }
  0xc5   : > { %855 = vst [vmem:[%s4327_s3 + $0xad0] sm:$0xff] %v854_v26  ;;  %857 = vst [vmem:[%s4327_s3 + $0xad8] sm:$0xff] %v856_v27  ;;  %v860_v29 = vld [vmem:[%s4322_s30 + $0x9368] sm:$0xff]  ;;  %v862_v30 = vld [vmem:[%s4322_s30 + $0x9370] sm:$0xff] }
  0xc6   : > { %859 = vst [vmem:[%s4327_s3 + $0xae0] sm:$0xff] %v858_v28  ;;  %861 = vst [vmem:[%s4327_s3 + $0xae8] sm:$0xff] %v860_v29  ;;  %v864_v31 = vld [vmem:[%s4322_s30 + $0x9378] sm:$0xff]  ;;  %v866_v32 = vld [vmem:[%s4322_s30 + $0x9380] sm:$0xff] }
  0xc7   : > { %863 = vst [vmem:[%s4327_s3 + $0xaf0] sm:$0xff] %v862_v30  ;;  %v868_v33 = vld [vmem:[%s4322_s30 + $0x9388] sm:$0xff]  ;;  %865 = vst [vmem:[%s4327_s3 + $0xaf8] sm:$0xff] %v864_v31  ;;  %v870_v34 = vld [vmem:[%s4322_s30 + $0x9390] sm:$0xff] }
  0xc8   : > { %867 = vst [vmem:[%s4327_s3 + $0xb00] sm:$0xff] %v866_v32  ;;  %869 = vst [vmem:[%s4327_s3 + $0xb08] sm:$0xff] %v868_v33  ;;  %v872_v35 = vld [vmem:[%s4322_s30 + $0x9398] sm:$0xff]  ;;  %v874_v36 = vld [vmem:[%s4322_s30 + $0x93a0] sm:$0xff] }
  0xc9   : > { %871 = vst [vmem:[%s4327_s3 + $0xb10] sm:$0xff] %v870_v34  ;;  %873 = vst [vmem:[%s4327_s3 + $0xb18] sm:$0xff] %v872_v35  ;;  %v876_v37 = vld [vmem:[%s4322_s30 + $0x93a8] sm:$0xff]  ;;  %v878_v38 = vld [vmem:[%s4322_s30 + $0x93b0] sm:$0xff] }
  0xca   : > { %875 = vst [vmem:[%s4327_s3 + $0xb20] sm:$0xff] %v874_v36  ;;  %v880_v39 = vld [vmem:[%s4322_s30 + $0x93b8] sm:$0xff]  ;;  %877 = vst [vmem:[%s4327_s3 + $0xb28] sm:$0xff] %v876_v37  ;;  %v882_v40 = vld [vmem:[%s4322_s30 + $0x93c0] sm:$0xff] }
  0xcb   : > { %879 = vst [vmem:[%s4327_s3 + $0xb30] sm:$0xff] %v878_v38  ;;  %881 = vst [vmem:[%s4327_s3 + $0xb38] sm:$0xff] %v880_v39  ;;  %v884_v41 = vld [vmem:[%s4322_s30 + $0x93c8] sm:$0xff]  ;;  %v886_v42 = vld [vmem:[%s4322_s30 + $0x93d0] sm:$0xff] }
  0xcc   : > { %883 = vst [vmem:[%s4327_s3 + $0xb40] sm:$0xff] %v882_v40  ;;  %885 = vst [vmem:[%s4327_s3 + $0xb48] sm:$0xff] %v884_v41  ;;  %v888_v43 = vld [vmem:[%s4322_s30 + $0x93d8] sm:$0xff]  ;;  %v890_v44 = vld [vmem:[%s4322_s30 + $0x93e0] sm:$0xff] }
  0xcd   : > { %887 = vst [vmem:[%s4327_s3 + $0xb50] sm:$0xff] %v886_v42  ;;  %v892_v45 = vld [vmem:[%s4322_s30 + $0x93e8] sm:$0xff]  ;;  %889 = vst [vmem:[%s4327_s3 + $0xb58] sm:$0xff] %v888_v43  ;;  %v894_v46 = vld [vmem:[%s4322_s30 + $0x93f0] sm:$0xff] }
  0xce   : > { %891 = vst [vmem:[%s4327_s3 + $0xb60] sm:$0xff] %v890_v44  ;;  %893 = vst [vmem:[%s4327_s3 + $0xb68] sm:$0xff] %v892_v45  ;;  %v896_v47 = vld [vmem:[%s4322_s30 + $0x93f8] sm:$0xff]  ;;  %v898_v48 = vld [vmem:[%s4322_s30 + $0x9400] sm:$0xff] }
  0xcf   : > { %895 = vst [vmem:[%s4327_s3 + $0xb70] sm:$0xff] %v894_v46  ;;  %897 = vst [vmem:[%s4327_s3 + $0xb78] sm:$0xff] %v896_v47  ;;  %v900_v49 = vld [vmem:[%s4322_s30 + $0x9408] sm:$0xff]  ;;  %v902_v50 = vld [vmem:[%s4322_s30 + $0x9410] sm:$0xff] }
  0xd0   : > { %899 = vst [vmem:[%s4327_s3 + $0xb80] sm:$0xff] %v898_v48  ;;  %v904_v51 = vld [vmem:[%s4322_s30 + $0x9418] sm:$0xff]  ;;  %901 = vst [vmem:[%s4327_s3 + $0xb88] sm:$0xff] %v900_v49  ;;  %v906_v52 = vld [vmem:[%s4322_s30 + $0x9420] sm:$0xff] }
  0xd1   : > { %903 = vst [vmem:[%s4327_s3 + $0xb90] sm:$0xff] %v902_v50  ;;  %905 = vst [vmem:[%s4327_s3 + $0xb98] sm:$0xff] %v904_v51  ;;  %v908_v53 = vld [vmem:[%s4322_s30 + $0x9428] sm:$0xff]  ;;  %v910_v54 = vld [vmem:[%s4322_s30 + $0x9430] sm:$0xff] }
  0xd2   : > { %907 = vst [vmem:[%s4327_s3 + $0xba0] sm:$0xff] %v906_v52  ;;  %909 = vst [vmem:[%s4327_s3 + $0xba8] sm:$0xff] %v908_v53  ;;  %v912_v55 = vld [vmem:[%s4322_s30 + $0x9438] sm:$0xff]  ;;  %v914_v56 = vld [vmem:[%s4322_s30 + $0x9440] sm:$0xff] }
  0xd3   : > { %911 = vst [vmem:[%s4327_s3 + $0xbb0] sm:$0xff] %v910_v54  ;;  %v916_v57 = vld [vmem:[%s4322_s30 + $0x9448] sm:$0xff]  ;;  %913 = vst [vmem:[%s4327_s3 + $0xbb8] sm:$0xff] %v912_v55  ;;  %v918_v58 = vld [vmem:[%s4322_s30 + $0x9450] sm:$0xff] }
  0xd4   : > { %915 = vst [vmem:[%s4327_s3 + $0xbc0] sm:$0xff] %v914_v56  ;;  %917 = vst [vmem:[%s4327_s3 + $0xbc8] sm:$0xff] %v916_v57  ;;  %v920_v59 = vld [vmem:[%s4322_s30 + $0x9458] sm:$0xff]  ;;  %v922_v60 = vld [vmem:[%s4322_s30 + $0x9460] sm:$0xff] }
  0xd5   : > { %919 = vst [vmem:[%s4327_s3 + $0xbd0] sm:$0xff] %v918_v58  ;;  %921 = vst [vmem:[%s4327_s3 + $0xbd8] sm:$0xff] %v920_v59  ;;  %v924_v61 = vld [vmem:[%s4322_s30 + $0x9468] sm:$0xff]  ;;  %v926_v62 = vld [vmem:[%s4322_s30 + $0x9470] sm:$0xff] }
  0xd6   : > { %923 = vst [vmem:[%s4327_s3 + $0xbe0] sm:$0xff] %v922_v60  ;;  %v928_v63 = vld [vmem:[%s4322_s30 + $0x9478] sm:$0xff]  ;;  %925 = vst [vmem:[%s4327_s3 + $0xbe8] sm:$0xff] %v924_v61  ;;  %v930_v0 = vld [vmem:[%s4322_s30 + $0x9480] sm:$0xff] }
  0xd7   : > { %927 = vst [vmem:[%s4327_s3 + $0xbf0] sm:$0xff] %v926_v62  ;;  %929 = vst [vmem:[%s4327_s3 + $0xbf8] sm:$0xff] %v928_v63  ;;  %v932_v1 = vld [vmem:[%s4322_s30 + $0x9488] sm:$0xff]  ;;  %v934_v2 = vld [vmem:[%s4322_s30 + $0x9490] sm:$0xff] }
  0xd8   : > { %931 = vst [vmem:[%s4327_s3 + $0xc00] sm:$0xff] %v930_v0  ;;  %933 = vst [vmem:[%s4327_s3 + $0xc08] sm:$0xff] %v932_v1  ;;  %v936_v3 = vld [vmem:[%s4322_s30 + $0x9498] sm:$0xff]  ;;  %v938_v4 = vld [vmem:[%s4322_s30 + $0x94a0] sm:$0xff] }
  0xd9   : > { %935 = vst [vmem:[%s4327_s3 + $0xc10] sm:$0xff] %v934_v2  ;;  %v940_v5 = vld [vmem:[%s4322_s30 + $0x94a8] sm:$0xff]  ;;  %937 = vst [vmem:[%s4327_s3 + $0xc18] sm:$0xff] %v936_v3  ;;  %v942_v6 = vld [vmem:[%s4322_s30 + $0x94b0] sm:$0xff] }
  0xda   : > { %939 = vst [vmem:[%s4327_s3 + $0xc20] sm:$0xff] %v938_v4  ;;  %941 = vst [vmem:[%s4327_s3 + $0xc28] sm:$0xff] %v940_v5  ;;  %v944_v7 = vld [vmem:[%s4322_s30 + $0x94b8] sm:$0xff] }
  0xdb   : > { %943 = vst [vmem:[%s4327_s3 + $0xc30] sm:$0xff] %v942_v6  ;;  %945 = vst [vmem:[%s4327_s3 + $0xc38] sm:$0xff] %v944_v7 }
  0xdc PF: > { %p3774_p7 = scmp.ge.s32.totalorder %s4245_s15, 1  ;;  %p950_p8 = scmp.lt.s32.totalorder %s4245_s15, 15 }
  0xde   : > { %p951_p9 = pnand %p3774_p7, %p950_p8 }
  0xdf   : > { %s957_s4 = sand.u32 (!%p951_p9), 1, %s4221_s9   ;;  %s984_s5 = smul.u32 (!%p951_p9), 7, %s4233_s12 }
  0xe0   : > { %954 = sbr.rel (%p951_p9) target bundleno = 856 (0x358), region = 47  ;;  %p997_p10 = scmp.lt.s32.totalorder (!%p951_p9), %s4233_s12, 1 }
  0xe1   : > { %s4118_s6 = smul.u32 (!%p951_p9), 3136, %s957_s4  ;;  %s985_s7 = sadd.s32 (!%p951_p9), %s4229_s11, %s984_s5 }
  0xe2   : > { %s986_s8 = smul.u32 (!%p951_p9), 56, %s985_s7  ;;  %p3777_p12 = scmp.ne.s32.totalorder (!%p951_p9), %s4229_s11, 0 }
  0xe3   : > { %s5127_s9 = scalar_lea.vmem (!%p951_p9), [#allocation2], %s4118_s6 }
  0xe4   : > { %p987_p11 = scmp.lt.s32.totalorder (!%p951_p9), %s986_s8, 783 }
  0xe7   : > { %s5741_s12 = smov (!%p997_p10, %s4233_s12), 1  ;;  %s5743_s8 = smov (!%p987_p11, %s986_s8), 783 }
  0xe8   : > { %s3776_s18 = sshll.u32 %s5741_s12, 1  ;;  %s3775_s22 = sshll.u32 %s5743_s8, 1  ;;  %vm1005_vm0 = vcmask (!%p3777_p12), 451584   ;;  %v4247_v8 = vmov (!%p3777_p12), 0.0  }
  0xe9   : > { %s5120_s21 = scalar_lea.vmem %s5727_s2, %s3776_s18  ;;  %s5125_s26 = scalar_lea.vmem %s5725_s0, %s3775_s22 }
  0xea   : > { %1004 = sbr.rel (%p3777_p12) target bundleno = 241 (0xf1), region = 55  ;;  %1006 = vst.msk [vmem:[%s5120_s21] sm:$0x3] (!%p3777_p12), %vm1005_vm0, %v4247_v8 }
  0xf1 PF: > { %v1023_v9 = vld [vmem:[%s5127_s9 + $0x8] sm:$0xff]  ;;  %v1022_v11 = vld [vmem:[%s5127_s9] sm:$0xff]  ;;  %v1432_v12 = vlaneseq  ;;  %v1025_v15 = vld [vmem:[%s5127_s9 + $0x18] sm:$0xff]  ;;  %v4248_v17 = vmov 1983009808   ;;  %vm3683_vm1 = vcmask 451584  }
  0xf2   : > { %v1079_v10 = vld [vmem:[%s5127_s9 + $0x1c8] sm:$0xff]  ;;  %v1078_v14 = vld [vmem:[%s5127_s9 + $0x1c0] sm:$0xff]  ;;  %v1081_v16 = vld [vmem:[%s5127_s9 + $0x1d8] sm:$0xff]  ;;  %v1430_v18 = vunpack.c.l.s4 %v4248_v17 }
  0xf3   : > { %v3781_v13 = vpack.c.bf16 %v1079_v10, %v1023_v9  ;;  %v3783_v19 = vpack.c.bf16 %v1078_v14, %v1022_v11  ;;  %v3793_v20 = vpack.c.bf16 %v1081_v16, %v1025_v15  ;;  %v1024_v21 = vld [vmem:[%s5127_s9 + $0x10] sm:$0xff]  ;;  %v1135_v23 = vld [vmem:[%s5127_s9 + $0x388] sm:$0xff]  ;;  %v1433_v24 = vshrl.u32 %v1432_v12, 7  ;;  %v1137_v29 = vld [vmem:[%s5127_s9 + $0x398] sm:$0xff] }
  0xf4   : > { %v1080_v22 = vld [vmem:[%s5127_s9 + $0x1d0] sm:$0xff]  ;;  %v1191_v26 = vld [vmem:[%s5127_s9 + $0x548] sm:$0xff]  ;;  %v1431_v27 = vunpack.c.0.s8 %v1430_v18  ;;  %v1193_v30 = vld [vmem:[%s5127_s9 + $0x558] sm:$0xff] }
  0xf5   : > { %3782 = vmatprep.subr.bf16.mxu0 %v3781_v13  ;;  %v3795_v25 = vpack.c.bf16 %v1080_v22, %v1024_v21  ;;  %3794 = vmatprep.subr.bf16.mxu1 %v3793_v20  ;;  %v3785_v28 = vpack.c.bf16 %v1191_v26, %v1135_v23  ;;  %v1134_v31 = vld [vmem:[%s5127_s9 + $0x380] sm:$0xff]  ;;  %v3797_v33 = vpack.c.bf16 %v1193_v30, %v1137_v29  ;;  %v1136_v34 = vld [vmem:[%s5127_s9 + $0x390] sm:$0xff]  ;;  %v1247_v36 = vld [vmem:[%s5127_s9 + $0x708] sm:$0xff] }
  0xf6   : > { %3784 = vmatpush1.bf16.xpose.msra.mxu0 %v3783_v19  ;;  %v1190_v32 = vld [vmem:[%s5127_s9 + $0x540] sm:$0xff]  ;;  %v1192_v35 = vld [vmem:[%s5127_s9 + $0x550] sm:$0xff]  ;;  %v1303_v37 = vld [vmem:[%s5127_s9 + $0x8c8] sm:$0xff]  ;;  %v5149_v38 = vsub.s32 %v1431_v27, %v1433_v24 }
  0xf7   : > { %3796 = vmatpush1.bf16.xpose.msra.mxu1 %v3795_v25  ;;  %3786 = vmatprep.subr.bf16.mxu0 %v3785_v28  ;;  %v1249_v39 = vld [vmem:[%s5127_s9 + $0x718] sm:$0xff]  ;;  %v3787_v41 = vpack.c.bf16 %v1190_v32, %v1134_v31  ;;  %v3799_v42 = vpack.c.bf16 %v1192_v35, %v1136_v34  ;;  %v3789_v43 = vpack.c.bf16 %v1303_v37, %v1247_v36  ;;  %v1008_v44 = vld [vmem:[%s5125_s26] sm:$0xff]  ;;  %v1248_v52 = vld [vmem:[%s5127_s9 + $0x710] sm:$0xff] }
  0xf8   : > { %3798 = vmatprep.subr.bf16.mxu1 %v3797_v33  ;;  %v1305_v40 = vld [vmem:[%s5127_s9 + $0x8d8] sm:$0xff]  ;;  %v1435_v46 = vrot.slane %v1008_v44, %v5149_v38  ;;  %v1428_v47 = vcombine.high %v1008_v44, %v1008_v44  ;;  %v1246_v50 = vld [vmem:[%s5127_s9 + $0x700] sm:$0xff]  ;;  %v1304_v53 = vld [vmem:[%s5127_s9 + $0x8d0] sm:$0xff] }
  0xf9   : > { %v3801_v45 = vpack.c.bf16 %v1305_v40, %v1249_v39  ;;  %v1302_v51 = vld [vmem:[%s5127_s9 + $0x8c0] sm:$0xff]  ;;  %v3803_v56 = vpack.c.bf16 %v1304_v53, %v1248_v52  ;;  %v1359_v57 = vld [vmem:[%s5127_s9 + $0xa88] sm:$0xff]  ;;  %v1361_v58 = vld [vmem:[%s5127_s9 + $0xa98] sm:$0xff] }
  0xfa   : > { %v1443_v48 = vcombine.high %v1435_v46, %v1435_v46  ;;  %v1442_v49 = vrot.slane %v1428_v47, %v5149_v38  ;;  %v3791_v55 = vpack.c.bf16 %v1302_v51, %v1246_v50  ;;  %v1009_v59 = vld [vmem:[%s5125_s26 + $0x8] sm:$0xff]  ;;  %v1029_v62 = vld [vmem:[%s5127_s9 + $0x38] sm:$0xff]  ;;  %v1358_v1 = vld [vmem:[%s5127_s9 + $0xa80] sm:$0xff] }
  0xfb   : > { %v1027_v60 = vld [vmem:[%s5127_s9 + $0x28] sm:$0xff]  ;;  %v1085_v63 = vld [vmem:[%s5127_s9 + $0x1f8] sm:$0xff]  ;;  %v1445_v0 = vcombine.high %v1009_v59, %v1009_v59  ;;  %v1360_v2 = vld [vmem:[%s5127_s9 + $0xa90] sm:$0xff]  ;;  %v5176_v11 = vrot.slane %v1009_v59, %v5149_v38 }
  0xfc   : > { %1786 = vmatprep.mubr.f32.mxu0 %v1443_v48  ;;  %v1444_v54 = vcombine.high %v1442_v49, %v1442_v49  ;;  %v1083_v61 = vld [vmem:[%s5127_s9 + $0x1e8] sm:$0xff]  ;;  %v1026_v4 = vld [vmem:[%s5127_s9 + $0x20] sm:$0xff]  ;;  %v1028_v6 = vld [vmem:[%s5127_s9 + $0x30] sm:$0xff]  ;;  %v3817_v7 = vpack.c.bf16 %v1085_v63, %v1029_v62 }
  0xfd   : > { %v3805_v3 = vpack.c.bf16 %v1083_v61, %v1027_v60  ;;  %v1082_v5 = vld [vmem:[%s5127_s9 + $0x1e0] sm:$0xff]  ;;  %v1084_v8 = vld [vmem:[%s5127_s9 + $0x1f0] sm:$0xff]  ;;  %v1139_v9 = vld [vmem:[%s5127_s9 + $0x3a8] sm:$0xff]  ;;  %v5181_v14 = vrot.slane %v1445_v0, %v5149_v38  ;;  %v1460_v19 = vcombine.high %v5176_v11, %v5176_v11 }
  0xfe   : > { %3788 = vmatpush1.bf16.xpose.msra.mxu0 %v3787_v41  ;;  %1856 = vmatprep.mubr.f32.mxu1 %v1444_v54  ;;  %v1195_v10 = vld [vmem:[%s5127_s9 + $0x568] sm:$0xff]  ;;  %v1141_v12 = vld [vmem:[%s5127_s9 + $0x3b8] sm:$0xff]  ;;  %v3807_v15 = vpack.c.bf16 %v1082_v5, %v1026_v4  ;;  %v3819_v16 = vpack.c.bf16 %v1084_v8, %v1028_v6  ;;  %v1138_v21 = vld [vmem:[%s5127_s9 + $0x3a0] sm:$0xff] }
  0xff   : > { %3800 = vmatpush1.bf16.xpose.msra.mxu1 %v3799_v42  ;;  %3790 = vmatprep.subr.bf16.mxu0 %v3789_v43  ;;  %v1197_v13 = vld [vmem:[%s5127_s9 + $0x578] sm:$0xff]  ;;  %v3809_v17 = vpack.c.bf16 %v1195_v10, %v1139_v9  ;;  %v1461_v20 = vcombine.high %v5181_v14, %v5181_v14  ;;  %v1194_v22 = vld [vmem:[%s5127_s9 + $0x560] sm:$0xff]  ;;  %v1140_v23 = vld [vmem:[%s5127_s9 + $0x3b0] sm:$0xff] }
 0x100   : > { %3802 = vmatprep.subr.bf16.mxu1 %v3801_v45  ;;  %v3821_v18 = vpack.c.bf16 %v1197_v13, %v1141_v12  ;;  %v1196_v24 = vld [vmem:[%s5127_s9 + $0x570] sm:$0xff]  ;;  %v1251_v25 = vld [vmem:[%s5127_s9 + $0x728] sm:$0xff]  ;;  %v1253_v27 = vld [vmem:[%s5127_s9 + $0x738] sm:$0xff]  ;;  %v3811_v29 = vpack.c.bf16 %v1194_v22, %v1138_v21 }
 0x101   : > { %v1307_v26 = vld [vmem:[%s5127_s9 + $0x8e8] sm:$0xff]  ;;  %v1309_v28 = vld [vmem:[%s5127_s9 + $0x8f8] sm:$0xff]  ;;  %v3823_v30 = vpack.c.bf16 %v1196_v24, %v1140_v23  ;;  %v1250_v33 = vld [vmem:[%s5127_s9 + $0x720] sm:$0xff] }
 0x102   : > { %v3813_v31 = vpack.c.bf16 %v1307_v26, %v1251_v25  ;;  %v3825_v32 = vpack.c.bf16 %v1309_v28, %v1253_v27  ;;  %v1306_v34 = vld [vmem:[%s5127_s9 + $0x8e0] sm:$0xff]  ;;  %v1252_v35 = vld [vmem:[%s5127_s9 + $0x730] sm:$0xff]  ;;  %v1363_v40 = vld [vmem:[%s5127_s9 + $0xaa8] sm:$0xff] }
 0x103   : > { %v1308_v36 = vld [vmem:[%s5127_s9 + $0x8f0] sm:$0xff]  ;;  %v3815_v37 = vpack.c.bf16 %v1306_v34, %v1250_v33  ;;  %v1365_v41 = vld [vmem:[%s5127_s9 + $0xab8] sm:$0xff]  ;;  %v1031_v43 = vld [vmem:[%s5127_s9 + $0x48] sm:$0xff] }
 0x104   : > { %v3827_v39 = vpack.c.bf16 %v1308_v36, %v1252_v35  ;;  %v1010_v42 = vld [vmem:[%s5125_s26 + $0x10] sm:$0xff]  ;;  %v1087_v44 = vld [vmem:[%s5127_s9 + $0x208] sm:$0xff]  ;;  %v1033_v45 = vld [vmem:[%s5127_s9 + $0x58] sm:$0xff] }
 0x105   : > { %v1462_v47 = vcombine.high %v1010_v42, %v1010_v42  ;;  %v1362_v48 = vld [vmem:[%s5127_s9 + $0xaa0] sm:$0xff]  ;;  %v3829_v50 = vpack.c.bf16 %v1087_v44, %v1031_v43  ;;  %v1032_v53 = vld [vmem:[%s5127_s9 + $0x50] sm:$0xff]  ;;  %v1145_v59 = vld [vmem:[%s5127_s9 + $0x3d8] sm:$0xff] }
 0x106   : > { %3792 = vmatpush1.bf16.xpose.msra.mxu0 %v3791_v55  ;;  %v1030_v51 = vld [vmem:[%s5127_s9 + $0x40] sm:$0xff]  ;;  %v1088_v55 = vld [vmem:[%s5127_s9 + $0x210] sm:$0xff]  ;;  %v1201_v60 = vld [vmem:[%s5127_s9 + $0x598] sm:$0xff] }
 0x107   : > { %3804 = vmatpush1.bf16.xpose.msra.mxu1 %v3803_v56  ;;  %1734 = vmatprep.subr.mxu0 %v1359_v57  ;;  %v1086_v52 = vld [vmem:[%s5127_s9 + $0x200] sm:$0xff]  ;;  %v1143_v56 = vld [vmem:[%s5127_s9 + $0x3c8] sm:$0xff]  ;;  %v5220_v61 = vrot.slane %v1462_v47, %v5149_v38  ;;  %v3843_v63 = vpack.c.bf16 %v1088_v55, %v1032_v53  ;;  %v1144_v6 = vld [vmem:[%s5127_s9 + $0x3d0] sm:$0xff] }
 0x108   : > { %1804 = vmatprep.subr.mxu1 %v1361_v58  ;;  %v1199_v57 = vld [vmem:[%s5127_s9 + $0x588] sm:$0xff]  ;;  %v5215_v58 = vrot.slane %v1010_v42, %v5149_v38  ;;  %v3831_v62 = vpack.c.bf16 %v1086_v52, %v1030_v51  ;;  %v1142_v4 = vld [vmem:[%s5127_s9 + $0x3c0] sm:$0xff]  ;;  %v1257_v10 = vld [vmem:[%s5127_s9 + $0x758] sm:$0xff] }
 0x109   : > { %v3833_v0 = vpack.c.bf16 %v1199_v57, %v1143_v56  ;;  %v1198_v5 = vld [vmem:[%s5127_s9 + $0x580] sm:$0xff]  ;;  %v1255_v8 = vld [vmem:[%s5127_s9 + $0x748] sm:$0xff]  ;;  %v1369_v23 = vld [vmem:[%s5127_s9 + $0xad8] sm:$0xff] }
 0x10a   : > { %v1311_v9 = vld [vmem:[%s5127_s9 + $0x908] sm:$0xff]  ;;  %v3835_v12 = vpack.c.bf16 %v1198_v5, %v1142_v4  ;;  %v1011_v24 = vld [vmem:[%s5125_s26 + $0x18] sm:$0xff]  ;;  %v1034_v33 = vld [vmem:[%s5127_s9 + $0x60] sm:$0xff] }
 0x10b   : > { %v1367_v22 = vld [vmem:[%s5127_s9 + $0xac8] sm:$0xff]  ;;  %v1037_v27 = vld [vmem:[%s5127_s9 + $0x78] sm:$0xff]  ;;  %v1090_v34 = vld [vmem:[%s5127_s9 + $0x220] sm:$0xff] }
 0x10c   : > { %v1035_v25 = vld [vmem:[%s5127_s9 + $0x68] sm:$0xff]  ;;  %v1093_v28 = vld [vmem:[%s5127_s9 + $0x238] sm:$0xff]  ;;  %v1036_v35 = vld [vmem:[%s5127_s9 + $0x70] sm:$0xff] }
 0x10d   : > { %v1091_v26 = vld [vmem:[%s5127_s9 + $0x228] sm:$0xff]  ;;  %v3865_v36 = vpack.c.bf16 %v1093_v28, %v1037_v27  ;;  %v1149_v42 = vld [vmem:[%s5127_s9 + $0x3f8] sm:$0xff]  ;;  %v1146_v51 = vld [vmem:[%s5127_s9 + $0x3e0] sm:$0xff] }
 0x10e   : > { %1735 = vmatpush1.xpose.msra.mxu0 %v1358_v1  ;;  %v3845_v1 = vpack.c.bf16 %v1201_v60, %v1145_v59  ;;  %v1205_v43 = vld [vmem:[%s5127_s9 + $0x5b8] sm:$0xff]  ;;  %v1202_v52 = vld [vmem:[%s5127_s9 + $0x5a0] sm:$0xff]  ;;  %v1148_v53 = vld [vmem:[%s5127_s9 + $0x3f0] sm:$0xff] }
 0x10f   : > { %1805 = vmatpush1.xpose.msra.mxu1 %v1360_v2  ;;  %3806 = vmatprep.subr.bf16.mxu0 %v3805_v3  ;;  %v1477_v2 = vcombine.high %v5215_v58, %v5215_v58  ;;  %v1478_v3 = vcombine.high %v5220_v61, %v5220_v61  ;;  %v1259_v55 = vld [vmem:[%s5127_s9 + $0x768] sm:$0xff]  ;;  %v1261_v57 = vld [vmem:[%s5127_s9 + $0x778] sm:$0xff]  ;;  %v3859_v59 = vpack.c.bf16 %v1202_v52, %v1146_v51 }
 0x110   : > { %3818 = vmatprep.subr.bf16.mxu1 %v3817_v7  ;;  %v1200_v7 = vld [vmem:[%s5127_s9 + $0x590] sm:$0xff]  ;;  %v1315_v56 = vld [vmem:[%s5127_s9 + $0x928] sm:$0xff] }
 0x111   : > { %1787 = vmatmul.mubr.f32.vlgmr.msra.gmra.mrb[0].mxu0 %v1435_v46  ;;  %v1089_v46 = vld [vmem:[%s5127_s9 + $0x218] sm:$0xff]  ;;  %v3847_v13 = vpack.c.bf16 %v1200_v7, %v1144_v6  ;;  %v1371_v5 = vld [vmem:[%s5127_s9 + $0xae8] sm:$0xff]  ;;  %v1012_v7 = vld [vmem:[%s5125_s26 + $0x20] sm:$0xff] }
 0x112   : > { %1857 = vmatmul.mubr.f32.vlgmr.msra.gmra.mrb[0].mxu1 %v1442_v49  ;;  %3808 = vmatpush1.bf16.xpose.msra.mxu0 %v3807_v15  ;;  %v1364_v49 = vld [vmem:[%s5127_s9 + $0xab0] sm:$0xff]  ;;  %v3841_v54 = vpack.c.bf16 %v1089_v46, %v1033_v45  ;;  %v3855_v45 = vpack.c.bf16 %v1090_v34, %v1034_v33  ;;  %v1373_v6 = vld [vmem:[%s5127_s9 + $0xaf8] sm:$0xff]  ;;  %v1150_v33 = vld [vmem:[%s5127_s9 + $0x400] sm:$0xff] }
 0x113   : > { %3820 = vmatpush1.bf16.xpose.msra.mxu1 %v3819_v16  ;;  %3810 = vmatprep.subr.bf16.mxu0 %v3809_v17  ;;  %v1254_v16 = vld [vmem:[%s5127_s9 + $0x740] sm:$0xff]  ;;  %v1375_v52 = vld [vmem:[%s5127_s9 + $0xb08] sm:$0xff] }
 0x114   : > { %3822 = vmatprep.subr.bf16.mxu1 %v3821_v18  ;;  %1926 = vmatprep.mubr.f32.mxu0 %v1460_v19  ;;  %v1310_v17 = vld [vmem:[%s5127_s9 + $0x900] sm:$0xff]  ;;  %v1256_v18 = vld [vmem:[%s5127_s9 + $0x750] sm:$0xff] }
 0x115   : > { %1996 = vmatprep.mubr.f32.mxu1 %v1461_v20  ;;  %v1312_v19 = vld [vmem:[%s5127_s9 + $0x910] sm:$0xff]  ;;  %v3839_v20 = vpack.c.bf16 %v1310_v17, %v1254_v16  ;;  %v1038_v16 = vld [vmem:[%s5127_s9 + $0x80] sm:$0xff] }
 0x116   : > { %v3851_v21 = vpack.c.bf16 %v1312_v19, %v1256_v18  ;;  %v1094_v17 = vld [vmem:[%s5127_s9 + $0x240] sm:$0xff]  ;;  %v1040_v18 = vld [vmem:[%s5127_s9 + $0x90] sm:$0xff] }
 0x117   : > { %v3879_v27 = vpack.c.bf16 %v1094_v17, %v1038_v16  ;;  %v1206_v34 = vld [vmem:[%s5127_s9 + $0x5c0] sm:$0xff] }
 0x118   : > { %v1154_v16 = vld [vmem:[%s5127_s9 + $0x420] sm:$0xff] }
 0x119   : > { %v1210_v17 = vld [vmem:[%s5127_s9 + $0x5e0] sm:$0xff] }
 0x11a   : > { %3812 = vmatpush1.bf16.xpose.msra.mxu0 %v3811_v29  ;;  %v1479_v29 = vcombine.high %v1011_v24, %v1011_v24 }
 0x11b   : > { %3824 = vmatpush1.bf16.xpose.msra.mxu1 %v3823_v30  ;;  %3814 = vmatprep.subr.bf16.mxu0 %v3813_v31  ;;  %v1366_v30 = vld [vmem:[%s5127_s9 + $0xac0] sm:$0xff]  ;;  %v1368_v31 = vld [vmem:[%s5127_s9 + $0xad0] sm:$0xff] }
 0x11c   : > { %3826 = vmatprep.subr.bf16.mxu1 %v3825_v32  ;;  %v3853_v32 = vpack.c.bf16 %v1091_v26, %v1035_v25  ;;  %v5261_v44 = vrot.slane %v1479_v29, %v5149_v38  ;;  %v1209_v25 = vld [vmem:[%s5127_s9 + $0x5d8] sm:$0xff] }
 0x122   : > { %3816 = vmatpush1.bf16.xpose.msra.mxu0 %v3815_v37  ;;  %v1092_v37 = vld [vmem:[%s5127_s9 + $0x230] sm:$0xff] }
 0x123   : > { %3828 = vmatpush1.bf16.xpose.msra.mxu1 %v3827_v39  ;;  %1874 = vmatprep.subr.mxu0 %v1363_v40  ;;  %v1147_v39 = vld [vmem:[%s5127_s9 + $0x3e8] sm:$0xff]  ;;  %v3867_v46 = vpack.c.bf16 %v1092_v37, %v1036_v35  ;;  %v1152_v35 = vld [vmem:[%s5127_s9 + $0x410] sm:$0xff] }
 0x124   : > { %1944 = vmatprep.subr.mxu1 %v1365_v41  ;;  %v1203_v40 = vld [vmem:[%s5127_s9 + $0x5a8] sm:$0xff]  ;;  %v5256_v41 = vrot.slane %v1011_v24, %v5149_v38  ;;  %v1153_v24 = vld [vmem:[%s5127_s9 + $0x418] sm:$0xff] }
 0x125   : > { %v3857_v47 = vpack.c.bf16 %v1203_v40, %v1147_v39  ;;  %v1263_v37 = vld [vmem:[%s5127_s9 + $0x788] sm:$0xff]  ;;  %v1265_v40 = vld [vmem:[%s5127_s9 + $0x798] sm:$0xff] }
 0x126   : > { %v1319_v39 = vld [vmem:[%s5127_s9 + $0x948] sm:$0xff] }
 0x12a   : > { %1875 = vmatpush1.xpose.msra.mxu0 %v1362_v48  ;;  %v3869_v48 = vpack.c.bf16 %v1205_v43, %v1149_v42  ;;  %v3883_v42 = vpack.c.bf16 %v1206_v34, %v1150_v33  ;;  %v1379_v34 = vld [vmem:[%s5127_s9 + $0xb28] sm:$0xff] }
 0x12b   : > { %1945 = vmatpush1.xpose.msra.mxu1 %v1364_v49  ;;  %3830 = vmatprep.subr.bf16.mxu0 %v3829_v50  ;;  %v1494_v49 = vcombine.high %v5256_v41, %v5256_v41  ;;  %v1495_v50 = vcombine.high %v5261_v44, %v5261_v44 }
 0x12c   : > { %3842 = vmatprep.subr.bf16.mxu1 %v3841_v54  ;;  %v1204_v54 = vld [vmem:[%s5127_s9 + $0x5b0] sm:$0xff] }
 0x12d   : > { %1927 = vmatmul.mubr.f32.vlgmr.msra.gmra.mrb[2].mxu0 %v5176_v11  ;;  %v1313_v11 = vld [vmem:[%s5127_s9 + $0x918] sm:$0xff]  ;;  %v3871_v60 = vpack.c.bf16 %v1204_v54, %v1148_v53  ;;  %v1013_v54 = vld [vmem:[%s5125_s26 + $0x28] sm:$0xff] }
 0x12e   : > { %3832 = vmatpush1.bf16.xpose.msra.mxu0 %v3831_v62  ;;  %1997 = vmatmul.mubr.f32.vlgmr.msra.gmra.mrb[2].mxu1 %v5181_v14  ;;  %v3837_v14 = vpack.c.bf16 %v1311_v9, %v1255_v8  ;;  %v3849_v15 = vpack.c.bf16 %v1313_v11, %v1257_v10  ;;  %v1039_v8 = vld [vmem:[%s5127_s9 + $0x88] sm:$0xff]  ;;  %v1041_v10 = vld [vmem:[%s5127_s9 + $0x98] sm:$0xff] }
 0x12f   : > { %3844 = vmatpush1.bf16.xpose.msra.mxu1 %v3843_v63  ;;  %3834 = vmatprep.subr.bf16.mxu0 %v3833_v0  ;;  %v1258_v63 = vld [vmem:[%s5127_s9 + $0x760] sm:$0xff]  ;;  %v1095_v9 = vld [vmem:[%s5127_s9 + $0x248] sm:$0xff]  ;;  %v1097_v11 = vld [vmem:[%s5127_s9 + $0x258] sm:$0xff] }
 0x130   : > { %3846 = vmatprep.subr.bf16.mxu1 %v3845_v1  ;;  %2066 = vmatprep.mubr.f32.mxu0 %v1477_v2  ;;  %v1314_v0 = vld [vmem:[%s5127_s9 + $0x920] sm:$0xff]  ;;  %v1260_v1 = vld [vmem:[%s5127_s9 + $0x770] sm:$0xff]  ;;  %v3889_v19 = vpack.c.bf16 %v1097_v11, %v1041_v10  ;;  %v1377_v53 = vld [vmem:[%s5127_s9 + $0xb18] sm:$0xff] }
 0x131   : > { %2136 = vmatprep.mubr.f32.mxu1 %v1478_v3  ;;  %v1316_v2 = vld [vmem:[%s5127_s9 + $0x930] sm:$0xff]  ;;  %v3863_v3 = vpack.c.bf16 %v1314_v0, %v1258_v63  ;;  %v1042_v63 = vld [vmem:[%s5127_s9 + $0xa0] sm:$0xff] }
 0x132   : > { %v3875_v4 = vpack.c.bf16 %v1316_v2, %v1260_v1  ;;  %v1098_v0 = vld [vmem:[%s5127_s9 + $0x260] sm:$0xff]  ;;  %v1044_v1 = vld [vmem:[%s5127_s9 + $0xb0] sm:$0xff] }
 0x133   : > { %v3903_v10 = vpack.c.bf16 %v1098_v0, %v1042_v63  ;;  %v1158_v63 = vld [vmem:[%s5127_s9 + $0x440] sm:$0xff] }
 0x134   : > { %v1214_v0 = vld [vmem:[%s5127_s9 + $0x600] sm:$0xff] }
 0x136   : > { %3836 = vmatpush1.bf16.xpose.msra.mxu0 %v3835_v12  ;;  %v1496_v12 = vcombine.high %v1012_v7, %v1012_v7 }
 0x137   : > { %3848 = vmatpush1.bf16.xpose.msra.mxu1 %v3847_v13  ;;  %3838 = vmatprep.subr.bf16.mxu0 %v3837_v14  ;;  %v1370_v13 = vld [vmem:[%s5127_s9 + $0xae0] sm:$0xff]  ;;  %v1372_v14 = vld [vmem:[%s5127_s9 + $0xaf0] sm:$0xff] }
 0x138   : > { %3850 = vmatprep.subr.bf16.mxu1 %v3849_v15  ;;  %v3877_v15 = vpack.c.bf16 %v1095_v9, %v1039_v8  ;;  %v5302_v26 = vrot.slane %v1496_v12, %v5149_v38  ;;  %v1213_v8 = vld [vmem:[%s5127_s9 + $0x5f8] sm:$0xff] }
 0x13e   : > { %3840 = vmatpush1.bf16.xpose.msra.mxu0 %v3839_v20  ;;  %v1096_v20 = vld [vmem:[%s5127_s9 + $0x250] sm:$0xff] }
 0x13f   : > { %3852 = vmatpush1.bf16.xpose.msra.mxu1 %v3851_v21  ;;  %2014 = vmatprep.subr.mxu0 %v1367_v22  ;;  %v1151_v21 = vld [vmem:[%s5127_s9 + $0x408] sm:$0xff]  ;;  %v3891_v28 = vpack.c.bf16 %v1096_v20, %v1040_v18  ;;  %v1156_v18 = vld [vmem:[%s5127_s9 + $0x430] sm:$0xff] }
 0x140   : > { %2084 = vmatprep.subr.mxu1 %v1369_v23  ;;  %v1207_v22 = vld [vmem:[%s5127_s9 + $0x5c8] sm:$0xff]  ;;  %v5297_v23 = vrot.slane %v1012_v7, %v5149_v38  ;;  %v1157_v7 = vld [vmem:[%s5127_s9 + $0x438] sm:$0xff] }
 0x141   : > { %v3881_v29 = vpack.c.bf16 %v1207_v22, %v1151_v21  ;;  %v1267_v20 = vld [vmem:[%s5127_s9 + $0x7a8] sm:$0xff]  ;;  %v1269_v22 = vld [vmem:[%s5127_s9 + $0x7b8] sm:$0xff] }
 0x142   : > { %v1323_v21 = vld [vmem:[%s5127_s9 + $0x968] sm:$0xff] }
 0x146   : > { %2015 = vmatpush1.xpose.msra.mxu0 %v1366_v30  ;;  %v3893_v30 = vpack.c.bf16 %v1209_v25, %v1153_v24  ;;  %v3907_v24 = vpack.c.bf16 %v1210_v17, %v1154_v16  ;;  %v1383_v17 = vld [vmem:[%s5127_s9 + $0xb48] sm:$0xff] }
 0x147   : > { %2085 = vmatpush1.xpose.msra.mxu1 %v1368_v31  ;;  %3854 = vmatprep.subr.bf16.mxu0 %v3853_v32  ;;  %v1511_v31 = vcombine.high %v5297_v23, %v5297_v23  ;;  %v1512_v32 = vcombine.high %v5302_v26, %v5302_v26 }
 0x148   : > { %3866 = vmatprep.subr.bf16.mxu1 %v3865_v36  ;;  %v1208_v36 = vld [vmem:[%s5127_s9 + $0x5d0] sm:$0xff] }
 0x149   : > { %2067 = vmatmul.mubr.f32.vlgmr.msra.gmra.mrb[4].mxu0 %v5215_v58  ;;  %v1317_v58 = vld [vmem:[%s5127_s9 + $0x938] sm:$0xff]  ;;  %v3895_v43 = vpack.c.bf16 %v1208_v36, %v1152_v35  ;;  %v1014_v36 = vld [vmem:[%s5125_s26 + $0x30] sm:$0xff] }
 0x14a   : > { %3856 = vmatpush1.bf16.xpose.msra.mxu0 %v3855_v45  ;;  %2137 = vmatmul.mubr.f32.vlgmr.msra.gmra.mrb[4].mxu1 %v5220_v61  ;;  %v3861_v61 = vpack.c.bf16 %v1315_v56, %v1259_v55  ;;  %v3873_v62 = vpack.c.bf16 %v1317_v58, %v1261_v57  ;;  %v1043_v55 = vld [vmem:[%s5127_s9 + $0xa8] sm:$0xff]  ;;  %v1045_v57 = vld [vmem:[%s5127_s9 + $0xb8] sm:$0xff] }
 0x14b   : > { %3868 = vmatpush1.bf16.xpose.msra.mxu1 %v3867_v46  ;;  %3858 = vmatprep.subr.bf16.mxu0 %v3857_v47  ;;  %v1262_v46 = vld [vmem:[%s5127_s9 + $0x780] sm:$0xff]  ;;  %v1099_v56 = vld [vmem:[%s5127_s9 + $0x268] sm:$0xff]  ;;  %v1101_v58 = vld [vmem:[%s5127_s9 + $0x278] sm:$0xff] }
 0x14c   : > { %3870 = vmatprep.subr.bf16.mxu1 %v3869_v48  ;;  %2206 = vmatprep.mubr.f32.mxu0 %v1494_v49  ;;  %v1318_v47 = vld [vmem:[%s5127_s9 + $0x940] sm:$0xff]  ;;  %v1264_v48 = vld [vmem:[%s5127_s9 + $0x790] sm:$0xff]  ;;  %v3913_v2 = vpack.c.bf16 %v1101_v58, %v1045_v57  ;;  %v1381_v35 = vld [vmem:[%s5127_s9 + $0xb38] sm:$0xff] }
 0x14d   : > { %2276 = vmatprep.mubr.f32.mxu1 %v1495_v50  ;;  %v1320_v49 = vld [vmem:[%s5127_s9 + $0x950] sm:$0xff]  ;;  %v3887_v50 = vpack.c.bf16 %v1318_v47, %v1262_v46  ;;  %v1046_v46 = vld [vmem:[%s5127_s9 + $0xc0] sm:$0xff] }
 0x14e   : > { %v3899_v51 = vpack.c.bf16 %v1320_v49, %v1264_v48  ;;  %v1102_v47 = vld [vmem:[%s5127_s9 + $0x280] sm:$0xff]  ;;  %v1048_v48 = vld [vmem:[%s5127_s9 + $0xd0] sm:$0xff] }
 0x14f   : > { %v3927_v57 = vpack.c.bf16 %v1102_v47, %v1046_v46  ;;  %v1162_v46 = vld [vmem:[%s5127_s9 + $0x460] sm:$0xff] }
 0x150   : > { %v1218_v47 = vld [vmem:[%s5127_s9 + $0x620] sm:$0xff] }
 0x152   : > { %3860 = vmatpush1.bf16.xpose.msra.mxu0 %v3859_v59  ;;  %v1513_v59 = vcombine.high %v1013_v54, %v1013_v54 }
 0x153   : > { %3872 = vmatpush1.bf16.xpose.msra.mxu1 %v3871_v60  ;;  %3862 = vmatprep.subr.bf16.mxu0 %v3861_v61  ;;  %v1374_v60 = vld [vmem:[%s5127_s9 + $0xb00] sm:$0xff]  ;;  %v1376_v61 = vld [vmem:[%s5127_s9 + $0xb10] sm:$0xff] }
 0x154   : > { %3874 = vmatprep.subr.bf16.mxu1 %v3873_v62  ;;  %v3901_v62 = vpack.c.bf16 %v1099_v56, %v1043_v55  ;;  %v5343_v9 = vrot.slane %v1513_v59, %v5149_v38  ;;  %v1217_v55 = vld [vmem:[%s5127_s9 + $0x618] sm:$0xff] }
 0x15a   : > { %3864 = vmatpush1.bf16.xpose.msra.mxu0 %v3863_v3  ;;  %v1100_v3 = vld [vmem:[%s5127_s9 + $0x270] sm:$0xff] }
 0x15b   : > { %3876 = vmatpush1.bf16.xpose.msra.mxu1 %v3875_v4  ;;  %2154 = vmatprep.subr.mxu0 %v1371_v5  ;;  %v1155_v4 = vld [vmem:[%s5127_s9 + $0x428] sm:$0xff]  ;;  %v3915_v11 = vpack.c.bf16 %v1100_v3, %v1044_v1  ;;  %v1160_v1 = vld [vmem:[%s5127_s9 + $0x450] sm:$0xff] }
 0x15c   : > { %2224 = vmatprep.subr.mxu1 %v1373_v6  ;;  %v1211_v5 = vld [vmem:[%s5127_s9 + $0x5e8] sm:$0xff]  ;;  %v5338_v6 = vrot.slane %v1013_v54, %v5149_v38  ;;  %v1161_v54 = vld [vmem:[%s5127_s9 + $0x458] sm:$0xff] }
 0x15d   : > { %v3905_v12 = vpack.c.bf16 %v1211_v5, %v1155_v4  ;;  %v1271_v3 = vld [vmem:[%s5127_s9 + $0x7c8] sm:$0xff]  ;;  %v1273_v5 = vld [vmem:[%s5127_s9 + $0x7d8] sm:$0xff] }
 0x15e   : > { %v1327_v4 = vld [vmem:[%s5127_s9 + $0x988] sm:$0xff] }
 0x162   : > { %2155 = vmatpush1.xpose.msra.mxu0 %v1370_v13  ;;  %v3917_v13 = vpack.c.bf16 %v1213_v8, %v1157_v7  ;;  %v3931_v7 = vpack.c.bf16 %v1214_v0, %v1158_v63  ;;  %v1387_v0 = vld [vmem:[%s5127_s9 + $0xb68] sm:$0xff] }
 0x163   : > { %2225 = vmatpush1.xpose.msra.mxu1 %v1372_v14  ;;  %3878 = vmatprep.subr.bf16.mxu0 %v3877_v15  ;;  %v1528_v14 = vcombine.high %v5338_v6, %v5338_v6  ;;  %v1529_v15 = vcombine.high %v5343_v9, %v5343_v9 }
 0x164   : > { %3890 = vmatprep.subr.bf16.mxu1 %v3889_v19  ;;  %v1212_v19 = vld [vmem:[%s5127_s9 + $0x5f0] sm:$0xff] }
 0x165   : > { %2207 = vmatmul.mubr.f32.vlgmr.msra.gmra.mrb[6].mxu0 %v5256_v41  ;;  %v1321_v41 = vld [vmem:[%s5127_s9 + $0x958] sm:$0xff]  ;;  %v3919_v25 = vpack.c.bf16 %v1212_v19, %v1156_v18 }
 0x166   : > { %3880 = vmatpush1.bf16.xpose.msra.mxu0 %v3879_v27  ;;  %2277 = vmatmul.mubr.f32.vlgmr.msra.gmra.mrb[6].mxu1 %v5261_v44  ;;  %v3885_v44 = vpack.c.bf16 %v1319_v39, %v1263_v37  ;;  %v3897_v45 = vpack.c.bf16 %v1321_v41, %v1265_v40  ;;  %v1047_v37 = vld [vmem:[%s5127_s9 + $0xc8] sm:$0xff]  ;;  %v1049_v40 = vld [vmem:[%s5127_s9 + $0xd8] sm:$0xff] }
 0x167   : > { %3892 = vmatpush1.bf16.xpose.msra.mxu1 %v3891_v28  ;;  %3882 = vmatprep.subr.bf16.mxu0 %v3881_v29  ;;  %v1266_v28 = vld [vmem:[%s5127_s9 + $0x7a0] sm:$0xff]  ;;  %v1103_v39 = vld [vmem:[%s5127_s9 + $0x288] sm:$0xff]  ;;  %v1105_v41 = vld [vmem:[%s5127_s9 + $0x298] sm:$0xff] }
 0x168   : > { %3894 = vmatprep.subr.bf16.mxu1 %v3893_v30  ;;  %2346 = vmatprep.mubr.f32.mxu0 %v1511_v31  ;;  %v1322_v29 = vld [vmem:[%s5127_s9 + $0x960] sm:$0xff]  ;;  %v1268_v30 = vld [vmem:[%s5127_s9 + $0x7b0] sm:$0xff]  ;;  %v3937_v49 = vpack.c.bf16 %v1105_v41, %v1049_v40  ;;  %v1385_v18 = vld [vmem:[%s5127_s9 + $0xb58] sm:$0xff] }
 0x169   : > { %2416 = vmatprep.mubr.f32.mxu1 %v1512_v32  ;;  %v1324_v31 = vld [vmem:[%s5127_s9 + $0x970] sm:$0xff]  ;;  %v3911_v32 = vpack.c.bf16 %v1322_v29, %v1266_v28  ;;  %v1015_v19 = vld [vmem:[%s5125_s26 + $0x38] sm:$0xff]  ;;  %v1050_v28 = vld [vmem:[%s5127_s9 + $0xe0] sm:$0xff] }
 0x16a   : > { %v3923_v33 = vpack.c.bf16 %v1324_v31, %v1268_v30  ;;  %v1106_v29 = vld [vmem:[%s5127_s9 + $0x2a0] sm:$0xff]  ;;  %v1052_v30 = vld [vmem:[%s5127_s9 + $0xf0] sm:$0xff] }
 0x16b   : > { %v3951_v40 = vpack.c.bf16 %v1106_v29, %v1050_v28  ;;  %v1166_v28 = vld [vmem:[%s5127_s9 + $0x480] sm:$0xff] }
 0x16c   : > { %v1222_v29 = vld [vmem:[%s5127_s9 + $0x640] sm:$0xff] }
 0x16e   : > { %3884 = vmatpush1.bf16.xpose.msra.mxu0 %v3883_v42  ;;  %v1530_v42 = vcombine.high %v1014_v36, %v1014_v36 }
 0x16f   : > { %3896 = vmatpush1.bf16.xpose.msra.mxu1 %v3895_v43  ;;  %3886 = vmatprep.subr.bf16.mxu0 %v3885_v44  ;;  %v1378_v43 = vld [vmem:[%s5127_s9 + $0xb20] sm:$0xff]  ;;  %v1380_v44 = vld [vmem:[%s5127_s9 + $0xb30] sm:$0xff] }
 0x170   : > { %3898 = vmatprep.subr.bf16.mxu1 %v3897_v45  ;;  %v3925_v45 = vpack.c.bf16 %v1103_v39, %v1047_v37  ;;  %v5384_v56 = vrot.slane %v1530_v42, %v5149_v38  ;;  %v1221_v37 = vld [vmem:[%s5127_s9 + $0x638] sm:$0xff] }
 0x176   : > { %3888 = vmatpush1.bf16.xpose.msra.mxu0 %v3887_v50  ;;  %v1104_v50 = vld [vmem:[%s5127_s9 + $0x290] sm:$0xff] }
 0x177   : > { %3900 = vmatpush1.bf16.xpose.msra.mxu1 %v3899_v51  ;;  %2294 = vmatprep.subr.mxu0 %v1375_v52  ;;  %v1159_v51 = vld [vmem:[%s5127_s9 + $0x448] sm:$0xff]  ;;  %v3939_v58 = vpack.c.bf16 %v1104_v50, %v1048_v48  ;;  %v1164_v48 = vld [vmem:[%s5127_s9 + $0x470] sm:$0xff] }
 0x178   : > { %2364 = vmatprep.subr.mxu1 %v1377_v53  ;;  %v1215_v52 = vld [vmem:[%s5127_s9 + $0x608] sm:$0xff]  ;;  %v5379_v53 = vrot.slane %v1014_v36, %v5149_v38  ;;  %v1165_v36 = vld [vmem:[%s5127_s9 + $0x478] sm:$0xff] }
 0x179   : > { %v3929_v59 = vpack.c.bf16 %v1215_v52, %v1159_v51  ;;  %v1275_v50 = vld [vmem:[%s5127_s9 + $0x7e8] sm:$0xff]  ;;  %v1277_v52 = vld [vmem:[%s5127_s9 + $0x7f8] sm:$0xff] }
 0x17a   : > { %v1331_v51 = vld [vmem:[%s5127_s9 + $0x9a8] sm:$0xff] }
 0x17e   : > { %2295 = vmatpush1.xpose.msra.mxu0 %v1374_v60  ;;  %v3941_v60 = vpack.c.bf16 %v1217_v55, %v1161_v54  ;;  %v3955_v54 = vpack.c.bf16 %v1218_v47, %v1162_v46 }
 0x17f   : > { %2365 = vmatpush1.xpose.msra.mxu1 %v1376_v61  ;;  %3902 = vmatprep.subr.bf16.mxu0 %v3901_v62  ;;  %v1545_v61 = vcombine.high %v5379_v53, %v5379_v53  ;;  %v1546_v62 = vcombine.high %v5384_v56, %v5384_v56 }
 0x180   : > { %3914 = vmatprep.subr.bf16.mxu1 %v3913_v2  ;;  %v1216_v2 = vld [vmem:[%s5127_s9 + $0x610] sm:$0xff] }
 0x181   : > { %2347 = vmatmul.mubr.f32.vlgmr.msra.gmra.mrb[8].mxu0 %v5297_v23  ;;  %v1325_v23 = vld [vmem:[%s5127_s9 + $0x978] sm:$0xff]  ;;  %v3943_v8 = vpack.c.bf16 %v1216_v2, %v1160_v1  ;;  %v1016_v2 = vld [vmem:[%s5125_s26 + $0x40] sm:$0xff] }
 0x182   : > { %3904 = vmatpush1.bf16.xpose.msra.mxu0 %v3903_v10  ;;  %2417 = vmatmul.mubr.f32.vlgmr.msra.gmra.mrb[8].mxu1 %v5302_v26  ;;  %v3909_v26 = vpack.c.bf16 %v1323_v21, %v1267_v20  ;;  %v3921_v27 = vpack.c.bf16 %v1325_v23, %v1269_v22  ;;  %v1051_v20 = vld [vmem:[%s5127_s9 + $0xe8] sm:$0xff]  ;;  %v1053_v22 = vld [vmem:[%s5127_s9 + $0xf8] sm:$0xff] }
 0x183   : > { %3916 = vmatpush1.bf16.xpose.msra.mxu1 %v3915_v11  ;;  %3906 = vmatprep.subr.bf16.mxu0 %v3905_v12  ;;  %v1270_v11 = vld [vmem:[%s5127_s9 + $0x7c0] sm:$0xff]  ;;  %v1107_v21 = vld [vmem:[%s5127_s9 + $0x2a8] sm:$0xff]  ;;  %v1109_v23 = vld [vmem:[%s5127_s9 + $0x2b8] sm:$0xff] }
 0x184   : > { %3918 = vmatprep.subr.bf16.mxu1 %v3917_v13  ;;  %2486 = vmatprep.mubr.f32.mxu0 %v1528_v14  ;;  %v1326_v12 = vld [vmem:[%s5127_s9 + $0x980] sm:$0xff]  ;;  %v1272_v13 = vld [vmem:[%s5127_s9 + $0x7d0] sm:$0xff]  ;;  %v3961_v31 = vpack.c.bf16 %v1109_v23, %v1053_v22  ;;  %v1389_v1 = vld [vmem:[%s5127_s9 + $0xb78] sm:$0xff] }
 0x185   : > { %2556 = vmatprep.mubr.f32.mxu1 %v1529_v15  ;;  %v1328_v14 = vld [vmem:[%s5127_s9 + $0x990] sm:$0xff]  ;;  %v3935_v15 = vpack.c.bf16 %v1326_v12, %v1270_v11  ;;  %v1054_v11 = vld [vmem:[%s5127_s9 + $0x100] sm:$0xff] }
 0x186   : > { %v3947_v16 = vpack.c.bf16 %v1328_v14, %v1272_v13  ;;  %v1110_v12 = vld [vmem:[%s5127_s9 + $0x2c0] sm:$0xff]  ;;  %v1056_v13 = vld [vmem:[%s5127_s9 + $0x110] sm:$0xff] }
 0x187   : > { %v3975_v22 = vpack.c.bf16 %v1110_v12, %v1054_v11 }
 0x18a   : > { %3908 = vmatpush1.bf16.xpose.msra.mxu0 %v3907_v24  ;;  %v1547_v24 = vcombine.high %v1015_v19, %v1015_v19 }
 0x18b   : > { %3920 = vmatpush1.bf16.xpose.msra.mxu1 %v3919_v25  ;;  %3910 = vmatprep.subr.bf16.mxu0 %v3909_v26  ;;  %v1382_v25 = vld [vmem:[%s5127_s9 + $0xb40] sm:$0xff]  ;;  %v1384_v26 = vld [vmem:[%s5127_s9 + $0xb50] sm:$0xff] }
 0x18c   : > { %3922 = vmatprep.subr.bf16.mxu1 %v3921_v27  ;;  %v3949_v27 = vpack.c.bf16 %v1107_v21, %v1051_v20  ;;  %v5425_v39 = vrot.slane %v1547_v24, %v5149_v38  ;;  %v1225_v20 = vld [vmem:[%s5127_s9 + $0x658] sm:$0xff] }
 0x192   : > { %3912 = vmatpush1.bf16.xpose.msra.mxu0 %v3911_v32  ;;  %v1108_v32 = vld [vmem:[%s5127_s9 + $0x2b0] sm:$0xff] }
 0x193   : > { %3924 = vmatpush1.bf16.xpose.msra.mxu1 %v3923_v33  ;;  %2434 = vmatprep.subr.mxu0 %v1379_v34  ;;  %v1163_v33 = vld [vmem:[%s5127_s9 + $0x468] sm:$0xff]  ;;  %v3963_v41 = vpack.c.bf16 %v1108_v32, %v1052_v30  ;;  %v1168_v30 = vld [vmem:[%s5127_s9 + $0x490] sm:$0xff] }
 0x194   : > { %2504 = vmatprep.subr.mxu1 %v1381_v35  ;;  %v1219_v34 = vld [vmem:[%s5127_s9 + $0x628] sm:$0xff]  ;;  %v5420_v35 = vrot.slane %v1015_v19, %v5149_v38  ;;  %v1169_v19 = vld [vmem:[%s5127_s9 + $0x498] sm:$0xff] }
 0x195   : > { %v3953_v42 = vpack.c.bf16 %v1219_v34, %v1163_v33  ;;  %v1279_v32 = vld [vmem:[%s5127_s9 + $0x808] sm:$0xff]  ;;  %v1281_v34 = vld [vmem:[%s5127_s9 + $0x818] sm:$0xff] }
 0x196   : > { %v1335_v33 = vld [vmem:[%s5127_s9 + $0x9c8] sm:$0xff] }
 0x19a   : > { %2435 = vmatpush1.xpose.msra.mxu0 %v1378_v43  ;;  %v3965_v43 = vpack.c.bf16 %v1221_v37, %v1165_v36  ;;  %v3979_v36 = vpack.c.bf16 %v1222_v29, %v1166_v28  ;;  %v1282_v28 = vld [vmem:[%s5127_s9 + $0x820] sm:$0xff] }
 0x19b   : > { %2505 = vmatpush1.xpose.msra.mxu1 %v1380_v44  ;;  %3926 = vmatprep.subr.bf16.mxu0 %v3925_v45  ;;  %v1562_v44 = vcombine.high %v5420_v35, %v5420_v35  ;;  %v1563_v45 = vcombine.high %v5425_v39, %v5425_v39  ;;  %v1338_v29 = vld [vmem:[%s5127_s9 + $0x9e0] sm:$0xff] }
 0x19c   : > { %3938 = vmatprep.subr.bf16.mxu1 %v3937_v49  ;;  %v1220_v49 = vld [vmem:[%s5127_s9 + $0x630] sm:$0xff] }
 0x19d   : > { %2487 = vmatmul.mubr.f32.vlgmr.msra.gmra.mrb[10].mxu0 %v5338_v6  ;;  %v1329_v6 = vld [vmem:[%s5127_s9 + $0x998] sm:$0xff]  ;;  %v3967_v55 = vpack.c.bf16 %v1220_v49, %v1164_v48  ;;  %v1391_v48 = vld [vmem:[%s5127_s9 + $0xb88] sm:$0xff] }
 0x19e   : > { %3928 = vmatpush1.bf16.xpose.msra.mxu0 %v3927_v57  ;;  %2557 = vmatmul.mubr.f32.vlgmr.msra.gmra.mrb[10].mxu1 %v5343_v9  ;;  %v3933_v9 = vpack.c.bf16 %v1327_v4, %v1271_v3  ;;  %v3945_v10 = vpack.c.bf16 %v1329_v6, %v1273_v5  ;;  %v1055_v3 = vld [vmem:[%s5127_s9 + $0x108] sm:$0xff]  ;;  %v1057_v5 = vld [vmem:[%s5127_s9 + $0x118] sm:$0xff] }
 0x19f   : > { %3940 = vmatpush1.bf16.xpose.msra.mxu1 %v3939_v58  ;;  %3930 = vmatprep.subr.bf16.mxu0 %v3929_v59  ;;  %v1274_v58 = vld [vmem:[%s5127_s9 + $0x7e0] sm:$0xff]  ;;  %v1111_v4 = vld [vmem:[%s5127_s9 + $0x2c8] sm:$0xff]  ;;  %v1113_v6 = vld [vmem:[%s5127_s9 + $0x2d8] sm:$0xff] }
 0x1a0   : > { %3942 = vmatprep.subr.bf16.mxu1 %v3941_v60  ;;  %2626 = vmatprep.mubr.f32.mxu0 %v1545_v61  ;;  %v1330_v59 = vld [vmem:[%s5127_s9 + $0x9a0] sm:$0xff]  ;;  %v1276_v60 = vld [vmem:[%s5127_s9 + $0x7f0] sm:$0xff]  ;;  %v3985_v14 = vpack.c.bf16 %v1113_v6, %v1057_v5  ;;  %v1227_v5 = vld [vmem:[%s5127_s9 + $0x668] sm:$0xff] }
 0x1a1   : > { %2696 = vmatprep.mubr.f32.mxu1 %v1546_v62  ;;  %v1332_v61 = vld [vmem:[%s5127_s9 + $0x9b0] sm:$0xff]  ;;  %v3959_v62 = vpack.c.bf16 %v1330_v59, %v1274_v58  ;;  %v1117_v58 = vld [vmem:[%s5127_s9 + $0x2f8] sm:$0xff] }
 0x1a2   : > { %v3971_v63 = vpack.c.bf16 %v1332_v61, %v1276_v60  ;;  %v1390_v60 = vld [vmem:[%s5127_s9 + $0xb80] sm:$0xff]  ;;  %v1392_v61 = vld [vmem:[%s5127_s9 + $0xb90] sm:$0xff] }
 0x1a6   : > { %3932 = vmatpush1.bf16.xpose.msra.mxu0 %v3931_v7  ;;  %v1564_v7 = vcombine.high %v1016_v2, %v1016_v2 }
 0x1a7   : > { %3944 = vmatpush1.bf16.xpose.msra.mxu1 %v3943_v8  ;;  %3934 = vmatprep.subr.bf16.mxu0 %v3933_v9  ;;  %v1386_v8 = vld [vmem:[%s5127_s9 + $0xb60] sm:$0xff]  ;;  %v1388_v9 = vld [vmem:[%s5127_s9 + $0xb70] sm:$0xff] }
 0x1a8   : > { %3946 = vmatprep.subr.bf16.mxu1 %v3945_v10  ;;  %v3973_v10 = vpack.c.bf16 %v1111_v4, %v1055_v3  ;;  %v5466_v21 = vrot.slane %v1564_v7, %v5149_v38  ;;  %v1116_v3 = vld [vmem:[%s5127_s9 + $0x2f0] sm:$0xff]  ;;  %v1171_v4 = vld [vmem:[%s5127_s9 + $0x4a8] sm:$0xff]  ;;  %v1173_v7 = vld [vmem:[%s5127_s9 + $0x4b8] sm:$0xff] }
 0x1a9   : > { %v4001_v12 = vpack.c.bf16 %v1227_v5, %v1171_v4  ;;  %v1174_v5 = vld [vmem:[%s5127_s9 + $0x4c0] sm:$0xff] }
 0x1ae   : > { %3936 = vmatpush1.bf16.xpose.msra.mxu0 %v3935_v15  ;;  %v1112_v15 = vld [vmem:[%s5127_s9 + $0x2d0] sm:$0xff] }
 0x1af   : > { %3948 = vmatpush1.bf16.xpose.msra.mxu1 %v3947_v16  ;;  %2574 = vmatprep.subr.mxu0 %v1383_v17  ;;  %v1167_v16 = vld [vmem:[%s5127_s9 + $0x488] sm:$0xff]  ;;  %v3987_v23 = vpack.c.bf16 %v1112_v15, %v1056_v13 }
 0x1b0   : > { %2644 = vmatprep.subr.mxu1 %v1385_v18  ;;  %v1223_v17 = vld [vmem:[%s5127_s9 + $0x648] sm:$0xff]  ;;  %v5461_v18 = vrot.slane %v1016_v2, %v5149_v38 }
 0x1b1   : > { %v3977_v24 = vpack.c.bf16 %v1223_v17, %v1167_v16  ;;  %v1170_v16 = vld [vmem:[%s5127_s9 + $0x4a0] sm:$0xff] }
 0x1b2   : > { %v1226_v17 = vld [vmem:[%s5127_s9 + $0x660] sm:$0xff] }
 0x1b6   : > { %2575 = vmatpush1.xpose.msra.mxu0 %v1382_v25  ;;  %v3989_v25 = vpack.c.bf16 %v1225_v20, %v1169_v19  ;;  %v1172_v19 = vld [vmem:[%s5127_s9 + $0x4b0] sm:$0xff] }
 0x1b7   : > { %2645 = vmatpush1.xpose.msra.mxu1 %v1384_v26  ;;  %3950 = vmatprep.subr.bf16.mxu0 %v3949_v27  ;;  %v1579_v26 = vcombine.high %v5461_v18, %v5461_v18  ;;  %v1580_v27 = vcombine.high %v5466_v21, %v5466_v21  ;;  %v1228_v20 = vld [vmem:[%s5127_s9 + $0x670] sm:$0xff] }
 0x1b8   : > { %3962 = vmatprep.subr.bf16.mxu1 %v3961_v31  ;;  %v1224_v31 = vld [vmem:[%s5127_s9 + $0x650] sm:$0xff] }
 0x1b9   : > { %2627 = vmatmul.mubr.f32.vlgmr.msra.gmra.mrb[12].mxu0 %v5379_v53  ;;  %v1333_v53 = vld [vmem:[%s5127_s9 + $0x9b8] sm:$0xff]  ;;  %v3991_v37 = vpack.c.bf16 %v1224_v31, %v1168_v30  ;;  %v1284_v30 = vld [vmem:[%s5127_s9 + $0x830] sm:$0xff] }
 0x1ba   : > { %3952 = vmatpush1.bf16.xpose.msra.mxu0 %v3951_v40  ;;  %2697 = vmatmul.mubr.f32.vlgmr.msra.gmra.mrb[12].mxu1 %v5384_v56  ;;  %v3957_v56 = vpack.c.bf16 %v1331_v51, %v1275_v50  ;;  %v3969_v57 = vpack.c.bf16 %v1333_v53, %v1277_v52  ;;  %v1393_v51 = vld [vmem:[%s5127_s9 + $0xb98] sm:$0xff]  ;;  %v1340_v31 = vld [vmem:[%s5127_s9 + $0x9f0] sm:$0xff] }
 0x1bb   : > { %3964 = vmatpush1.bf16.xpose.msra.mxu1 %v3963_v41  ;;  %3954 = vmatprep.subr.bf16.mxu0 %v3953_v42  ;;  %v1278_v41 = vld [vmem:[%s5127_s9 + $0x800] sm:$0xff] }
 0x1bc   : > { %3966 = vmatprep.subr.bf16.mxu1 %v3965_v43  ;;  %2766 = vmatprep.mubr.f32.mxu0 %v1562_v44  ;;  %v1334_v42 = vld [vmem:[%s5127_s9 + $0x9c0] sm:$0xff]  ;;  %v1280_v43 = vld [vmem:[%s5127_s9 + $0x810] sm:$0xff] }
 0x1bd   : > { %2836 = vmatprep.mubr.f32.mxu1 %v1563_v45  ;;  %v1336_v44 = vld [vmem:[%s5127_s9 + $0x9d0] sm:$0xff]  ;;  %v3983_v45 = vpack.c.bf16 %v1334_v42, %v1278_v41 }
 0x1be   : > { %v3995_v46 = vpack.c.bf16 %v1336_v44, %v1280_v43  ;;  %v1018_v42 = vld [vmem:[%s5125_s26 + $0x50] sm:$0xff]  ;;  %v1063_v44 = vld [vmem:[%s5127_s9 + $0x148] sm:$0xff] }
 0x1c2   : > { %3956 = vmatpush1.bf16.xpose.msra.mxu0 %v3955_v54  ;;  %v1017_v54 = vld [vmem:[%s5125_s26 + $0x48] sm:$0xff] }
 0x1c3   : > { %3968 = vmatpush1.bf16.xpose.msra.mxu1 %v3967_v55  ;;  %3958 = vmatprep.subr.bf16.mxu0 %v3957_v56  ;;  %v1059_v55 = vld [vmem:[%s5127_s9 + $0x128] sm:$0xff]  ;;  %v1581_v59 = vcombine.high %v1017_v54, %v1017_v54  ;;  %v5504_v6 = vrot.slane %v1017_v54, %v5149_v38  ;;  %v1064_v54 = vld [vmem:[%s5127_s9 + $0x150] sm:$0xff] }
 0x1c4   : > { %3970 = vmatprep.subr.bf16.mxu1 %v3969_v57  ;;  %v1115_v56 = vld [vmem:[%s5127_s9 + $0x2e8] sm:$0xff]  ;;  %v1061_v57 = vld [vmem:[%s5127_s9 + $0x138] sm:$0xff] }
 0x1c5   : > { %v4009_v2 = vpack.c.bf16 %v1117_v58, %v1061_v57  ;;  %v1175_v57 = vld [vmem:[%s5127_s9 + $0x4c8] sm:$0xff] }
 0x1c6   : > { %v1231_v58 = vld [vmem:[%s5127_s9 + $0x688] sm:$0xff] }
 0x1ca   : > { %3960 = vmatpush1.bf16.xpose.msra.mxu0 %v3959_v62  ;;  %v3997_v62 = vpack.c.bf16 %v1115_v56, %v1059_v55  ;;  %v1120_v56 = vld [vmem:[%s5127_s9 + $0x310] sm:$0xff] }
 0x1cb   : > { %3972 = vmatpush1.bf16.xpose.msra.mxu1 %v3971_v63  ;;  %2714 = vmatprep.subr.mxu0 %v1387_v0  ;;  %v1058_v63 = vld [vmem:[%s5127_s9 + $0x120] sm:$0xff] }
 0x1cc   : > { %2784 = vmatprep.subr.mxu1 %v1389_v1  ;;  %v1114_v0 = vld [vmem:[%s5127_s9 + $0x2e0] sm:$0xff]  ;;  %v1060_v1 = vld [vmem:[%s5127_s9 + $0x130] sm:$0xff] }
 0x1cd   : > { %v4011_v11 = vpack.c.bf16 %v1116_v3, %v1060_v1  ;;  %v4025_v1 = vpack.c.bf16 %v1231_v58, %v1175_v57  ;;  %v1178_v58 = vld [vmem:[%s5127_s9 + $0x4e0] sm:$0xff] }
 0x1d2   : > { %2715 = vmatpush1.xpose.msra.mxu0 %v1386_v8  ;;  %v1229_v8 = vld [vmem:[%s5127_s9 + $0x678] sm:$0xff] }
 0x1d3   : > { %2785 = vmatpush1.xpose.msra.mxu1 %v1388_v9  ;;  %3974 = vmatprep.subr.bf16.mxu0 %v3973_v10  ;;  %v5509_v9 = vrot.slane %v1581_v59, %v5149_v38  ;;  %v3999_v10 = vpack.c.bf16 %v1114_v0, %v1058_v63  ;;  %v4013_v13 = vpack.c.bf16 %v1229_v8, %v1173_v7  ;;  %v1230_v7 = vld [vmem:[%s5127_s9 + $0x680] sm:$0xff]  ;;  %v1176_v8 = vld [vmem:[%s5127_s9 + $0x4d0] sm:$0xff] }
 0x1d4   : > { %3986 = vmatprep.subr.bf16.mxu1 %v3985_v14  ;;  %v1596_v14 = vcombine.high %v5504_v6, %v5504_v6  ;;  %v5548_v59 = vrot.slane %v1018_v42, %v5149_v38  ;;  %v4035_v0 = vpack.c.bf16 %v1120_v56, %v1064_v54 }
 0x1d5   : > { %2767 = vmatmul.mubr.f32.vlgmr.msra.gmra.mrb[14].mxu0 %v5420_v35  ;;  %v1337_v35 = vld [vmem:[%s5127_s9 + $0x9d8] sm:$0xff]  ;;  %v1597_v15 = vcombine.high %v5509_v9, %v5509_v9 }
 0x1d6   : > { %3976 = vmatpush1.bf16.xpose.msra.mxu0 %v3975_v22  ;;  %2837 = vmatmul.mubr.f32.vlgmr.msra.gmra.mrb[14].mxu1 %v5425_v39  ;;  %v3981_v39 = vpack.c.bf16 %v1335_v33, %v1279_v32  ;;  %v3993_v40 = vpack.c.bf16 %v1337_v35, %v1281_v34  ;;  %v1283_v22 = vld [vmem:[%s5127_s9 + $0x828] sm:$0xff]  ;;  %v4007_v32 = vpack.c.bf16 %v1338_v29, %v1282_v28  ;;  %v1401_v28 = vld [vmem:[%s5127_s9 + $0xbd8] sm:$0xff] }
 0x1d7   : > { %3988 = vmatpush1.bf16.xpose.msra.mxu1 %v3987_v23  ;;  %3978 = vmatprep.subr.bf16.mxu0 %v3977_v24  ;;  %v1339_v23 = vld [vmem:[%s5127_s9 + $0x9e8] sm:$0xff]  ;;  %v1341_v24 = vld [vmem:[%s5127_s9 + $0x9f8] sm:$0xff]  ;;  %v4019_v33 = vpack.c.bf16 %v1340_v31, %v1284_v30  ;;  %v1613_v3 = vcombine.high %v5548_v59, %v5548_v59 }
 0x1d8   : > { %3990 = vmatprep.subr.bf16.mxu1 %v3989_v25  ;;  %2906 = vmatprep.mubr.f32.mxu0 %v1579_v26  ;;  %v4003_v25 = vpack.c.bf16 %v1226_v17, %v1170_v16  ;;  %v4005_v26 = vpack.c.bf16 %v1339_v23, %v1283_v22  ;;  %v1395_v35 = vld [vmem:[%s5127_s9 + $0xba8] sm:$0xff]  ;;  %v1286_v17 = vld [vmem:[%s5127_s9 + $0x840] sm:$0xff]  ;;  %v1344_v22 = vld [vmem:[%s5127_s9 + $0xa10] sm:$0xff] }
 0x1d9   : > { %2976 = vmatprep.mubr.f32.mxu1 %v1580_v27  ;;  %v1019_v30 = vld [vmem:[%s5125_s26 + $0x58] sm:$0xff] }
 0x1de   : > { %3980 = vmatpush1.bf16.xpose.msra.mxu0 %v3979_v36 }
 0x1df   : > { %3992 = vmatpush1.bf16.xpose.msra.mxu1 %v3991_v37  ;;  %3982 = vmatprep.subr.bf16.mxu0 %v3981_v39 }
 0x1e0   : > { %3994 = vmatprep.subr.bf16.mxu1 %v3993_v40  ;;  %v1397_v40 = vld [vmem:[%s5127_s9 + $0xbb8] sm:$0xff] }
 0x1e4   : > { %v1788_v47 = vpop.f32.mrb[0].mxu0 }
 0x1e5   : > { %v1790_v49 = vpop.f32.mrb[1].mxu0  ;;  %v1858_v50 = vpop.f32.mrb[0].mxu1 }
 0x1e6   : > { %v5488_v52 = vadd.f32 %v1858_v50, %v1788_v47  ;;  %3984 = vmatpush1.bf16.xpose.msra.mxu0 %v3983_v45  ;;  %v1860_v53 = vpop.f32.mrb[1].mxu1  ;;  %v1119_v45 = vld [vmem:[%s5127_s9 + $0x308] sm:$0xff]  ;;  %v1121_v47 = vld [vmem:[%s5127_s9 + $0x318] sm:$0xff]  ;;  %v1394_v49 = vld [vmem:[%s5127_s9 + $0xba0] sm:$0xff] }
 0x1e7   : > { %3996 = vmatpush1.bf16.xpose.msra.mxu1 %v3995_v46  ;;  %2854 = vmatprep.subr.mxu0 %v1391_v48  ;;  %v1065_v46 = vld [vmem:[%s5127_s9 + $0x158] sm:$0xff]  ;;  %v1598_v48 = vcombine.high %v1018_v42, %v1018_v42  ;;  %v1396_v50 = vld [vmem:[%s5127_s9 + $0xbb0] sm:$0xff]  ;;  %v1118_v53 = vld [vmem:[%s5127_s9 + $0x300] sm:$0xff] }
 0x1e8   : > { %2924 = vmatprep.subr.mxu1 %v1393_v51  ;;  %v4021_v51 = vpack.c.bf16 %v1119_v45, %v1063_v44  ;;  %v4033_v55 = vpack.c.bf16 %v1121_v47, %v1065_v46  ;;  %v1122_v42 = vld [vmem:[%s5127_s9 + $0x320] sm:$0xff]  ;;  %v1124_v45 = vld [vmem:[%s5127_s9 + $0x330] sm:$0xff]  ;;  %v1179_v46 = vld [vmem:[%s5127_s9 + $0x4e8] sm:$0xff] }
 0x1e9   : > { %v1235_v47 = vld [vmem:[%s5127_s9 + $0x6a8] sm:$0xff] }
 0x1ea   : > { %v4049_v54 = vpack.c.bf16 %v1235_v47, %v1179_v46  ;;  %v1182_v47 = vld [vmem:[%s5127_s9 + $0x500] sm:$0xff] }
 0x1ee   : > { %2855 = vmatpush1.xpose.msra.mxu0 %v1390_v60  ;;  %v1177_v60 = vld [vmem:[%s5127_s9 + $0x4d8] sm:$0xff] }
 0x1ef   : > { %2925 = vmatpush1.xpose.msra.mxu1 %v1392_v61  ;;  %3998 = vmatprep.subr.bf16.mxu0 %v3997_v62  ;;  %v1233_v61 = vld [vmem:[%s5127_s9 + $0x698] sm:$0xff]  ;;  %v5553_v62 = vrot.slane %v1598_v48, %v5149_v38  ;;  %v5592_v48 = vrot.slane %v1019_v30, %v5149_v38 }
 0x1f0   : > { %4010 = vmatprep.subr.bf16.mxu1 %v4009_v2  ;;  %v4037_v2 = vpack.c.bf16 %v1233_v61, %v1177_v60  ;;  %v1234_v60 = vld [vmem:[%s5127_s9 + $0x6a0] sm:$0xff]  ;;  %v1180_v61 = vld [vmem:[%s5127_s9 + $0x4f0] sm:$0xff] }
 0x1f1   : > { %2907 = vmatmul.mubr.f32.vlgmr.msra.gmra.mrb[16].mxu0 %v5461_v18  ;;  %v1285_v18 = vld [vmem:[%s5127_s9 + $0x838] sm:$0xff]  ;;  %v1614_v4 = vcombine.high %v5553_v62, %v5553_v62  ;;  %v1630_v56 = vcombine.high %v5592_v48, %v5592_v48 }
 0x1f2   : > { %4000 = vmatpush1.bf16.xpose.msra.mxu0 %v3999_v10  ;;  %2977 = vmatmul.mubr.f32.vlgmr.msra.gmra.mrb[16].mxu1 %v5466_v21  ;;  %v4015_v21 = vpack.c.bf16 %v1228_v20, %v1172_v19  ;;  %v4017_v27 = vpack.c.bf16 %v1341_v24, %v1285_v18  ;;  %v1232_v10 = vld [vmem:[%s5127_s9 + $0x690] sm:$0xff]  ;;  %v1342_v19 = vld [vmem:[%s5127_s9 + $0xa00] sm:$0xff] }
 0x1f3   : > { %4012 = vmatpush1.bf16.xpose.msra.mxu1 %v4011_v11  ;;  %4002 = vmatprep.subr.bf16.mxu0 %v4001_v12  ;;  %v1287_v11 = vld [vmem:[%s5127_s9 + $0x848] sm:$0xff]  ;;  %v1288_v20 = vld [vmem:[%s5127_s9 + $0x850] sm:$0xff]  ;;  %v4031_v23 = vpack.c.bf16 %v1342_v19, %v1286_v17  ;;  %v1405_v17 = vld [vmem:[%s5127_s9 + $0xbf8] sm:$0xff] }
 0x1f4   : > { %4014 = vmatprep.subr.bf16.mxu1 %v4013_v13  ;;  %3046 = vmatprep.mubr.f32.mxu0 %v1596_v14  ;;  %v1343_v12 = vld [vmem:[%s5127_s9 + $0xa08] sm:$0xff]  ;;  %v1345_v13 = vld [vmem:[%s5127_s9 + $0xa18] sm:$0xff]  ;;  %v4027_v14 = vpack.c.bf16 %v1230_v7, %v1174_v5  ;;  %v4043_v18 = vpack.c.bf16 %v1344_v22, %v1288_v20  ;;  %v1290_v7 = vld [vmem:[%s5127_s9 + $0x860] sm:$0xff] }
 0x1f5   : > { %3116 = vmatprep.mubr.f32.mxu1 %v1597_v15  ;;  %v4029_v15 = vpack.c.bf16 %v1343_v12, %v1287_v11  ;;  %v1348_v11 = vld [vmem:[%s5127_s9 + $0xa30] sm:$0xff]  ;;  %v1020_v20 = vld [vmem:[%s5125_s26 + $0x60] sm:$0xff] }
 0x1fa   : > { %4004 = vmatpush1.bf16.xpose.msra.mxu0 %v4003_v25  ;;  %v1399_v25 = vld [vmem:[%s5127_s9 + $0xbc8] sm:$0xff] }
 0x1fb   : > { %4016 = vmatpush1.bf16.xpose.msra.mxu1 %v4015_v21  ;;  %4006 = vmatprep.subr.bf16.mxu0 %v4005_v26 }
 0x1fc   : > { %4018 = vmatprep.subr.bf16.mxu1 %v4017_v27 }
 0x200   : > { %v1928_v34 = vpop.f32.mrb[2].mxu0 }
 0x201   : > { %v1929_v36 = vadd.f32 %v1928_v34, %v5488_v52  ;;  %v1930_v37 = vpop.f32.mrb[3].mxu0  ;;  %v1998_v39 = vpop.f32.mrb[2].mxu1  ;;  %v1062_v52 = vld [vmem:[%s5127_s9 + $0x140] sm:$0xff]  ;;  %v1069_v34 = vld [vmem:[%s5127_s9 + $0x178] sm:$0xff] }
 0x202   : > { %4008 = vmatpush1.bf16.xpose.msra.mxu0 %v4007_v32  ;;  %v2000_v41 = vpop.f32.mrb[3].mxu1  ;;  %v4023_v63 = vpack.c.bf16 %v1118_v53, %v1062_v52  ;;  %v1067_v32 = vld [vmem:[%s5127_s9 + $0x168] sm:$0xff]  ;;  %v1398_v37 = vld [vmem:[%s5127_s9 + $0xbc0] sm:$0xff] }
 0x203   : > { %v5533_v43 = vadd.f32 %v1998_v39, %v1929_v36  ;;  %4020 = vmatpush1.bf16.xpose.msra.mxu1 %v4019_v33  ;;  %2994 = vmatprep.subr.mxu0 %v1395_v35  ;;  %v1123_v33 = vld [vmem:[%s5127_s9 + $0x328] sm:$0xff]  ;;  %v1125_v35 = vld [vmem:[%s5127_s9 + $0x338] sm:$0xff]  ;;  %v1615_v36 = vcombine.high %v1019_v30, %v1019_v30  ;;  %v1400_v39 = vld [vmem:[%s5127_s9 + $0xbd0] sm:$0xff] }
 0x204   : > { %3064 = vmatprep.subr.mxu1 %v1397_v40  ;;  %v4045_v40 = vpack.c.bf16 %v1123_v33, %v1067_v32  ;;  %v1066_v41 = vld [vmem:[%s5127_s9 + $0x160] sm:$0xff]  ;;  %v4057_v44 = vpack.c.bf16 %v1125_v35, %v1069_v34  ;;  %v1128_v33 = vld [vmem:[%s5127_s9 + $0x350] sm:$0xff]  ;;  %v1183_v34 = vld [vmem:[%s5127_s9 + $0x508] sm:$0xff] }
 0x205   : > { %v4047_v52 = vpack.c.bf16 %v1122_v42, %v1066_v41  ;;  %v1126_v30 = vld [vmem:[%s5127_s9 + $0x340] sm:$0xff]  ;;  %v1239_v35 = vld [vmem:[%s5127_s9 + $0x6c8] sm:$0xff] }
 0x20a   : > { %2995 = vmatpush1.xpose.msra.mxu0 %v1394_v49  ;;  %v1181_v49 = vld [vmem:[%s5127_s9 + $0x4f8] sm:$0xff] }
 0x20b   : > { %3065 = vmatpush1.xpose.msra.mxu1 %v1396_v50  ;;  %4022 = vmatprep.subr.bf16.mxu0 %v4021_v51  ;;  %v1237_v50 = vld [vmem:[%s5127_s9 + $0x6b8] sm:$0xff]  ;;  %v5597_v51 = vrot.slane %v1615_v36, %v5149_v38  ;;  %v5636_v36 = vrot.slane %v1020_v20, %v5149_v38 }
 0x20c   : > { %4034 = vmatprep.subr.bf16.mxu1 %v4033_v55  ;;  %v4061_v55 = vpack.c.bf16 %v1237_v50, %v1181_v49  ;;  %v1238_v49 = vld [vmem:[%s5127_s9 + $0x6c0] sm:$0xff]  ;;  %v1184_v50 = vld [vmem:[%s5127_s9 + $0x510] sm:$0xff] }
 0x20d   : > { %3047 = vmatmul.mubr.f32.vlgmr.msra.gmra.mrb[18].mxu0 %v5504_v6  ;;  %v1289_v6 = vld [vmem:[%s5127_s9 + $0x858] sm:$0xff]  ;;  %v1631_v57 = vcombine.high %v5597_v51, %v5597_v51 }
 0x20e   : > { %4024 = vmatpush1.bf16.xpose.msra.mxu0 %v4023_v63  ;;  %3117 = vmatmul.mubr.f32.vlgmr.msra.gmra.mrb[18].mxu1 %v5509_v9  ;;  %v4039_v9 = vpack.c.bf16 %v1232_v10, %v1176_v8  ;;  %v4041_v16 = vpack.c.bf16 %v1345_v13, %v1289_v6  ;;  %v1236_v63 = vld [vmem:[%s5127_s9 + $0x6b0] sm:$0xff]  ;;  %v1346_v8 = vld [vmem:[%s5127_s9 + $0xa20] sm:$0xff] }
 0x20f   : > { %4036 = vmatpush1.bf16.xpose.msra.mxu1 %v4035_v0  ;;  %4026 = vmatprep.subr.bf16.mxu0 %v4025_v1  ;;  %v1291_v0 = vld [vmem:[%s5127_s9 + $0x868] sm:$0xff]  ;;  %v1292_v10 = vld [vmem:[%s5127_s9 + $0x870] sm:$0xff]  ;;  %v4055_v12 = vpack.c.bf16 %v1346_v8, %v1290_v7  ;;  %v1409_v7 = vld [vmem:[%s5127_s9 + $0xc18] sm:$0xff] }
 0x210   : > { %4038 = vmatprep.subr.bf16.mxu1 %v4037_v2  ;;  %3186 = vmatprep.mubr.f32.mxu0 %v1613_v3  ;;  %v1347_v1 = vld [vmem:[%s5127_s9 + $0xa28] sm:$0xff]  ;;  %v1349_v2 = vld [vmem:[%s5127_s9 + $0xa38] sm:$0xff]  ;;  %v4051_v3 = vpack.c.bf16 %v1234_v60, %v1178_v58  ;;  %v4067_v6 = vpack.c.bf16 %v1348_v11, %v1292_v10  ;;  %v1294_v60 = vld [vmem:[%s5127_s9 + $0x880] sm:$0xff] }
 0x211   : > { %3256 = vmatprep.mubr.f32.mxu1 %v1614_v4  ;;  %v4053_v4 = vpack.c.bf16 %v1347_v1, %v1291_v0  ;;  %v1352_v0 = vld [vmem:[%s5127_s9 + $0xa50] sm:$0xff]  ;;  %v1021_v10 = vld [vmem:[%s5125_s26 + $0x68] sm:$0xff] }
 0x216   : > { %4028 = vmatpush1.bf16.xpose.msra.mxu0 %v4027_v14  ;;  %v1403_v14 = vld [vmem:[%s5127_s9 + $0xbe8] sm:$0xff] }
 0x217   : > { %4040 = vmatpush1.bf16.xpose.msra.mxu1 %v4039_v9  ;;  %4030 = vmatprep.subr.bf16.mxu0 %v4029_v15 }
 0x218   : > { %4042 = vmatprep.subr.bf16.mxu1 %v4041_v16 }
 0x21c   : > { %v2068_v24 = vpop.f32.mrb[4].mxu0 }
 0x21d   : > { %v2069_v21 = vadd.f32 %v2068_v24, %v5533_v43  ;;  %v2070_v26 = vpop.f32.mrb[5].mxu0  ;;  %v2138_v27 = vpop.f32.mrb[4].mxu1  ;;  %v1068_v43 = vld [vmem:[%s5127_s9 + $0x170] sm:$0xff]  ;;  %v1073_v24 = vld [vmem:[%s5127_s9 + $0x198] sm:$0xff] }
 0x21e   : > { %4032 = vmatpush1.bf16.xpose.msra.mxu0 %v4031_v23  ;;  %v2140_v29 = vpop.f32.mrb[5].mxu1  ;;  %v4059_v53 = vpack.c.bf16 %v1124_v45, %v1068_v43  ;;  %v1071_v23 = vld [vmem:[%s5127_s9 + $0x188] sm:$0xff]  ;;  %v1402_v26 = vld [vmem:[%s5127_s9 + $0xbe0] sm:$0xff]  ;;  %v4073_v43 = vpack.c.bf16 %v1239_v35, %v1183_v34  ;;  %v1647_v45 = vcombine.high %v5636_v36, %v5636_v36 }
 0x21f   : > { %v5577_v31 = vadd.f32 %v2138_v27, %v2069_v21  ;;  %4044 = vmatpush1.bf16.xpose.msra.mxu1 %v4043_v18  ;;  %3134 = vmatprep.subr.mxu0 %v1399_v25  ;;  %v1127_v18 = vld [vmem:[%s5127_s9 + $0x348] sm:$0xff]  ;;  %v1129_v25 = vld [vmem:[%s5127_s9 + $0x358] sm:$0xff]  ;;  %v1632_v21 = vcombine.high %v1020_v20, %v1020_v20  ;;  %v1404_v27 = vld [vmem:[%s5127_s9 + $0xbf0] sm:$0xff] }
 0x220   : > { %3204 = vmatprep.subr.mxu1 %v1401_v28  ;;  %v4069_v28 = vpack.c.bf16 %v1127_v18, %v1071_v23  ;;  %v1070_v29 = vld [vmem:[%s5127_s9 + $0x180] sm:$0xff]  ;;  %v4081_v32 = vpack.c.bf16 %v1129_v25, %v1073_v24  ;;  %v1132_v18 = vld [vmem:[%s5127_s9 + $0x370] sm:$0xff]  ;;  %v1187_v24 = vld [vmem:[%s5127_s9 + $0x528] sm:$0xff] }
 0x221   : > { %v4071_v41 = vpack.c.bf16 %v1126_v30, %v1070_v29  ;;  %v1130_v20 = vld [vmem:[%s5127_s9 + $0x360] sm:$0xff]  ;;  %v1243_v25 = vld [vmem:[%s5127_s9 + $0x6e8] sm:$0xff] }
 0x222   : > { %v1186_v34 = vld [vmem:[%s5127_s9 + $0x520] sm:$0xff] }
 0x223   : > { %v1242_v35 = vld [vmem:[%s5127_s9 + $0x6e0] sm:$0xff] }
 0x226   : > { %3135 = vmatpush1.xpose.msra.mxu0 %v1398_v37  ;;  %v1185_v37 = vld [vmem:[%s5127_s9 + $0x518] sm:$0xff] }
 0x227   : > { %3205 = vmatpush1.xpose.msra.mxu1 %v1400_v39  ;;  %4046 = vmatprep.subr.bf16.mxu0 %v4045_v40  ;;  %v1241_v39 = vld [vmem:[%s5127_s9 + $0x6d8] sm:$0xff]  ;;  %v5641_v40 = vrot.slane %v1632_v21, %v5149_v38  ;;  %v1656_v21 = vrot.slane %v1021_v10, %v5149_v38 }
 0x228   : > { %4058 = vmatprep.subr.bf16.mxu1 %v4057_v44  ;;  %v4085_v44 = vpack.c.bf16 %v1241_v39, %v1185_v37  ;;  %v1188_v37 = vld [vmem:[%s5127_s9 + $0x530] sm:$0xff] }
 0x229   : > { %3187 = vmatmul.mubr.f32.vlgmr.msra.gmra.mrb[20].mxu0 %v5548_v59  ;;  %v1293_v59 = vld [vmem:[%s5127_s9 + $0x878] sm:$0xff]  ;;  %v1648_v46 = vcombine.high %v5641_v40, %v5641_v40  ;;  %v1244_v39 = vld [vmem:[%s5127_s9 + $0x6f0] sm:$0xff] }
 0x22a   : > { %4048 = vmatpush1.bf16.xpose.msra.mxu0 %v4047_v52  ;;  %3257 = vmatmul.mubr.f32.vlgmr.msra.gmra.mrb[20].mxu1 %v5553_v62  ;;  %v4063_v62 = vpack.c.bf16 %v1236_v63, %v1180_v61  ;;  %v4065_v5 = vpack.c.bf16 %v1349_v2, %v1293_v59  ;;  %v1240_v52 = vld [vmem:[%s5127_s9 + $0x6d0] sm:$0xff]  ;;  %v1350_v61 = vld [vmem:[%s5127_s9 + $0xa40] sm:$0xff] }
 0x22b   : > { %4060 = vmatpush1.bf16.xpose.msra.mxu1 %v4059_v53  ;;  %4050 = vmatprep.subr.bf16.mxu0 %v4049_v54  ;;  %v1295_v53 = vld [vmem:[%s5127_s9 + $0x888] sm:$0xff]  ;;  %v1296_v63 = vld [vmem:[%s5127_s9 + $0x890] sm:$0xff]  ;;  %v4079_v1 = vpack.c.bf16 %v1350_v61, %v1294_v60 }
 0x22c   : > { %4062 = vmatprep.subr.bf16.mxu1 %v4061_v55  ;;  %3326 = vmatprep.mubr.f32.mxu0 %v1630_v56  ;;  %v1351_v54 = vld [vmem:[%s5127_s9 + $0xa48] sm:$0xff]  ;;  %v1353_v55 = vld [vmem:[%s5127_s9 + $0xa58] sm:$0xff]  ;;  %v4075_v56 = vpack.c.bf16 %v1238_v49, %v1182_v47  ;;  %v4091_v59 = vpack.c.bf16 %v1352_v0, %v1296_v63  ;;  %v1298_v47 = vld [vmem:[%s5127_s9 + $0x8a0] sm:$0xff] }
 0x22d   : > { %3396 = vmatprep.mubr.f32.mxu1 %v1631_v57  ;;  %v4077_v57 = vpack.c.bf16 %v1351_v54, %v1295_v53  ;;  %v1354_v49 = vld [vmem:[%s5127_s9 + $0xa60] sm:$0xff]  ;;  %v1412_v0 = vld [vmem:[%s5127_s9 + $0xc30] sm:$0xff] }
 0x22e   : > { %v4103_v53 = vpack.c.bf16 %v1354_v49, %v1298_v47  ;;  %v1410_v63 = vld [vmem:[%s5127_s9 + $0xc20] sm:$0xff] }
 0x232   : > { %4052 = vmatpush1.bf16.xpose.msra.mxu0 %v4051_v3  ;;  %v1407_v3 = vld [vmem:[%s5127_s9 + $0xc08] sm:$0xff] }
 0x233   : > { %4064 = vmatpush1.bf16.xpose.msra.mxu1 %v4063_v62  ;;  %4054 = vmatprep.subr.bf16.mxu0 %v4053_v4 }
 0x234   : > { %4066 = vmatprep.subr.bf16.mxu1 %v4065_v5 }
 0x238   : > { %v2208_v13 = vpop.f32.mrb[6].mxu0 }
 0x239   : > { %v2209_v9 = vadd.f32 %v2208_v13, %v5577_v31  ;;  %v2210_v15 = vpop.f32.mrb[7].mxu0  ;;  %v2278_v16 = vpop.f32.mrb[6].mxu1  ;;  %v1072_v31 = vld [vmem:[%s5127_s9 + $0x190] sm:$0xff]  ;;  %v1077_v13 = vld [vmem:[%s5127_s9 + $0x1b8] sm:$0xff] }
 0x23a   : > { %4056 = vmatpush1.bf16.xpose.msra.mxu0 %v4055_v12  ;;  %v2280_v19 = vpop.f32.mrb[7].mxu1  ;;  %v4083_v42 = vpack.c.bf16 %v1128_v33, %v1072_v31  ;;  %v1075_v12 = vld [vmem:[%s5127_s9 + $0x1a8] sm:$0xff]  ;;  %v1406_v15 = vld [vmem:[%s5127_s9 + $0xc00] sm:$0xff]  ;;  %v4097_v31 = vpack.c.bf16 %v1243_v25, %v1187_v24  ;;  %v1664_v33 = vcombine.high %v1656_v21, %v1656_v21 }
 0x23b   : > { %v5621_v22 = vadd.f32 %v2278_v16, %v2209_v9  ;;  %4068 = vmatpush1.bf16.xpose.msra.mxu1 %v4067_v6  ;;  %3274 = vmatprep.subr.mxu0 %v1403_v14  ;;  %v1131_v6 = vld [vmem:[%s5127_s9 + $0x368] sm:$0xff]  ;;  %v1133_v14 = vld [vmem:[%s5127_s9 + $0x378] sm:$0xff]  ;;  %v1649_v9 = vcombine.high %v1021_v10, %v1021_v10  ;;  %v1408_v16 = vld [vmem:[%s5127_s9 + $0xc10] sm:$0xff] }
 0x23c   : > { %3344 = vmatprep.subr.mxu1 %v1405_v17  ;;  %v4093_v17 = vpack.c.bf16 %v1131_v6, %v1075_v12  ;;  %v1074_v19 = vld [vmem:[%s5127_s9 + $0x1a0] sm:$0xff]  ;;  %v4105_v23 = vpack.c.bf16 %v1133_v14, %v1077_v13 }
 0x23d   : > { %v4095_v29 = vpack.c.bf16 %v1130_v20, %v1074_v19 }
 0x242   : > { %3275 = vmatpush1.xpose.msra.mxu0 %v1402_v26  ;;  %v1189_v26 = vld [vmem:[%s5127_s9 + $0x538] sm:$0xff] }
 0x243   : > { %3345 = vmatpush1.xpose.msra.mxu1 %v1404_v27  ;;  %4070 = vmatprep.subr.bf16.mxu0 %v4069_v28  ;;  %v1245_v27 = vld [vmem:[%s5127_s9 + $0x6f8] sm:$0xff]  ;;  %v1663_v28 = vrot.slane %v1649_v9, %v5149_v38 }
 0x244   : > { %4082 = vmatprep.subr.bf16.mxu1 %v4081_v32  ;;  %v4109_v32 = vpack.c.bf16 %v1245_v27, %v1189_v26 }
 0x245   : > { %3327 = vmatmul.mubr.f32.vlgmr.msra.gmra.mrb[22].mxu0 %v5592_v48  ;;  %v1297_v48 = vld [vmem:[%s5127_s9 + $0x898] sm:$0xff]  ;;  %v1665_v38 = vcombine.high %v1663_v28, %v1663_v28 }
 0x246   : > { %4072 = vmatpush1.bf16.xpose.msra.mxu0 %v4071_v41  ;;  %3397 = vmatmul.mubr.f32.vlgmr.msra.gmra.mrb[22].mxu1 %v5597_v51  ;;  %v4087_v51 = vpack.c.bf16 %v1240_v52, %v1184_v50  ;;  %v4089_v58 = vpack.c.bf16 %v1353_v55, %v1297_v48  ;;  %v1299_v41 = vld [vmem:[%s5127_s9 + $0x8a8] sm:$0xff]  ;;  %v1300_v50 = vld [vmem:[%s5127_s9 + $0x8b0] sm:$0xff] }
 0x247   : > { %4084 = vmatpush1.bf16.xpose.msra.mxu1 %v4083_v42  ;;  %4074 = vmatprep.subr.bf16.mxu0 %v4073_v43  ;;  %v1355_v42 = vld [vmem:[%s5127_s9 + $0xa68] sm:$0xff]  ;;  %v1301_v43 = vld [vmem:[%s5127_s9 + $0x8b8] sm:$0xff]  ;;  %v1356_v52 = vld [vmem:[%s5127_s9 + $0xa70] sm:$0xff] }
 0x248   : > { %4086 = vmatprep.subr.bf16.mxu1 %v4085_v44  ;;  %3466 = vmatprep.mubr.f32.mxu0 %v1647_v45  ;;  %v4099_v44 = vpack.c.bf16 %v1242_v35, %v1186_v34  ;;  %v4101_v45 = vpack.c.bf16 %v1355_v42, %v1299_v41  ;;  %v4115_v54 = vpack.c.bf16 %v1356_v52, %v1300_v50  ;;  %v1411_v55 = vld [vmem:[%s5127_s9 + $0xc28] sm:$0xff] }
 0x249   : > { %3536 = vmatprep.mubr.f32.mxu1 %v1648_v46 }
 0x24e   : > { %4076 = vmatpush1.bf16.xpose.msra.mxu0 %v4075_v56 }
 0x24f   : > { %4088 = vmatpush1.bf16.xpose.msra.mxu1 %v4087_v51  ;;  %4078 = vmatprep.subr.bf16.mxu0 %v4077_v57 }
 0x250   : > { %4090 = vmatprep.subr.bf16.mxu1 %v4089_v58  ;;  %v1413_v58 = vld [vmem:[%s5127_s9 + $0xc38] sm:$0xff] }
 0x254   : > { %v2348_v2 = vpop.f32.mrb[8].mxu0 }
 0x255   : > { %v2349_v62 = vadd.f32 %v2348_v2, %v5621_v22  ;;  %v2350_v4 = vpop.f32.mrb[9].mxu0  ;;  %v2418_v5 = vpop.f32.mrb[8].mxu1  ;;  %v1076_v22 = vld [vmem:[%s5127_s9 + $0x1b0] sm:$0xff] }
 0x256   : > { %4080 = vmatpush1.bf16.xpose.msra.mxu0 %v4079_v1  ;;  %v2420_v8 = vpop.f32.mrb[9].mxu1  ;;  %v4107_v30 = vpack.c.bf16 %v1132_v18, %v1076_v22 }
 0x257   : > { %v5665_v11 = vadd.f32 %v2418_v5, %v2349_v62  ;;  %4092 = vmatpush1.bf16.xpose.msra.mxu1 %v4091_v59  ;;  %3414 = vmatprep.subr.mxu0 %v1407_v3 }
 0x258   : > { %3484 = vmatprep.subr.mxu1 %v1409_v7 }
 0x25e   : > { %3415 = vmatpush1.xpose.msra.mxu0 %v1406_v15 }
 0x25f   : > { %3485 = vmatpush1.xpose.msra.mxu1 %v1408_v16  ;;  %4094 = vmatprep.subr.bf16.mxu0 %v4093_v17 }
 0x260   : > { %4106 = vmatprep.subr.bf16.mxu1 %v4105_v23 }
 0x261   : > { %3467 = vmatmul.mubr.f32.vlgmr.msra.gmra.mrb[24].mxu0 %v5636_v36  ;;  %v1357_v36 = vld [vmem:[%s5127_s9 + $0xa78] sm:$0xff] }
 0x262   : > { %4096 = vmatpush1.bf16.xpose.msra.mxu0 %v4095_v29  ;;  %3537 = vmatmul.mubr.f32.vlgmr.msra.gmra.mrb[24].mxu1 %v5641_v40  ;;  %v4111_v40 = vpack.c.bf16 %v1244_v39, %v1188_v37  ;;  %v4113_v46 = vpack.c.bf16 %v1357_v36, %v1301_v43 }
 0x263   : > { %4108 = vmatpush1.bf16.xpose.msra.mxu1 %v4107_v30  ;;  %4098 = vmatprep.subr.bf16.mxu0 %v4097_v31 }
 0x264   : > { %4110 = vmatprep.subr.bf16.mxu1 %v4109_v32  ;;  %3606 = vmatprep.mubr.f32.mxu0 %v1664_v33 }
 0x265   : > { %3676 = vmatprep.mubr.f32.mxu1 %v1665_v38 }
 0x26a   : > { %4100 = vmatpush1.bf16.xpose.msra.mxu0 %v4099_v44 }
 0x26b   : > { %4112 = vmatpush1.bf16.xpose.msra.mxu1 %v4111_v40  ;;  %4102 = vmatprep.subr.bf16.mxu0 %v4101_v45  ;;  %v1007_v45 = vld [vmem:[%s5120_s21] sm:$0x3] }
 0x26c   : > { %4114 = vmatprep.subr.bf16.mxu1 %v4113_v46 }
 0x270   : > { %v2488_v48 = vpop.f32.mrb[10].mxu0 }
 0x271   : > { %v2489_v56 = vadd.f32 %v2488_v48, %v5665_v11  ;;  %v2490_v51 = vpop.f32.mrb[11].mxu0  ;;  %v2558_v57 = vpop.f32.mrb[10].mxu1 }
 0x272   : > { %4104 = vmatpush1.bf16.xpose.msra.mxu0 %v4103_v53  ;;  %v2560_v60 = vpop.f32.mrb[11].mxu1 }
 0x273   : > { %v2559_v61 = vadd.f32 %v2558_v57, %v2489_v56  ;;  %4116 = vmatpush1.bf16.xpose.msra.mxu1 %v4115_v54  ;;  %3554 = vmatprep.subr.mxu0 %v1411_v55 }
 0x274   : > { %3624 = vmatprep.subr.mxu1 %v1413_v58 }
 0x27a   : > { %3555 = vmatpush1.xpose.msra.mxu0 %v1410_v63 }
 0x27b   : > { %3625 = vmatpush1.xpose.msra.mxu1 %v1412_v0 }
 0x27d   : > { %3607 = vmatmul.mubr.f32.vlgmr.msra.gmra.mrb[26].mxu0 %v1656_v21 }
 0x27e   : > { %3677 = vmatmul.mubr.f32.vlgmr.msra.gmra.mrb[26].mxu1 %v1663_v28 }
 0x28c   : > { %v2628_v1 = vpop.f32.mrb[12].mxu0 }
 0x28d   : > { %v2629_v59 = vadd.f32 %v2628_v1, %v2559_v61  ;;  %v2630_v2 = vpop.f32.mrb[13].mxu0  ;;  %v2698_v3 = vpop.f32.mrb[12].mxu1 }
 0x28e   : > { %v2700_v62 = vpop.f32.mrb[13].mxu1 }
 0x28f   : > { %v2699_v4 = vadd.f32 %v2698_v3, %v2629_v59 }
 0x2a8   : > { %v2768_v5 = vpop.f32.mrb[14].mxu0 }
 0x2a9   : > { %v2769_v7 = vadd.f32 %v2768_v5, %v2699_v4  ;;  %v2770_v8 = vpop.f32.mrb[15].mxu0  ;;  %v2838_v10 = vpop.f32.mrb[14].mxu1 }
 0x2aa   : > { %v2840_v11 = vpop.f32.mrb[15].mxu1 }
 0x2ab   : > { %v2839_v12 = vadd.f32 %v2838_v10, %v2769_v7 }
 0x2c4   : > { %v2908_v6 = vpop.f32.mrb[16].mxu0 }
 0x2c5   : > { %v2909_v13 = vadd.f32 %v2908_v6, %v2839_v12  ;;  %v2910_v14 = vpop.f32.mrb[17].mxu0  ;;  %v2978_v9 = vpop.f32.mrb[16].mxu1 }
 0x2c6   : > { %v2980_v15 = vpop.f32.mrb[17].mxu1 }
 0x2c7   : > { %v2979_v16 = vadd.f32 %v2978_v9, %v2909_v13 }
 0x2e0   : > { %v3048_v17 = vpop.f32.mrb[18].mxu0 }
 0x2e1   : > { %v3049_v19 = vadd.f32 %v3048_v17, %v2979_v16  ;;  %v3050_v20 = vpop.f32.mrb[19].mxu0  ;;  %v3118_v22 = vpop.f32.mrb[18].mxu1 }
 0x2e2   : > { %v3120_v23 = vpop.f32.mrb[19].mxu1 }
 0x2e3   : > { %v3119_v18 = vadd.f32 %v3118_v22, %v3049_v19 }
 0x2fc   : > { %v3188_v24 = vpop.f32.mrb[20].mxu0 }
 0x2fd   : > { %v3189_v25 = vadd.f32 %v3188_v24, %v3119_v18  ;;  %v3190_v21 = vpop.f32.mrb[21].mxu0  ;;  %v3258_v26 = vpop.f32.mrb[20].mxu1 }
 0x2fe   : > { %v3260_v27 = vpop.f32.mrb[21].mxu1 }
 0x2ff   : > { %v3259_v28 = vadd.f32 %v3258_v26, %v3189_v25 }
 0x318   : > { %v3328_v29 = vpop.f32.mrb[22].mxu0 }
 0x319   : > { %v3329_v30 = vadd.f32 %v3328_v29, %v3259_v28  ;;  %v3330_v31 = vpop.f32.mrb[23].mxu0  ;;  %v3398_v32 = vpop.f32.mrb[22].mxu1 }
 0x31a   : > { %v3400_v33 = vpop.f32.mrb[23].mxu1 }
 0x31b   : > { %v3399_v38 = vadd.f32 %v3398_v32, %v3329_v30 }
 0x334   : > { %v3468_v34 = vpop.f32.mrb[24].mxu0 }
 0x335   : > { %v3469_v35 = vadd.f32 %v3468_v34, %v3399_v38  ;;  %v3470_v37 = vpop.f32.mrb[25].mxu0  ;;  %v3538_v39 = vpop.f32.mrb[24].mxu1 }
 0x336   : > { %v3540_v41 = vpop.f32.mrb[25].mxu1 }
 0x337   : > { %v3539_v42 = vadd.f32 %v3538_v39, %v3469_v35 }
 0x350   : > { %v3608_v43 = vpop.f32.mrb[26].mxu0 }
 0x351   : > { %v3609_v36 = vadd.f32 %v3608_v43, %v3539_v42  ;;  %v3610_v44 = vpop.f32.mrb[27].mxu0  ;;  %v3678_v40 = vpop.f32.mrb[26].mxu1 }
 0x352   : > { %v3680_v46 = vpop.f32.mrb[27].mxu1 }
 0x353   : > { %v3679_v47 = vadd.f32 %v3678_v40, %v3609_v36 }
 0x355   : > { %v3682_v49 = vadd.f32 %v3679_v47, %v1007_v45 }
 0x357   : > { %3684 = vst.msk [vmem:[%s5120_s21] sm:$0x3] %vm3683_vm1, %v3682_v49 }
 0x358 PF: > { %s12_s15 = sadd.s32 1, %s4245_s15   ;;  %s5728_s9 = smov %s4225_s10 }
 0x359   : > { %p9_p13 = scmp.ge.s32.totalorder %s12_s15, 16   ;;  %s5729_s10 = smov %s4315_s24 }
 0x35a   : > { %s5730_s11 = smov %s4237_s13  ;;  %s5731_s12 = smov %s4241_s14 }
 0x35b   : > { %s5732_s13 = smov %s5735_s16  ;;  %s5733_s14 = smov %s5739_s17 }
 0x35c   :  { %11 = sbr.rel (!%p9_p13) target bundleno = 4 (0x4), region = 93 }

// kernel: cnn_forward.7
= control target key start
LH: loop header
LB: loop body
LE: loop exit
PB: predicated region body
PF: predicated region fallthrough
CT: control target
= control target key end

     0   :  { %vm39_vm0 = vcmask 457728   ;;  %v171_v1 = vmov 0.0   ;;  %vm172_vm1 = vmmov 0   ;;  %s226_s0 = inlined_call_operand.vmem [shape: f32[2,2,56], index: 0, kind: input, shape index: {}]   ;;  %s227_s1 = inlined_call_operand.vmem [shape: f32[1,56], index: 1, kind: input, shape index: {}]   ;;  %s228_s2 = inlined_call_operand.vmem [shape: f32[4,56], index: 2, kind: input, shape index: {}]   ;;  %s229_s3 = inlined_call_operand.vmem [shape: f32[1,4], index: 3, kind: input, shape index: {}]   ;;  %s230_s4 = inlined_call_operand.hbm [shape: f32[2,4], index: 4, kind: output, shape index: {}]  }
   0x1   :  { %v31_v0 = vld [vmem:[%s228_s2] sm:$0xf]  ;;  %139 = vmatprep.subr.mxu0 %v171_v1  ;;  %141 = vmatprep.mubr.msk.f32.mxu0 %vm172_vm1, %v171_v1 }
   0x2   :  { %v18_v2 = vld [vmem:[%s226_s0] sm:$0x3]  ;;  %v132_v3 = vld [vmem:[%s226_s0 + $0x2] sm:$0x3]  ;;  %140 = vmatpush3.xpose.msk.msra.mxu0 %vm39_vm0, %v31_v0 }
   0x3   :  { %v133_v4 = vld [vmem:[%s227_s1] ss:$0 sm:$0xff]  ;;  %v21_v5 = vadd.f32 %v132_v3, %v18_v2 }
   0x4   :  { %9 = vsyncpa [#allocation3], 0  ;;  %v134_v8 = vld [vmem:[%s229_s3] ss:$0 sm:$0xff]  ;;  %s173_s24 = smov [#allocation2]   ;;  %vm116_vm2 = vcmask 25600  }
   0x5   :  { %v29_v6 = vadd.f32 %v133_v4, %v21_v5  ;;  %s124_s25 = sshll.u32 %s173_s24, 4  ;;  %s125_s25 = int_to_ptr.vmem [resolvable:$true] %s124_s25 }
   0x6   :  { %s147_s0 = scalar_lea.vmem %s125_s25, 32  ;;  %p152_p1 = scmp.lt.s32.totalorder %s125_s25, %s125_s25 }
   0x7   :  { %v30_v7 = vmax.f32 %v29_v6, 0.0  ;;  %p148_p0 = scmp.ne.s32.totalorder %s125_s25, %s147_s0  ;;  %p153_p2 = scmp.lt.s32.totalorder %s147_s0, %s147_s0 }
   0x9   :  { %142 = vmatmul.mubr.msk.f32.vlgmr.msra.gmra.mrb[0].mxu0 %vm39_vm0, %v30_v7  ;;  %p154_p3 = por %p153_p2, %p152_p1 }
   0xb   :  { %p155_p4 = pnand %p154_p3, %p148_p0 }
  0xdc   :  { %v112_v9 = vpop.f32.mrb[0].mxu0 }
  0xdd   :  { %v113_v10 = vadd.f32 %v134_v8, %v112_v9  ;;  %v143_v11 = vpop.f32.mrb[1].mxu0 }
  0xdf   :  { %117 = vst.msk [vmem:[#allocation2] sm:$0x3] %vm116_vm2, %v113_v10 }
  0xe0   :  { %158 = shalt.err (!%p155_p4)
}
  0xe1   :  { %s159_s27 = scalar_lea.hbm %s230_s4, 32 }
  0xe2   :  { %p160_p5 = scmp.ne.s32.totalorder %s230_s4, %s159_s27  ;;  %p163_p6 = scmp.lt.u32.totalorder %s159_s27, %s230_s4 }
  0xe4   :  { %p165_p7 = pnand %p163_p6, %p160_p5 }
  0xe6   :  { %168 = shalt.err (!%p165_p7)
}
  0xe7   :  { %127 = dma.vmem_to_hbm [thread:$0]  %s125_s25, 32, %s230_s4, [#allocation3]  }
  0xe8   :  { %169 = dma.done.wait [#allocation3], 32  }
  0xe9   :  { %170 = vsyncadd [#allocation3], 4294967264 }
  0xea   :  { %131 = vsyncpa [#allocation3], 1 }

</bundles_post_ra>
